<compile_context>
chip_gen: v7x
topology: tpu7x:2x2x1
jax: 0.10.0
libtpu: 0.0.40
codegen_flags: <defaults>
</compile_context>

<pallas_src>
import functools

import jax
import jax.numpy as jnp
from jax.experimental import pallas as pl
from jax.experimental.pallas import tpu as pltpu

EPS = 1e-5
MM_PREC = jax.lax.Precision.HIGHEST


def _gn_swish(x, A, gamma, beta):
    """GroupNorm (single-pass stats, biased var, eps=1e-5) + Swish on [C, HW].

    A: constant [C, C] block-diagonal group-averaging matrix
       (A[i, j] = 1/(Cg*HW) iff channels i, j share a group), so the per-group
       combine runs on the (otherwise idle) MXU.  gamma/beta: [C, 1]."""
    s = jnp.sum(x, axis=-1, keepdims=True)                 # [C,1] lane reduce
    sq = jnp.sum(x * x, axis=-1, keepdims=True)            # [C,1] lane reduce
    mean = jnp.dot(A, s, preferred_element_type=jnp.float32,
                   precision=MM_PREC)                      # [C,1] per-group mean
    ex2 = jnp.dot(A, sq, preferred_element_type=jnp.float32,
                  precision=MM_PREC)                       # [C,1] per-group E[x^2]
    var = ex2 - mean * mean
    scale = jax.lax.rsqrt(var + EPS) * gamma               # [C,1]
    shift = beta - mean * scale                            # [C,1]
    y = x * scale + shift
    return y * jax.nn.sigmoid(y)


def _conv3x3(h, w_ref, masks, bias, W):
    """3x3 SAME conv on a [Cin, HW] tile as 9 per-tap matmuls (no [9*Cin, HW]
    patch materialized).  w_ref: [9, Cout, Cin] (tap k = dy*3 + dx),
    masks: [9, HW] precomputed boundary-validity masks, bias: [Cout, 1]."""
    HW = h.shape[1]
    acc = None
    for k in range(9):
        oy, ox = k // 3 - 1, k % 3 - 1
        off = oy * W + ox
        if off == 0:
            tap = h
        else:
            # shifted[p] = h[p + off]; wrapped / out-of-image entries zeroed.
            tap = pltpu.roll(h, shift=(-off) % HW, axis=1) * masks[k:k + 1, :]
        p = jnp.dot(w_ref[k], tap, preferred_element_type=jnp.float32,
                    precision=MM_PREC)
        acc = p if acc is None else acc + p
    return acc + bias


def _residual_block_kernel(W, Cin, Cout, Bblk,
                           x_ref, temb_ref, masks_ref, A1_ref, A2_ref,
                           w1_ref, w2_ref, wsk_ref, pp_ref,
                           out_ref):
    # Packed per-channel params [Cmax, 8] columns:
    #   0 gn1_w  1 gn1_b  2 b1  3 gn2_w  4 gn2_b  5 b2  6 bskip  7 pad
    pp = pp_ref[...]
    g1, be1 = pp[0:Cin, 0:1], pp[0:Cin, 1:2]
    b1 = pp[0:Cout, 2:3]
    g2, be2 = pp[0:Cout, 3:4], pp[0:Cout, 4:5]
    b2 = pp[0:Cout, 5:6]
    bsk = pp[0:Cout, 6:7]

    A1 = A1_ref[...]
    A2 = A2_ref[...]
    wsk = wsk_ref[...]
    masks = masks_ref[...]                                 # [9, HW]

    for i in range(Bblk):                                  # static, small
        x = x_ref[i]                                       # [Cin, HW]

        # ---- norm1 + swish, conv1 ----
        h = _gn_swish(x, A1, g1, be1)
        h = _conv3x3(h, w1_ref, masks, b1, W)              # [Cout, HW]

        # ---- + time embedding (Linear hoisted to wrapper), spatial bcast ----
        h = h + temb_ref[i]                                # [Cout, 1] bcast

        # ---- norm2 + swish (dropout is identity in eval mode) ----
        # TODO(synk): training-mode Dropout(p=0.1) not implemented (eval semantics).
        h = _gn_swish(h, A2, g2, be2)

        # ---- conv2 ----
        h = _conv3x3(h, w2_ref, masks, b2, W)              # [Cout, HW]

        # ---- skip path: 1x1 conv on the original input ----
        skip = jnp.dot(wsk, x, preferred_element_type=jnp.float32,
                       precision=MM_PREC) + bsk            # [Cout, HW]

        out_ref[i] = h + skip


def residual_block_pallas(x_nchw, t, params, n_groups, samples_per_step=None):
    """x_nchw: [B, Cin, H, W], t: [B, Tc].  Returns [B, Cout, H, W]."""
    B, Cin, H, W = x_nchw.shape
    HW = H * W
    Cout = params["b1"].shape[0]
    Cmax = max(Cin, Cout)

    if samples_per_step is None:
        # Keep >= 2 grid steps (both v7x TCs busy); amortize per-step overhead
        # on single-TC v5e/v6e when B is larger.
        samples_per_step = max(1, B // 2) if B % 2 == 0 else 1
    Bblk = samples_per_step
    assert B % Bblk == 0, (B, Bblk)

    # Free reshape (no HBM transpose): channels on sublanes, spatial on lanes.
    x3 = x_nchw.reshape(B, Cin, HW).astype(jnp.float32)

    # Hoisted time-embedding Linear: swish(t) @ wt + bt -> [B, Cout, 1]
    t32 = t.astype(jnp.float32)
    temb = jnp.dot(t32 * jax.nn.sigmoid(t32), params["wt"].astype(jnp.float32),
                   precision=MM_PREC) + params["bt"].astype(jnp.float32)
    temb = temb.reshape(B, Cout, 1)

    # Hoisted 3x3 boundary-validity masks: [9, HW], tap k = dy*3 + dx.
    pos = jnp.arange(HW)
    yy, xx = pos // W, pos % W
    mrows = []
    for k in range(9):
        oy, ox = k // 3 - 1, k % 3 - 1
        valid = ((yy + oy >= 0) & (yy + oy < H) &
                 (xx + ox >= 0) & (xx + ox < W))
        mrows.append(valid)
    masks = jnp.stack(mrows, axis=0).astype(jnp.float32)       # [9, HW]

    # Block-diagonal group-averaging matrices (mean_col = A @ row_sums).
    def group_avg(C):
        Cg = C // n_groups
        idx = jnp.arange(C)
        same = (idx[:, None] // Cg) == (idx[None, :] // Cg)
        return same.astype(jnp.float32) / float(Cg * HW)
    A1, A2 = group_avg(Cin), group_avg(Cout)

    # Conv weights as [9, Cout, Cin]: index k = dy*3 + dx (matches tap order).
    w1 = jnp.transpose(params["w1_oihw"].astype(jnp.float32),
                       (2, 3, 0, 1)).reshape(9, Cout, Cin)
    w2 = jnp.transpose(params["w2_oihw"].astype(jnp.float32),
                       (2, 3, 0, 1)).reshape(9, Cout, Cout)

    if "wskip_oi" in params:
        wsk = params["wskip_oi"].astype(jnp.float32)           # [Cout, Cin]
        bsk = params["bskip"].astype(jnp.float32)
    else:  # in_channels == out_channels -> nn.Identity skip
        wsk = jnp.eye(Cout, Cin, dtype=jnp.float32)
        bsk = jnp.zeros((Cout,), jnp.float32)

    # Coalesce the seven tiny per-channel params into one [Cmax, 8] slab.
    def padc(v):
        v = v.astype(jnp.float32)
        return jnp.pad(v, (0, Cmax - v.shape[0]))
    pp = jnp.stack([padc(params["gn1_w"]), padc(params["gn1_b"]), padc(params["b1"]),
                    padc(params["gn2_w"]), padc(params["gn2_b"]), padc(params["b2"]),
                    padc(bsk), jnp.zeros((Cmax,), jnp.float32)], axis=1)  # [Cmax, 8]

    full = lambda shape: pl.BlockSpec(shape, lambda b: (0,) * len(shape))
    kernel = functools.partial(_residual_block_kernel, W, Cin, Cout, Bblk)

    flops = int(B * HW * (2 * 9 * Cin * Cout + 2 * 9 * Cout * Cout + 2 * Cin * Cout
                          + 12 * (Cin + Cout)))
    transcendentals = int(B * HW * (Cin + Cout))
    bytes_accessed = int(4 * (x3.size + B * Cout * HW + temb.size + masks.size +
                              A1.size + A2.size + w1.size + w2.size + wsk.size + pp.size))

    out3 = pl.pallas_call(
        kernel,
        out_shape=jax.ShapeDtypeStruct((B, Cout, HW), jnp.float32),
        grid_spec=pltpu.PrefetchScalarGridSpec(
            num_scalar_prefetch=0,
            grid=(B // Bblk,),
            in_specs=[
                pl.BlockSpec((Bblk, Cin, HW), lambda b: (b, 0, 0)),    # x
                pl.BlockSpec((Bblk, Cout, 1), lambda b: (b, 0, 0)),    # temb
                full((9, HW)),                                         # tap masks
                full((Cin, Cin)),                                      # A1
                full((Cout, Cout)),                                    # A2
                full((9, Cout, Cin)),                                  # conv1 w
                full((9, Cout, Cout)),                                 # conv2 w
                full((Cout, Cin)),                                     # skip w
                full((Cmax, 8)),                                       # packed params
            ],
            out_specs=pl.BlockSpec((Bblk, Cout, HW), lambda b: (b, 0, 0)),
        ),
        compiler_params=pltpu.CompilerParams(dimension_semantics=("parallel",)),
        cost_estimate=pl.CostEstimate(flops=flops,
                                      transcendentals=transcendentals,
                                      bytes_accessed=bytes_accessed),
    )(x3, temb, masks, A1, A2, w1, w2, wsk, pp)

    return out3.reshape(B, Cout, H, W)


# ---------------------------- pure-JAX reference ----------------------------
def _gn_ref(x_nhwc, gamma, beta, G):
    B, H, W, C = x_nhwc.shape
    xg = x_nhwc.reshape(B, H, W, G, C // G)
    mu = xg.mean(axis=(1, 2, 4), keepdims=True)
    var = jnp.square(xg - mu).mean(axis=(1, 2, 4), keepdims=True)
    y = ((xg - mu) * jax.lax.rsqrt(var + EPS)).reshape(B, H, W, C)
    return y * gamma + beta


def _swish(x):
    return x * jax.nn.sigmoid(x)


def residual_block_ref(x_nchw, t, params, n_groups):
    x = jnp.transpose(x_nchw, (0, 2, 3, 1)).astype(jnp.float32)  # NHWC
    w1 = jnp.transpose(params["w1_oihw"], (2, 3, 1, 0))          # OIHW -> HWIO
    w2 = jnp.transpose(params["w2_oihw"], (2, 3, 1, 0))
    conv = lambda z, w: jax.lax.conv_general_dilated(
        z, w, (1, 1), "SAME",
        dimension_numbers=("NHWC", "HWIO", "NHWC"),
        precision=MM_PREC)

    h = _swish(_gn_ref(x, params["gn1_w"], params["gn1_b"], n_groups))
    h = conv(h, w1) + params["b1"]
    temb = jnp.dot(_swish(t), params["wt"], precision=MM_PREC) + params["bt"]
    h = h + temb[:, None, None, :]
    h = _swish(_gn_ref(h, params["gn2_w"], params["gn2_b"], n_groups))
    h = conv(h, w2) + params["b2"]
    skip = jnp.einsum("bhwc,dc->bhwd", x, params["wskip_oi"],
                      precision=MM_PREC) + params["bskip"]
    out = h + skip
    return jnp.transpose(out, (0, 3, 1, 2))


# --------------------------------- main --------------------------------------
if __name__ == "__main__":
    B, Cin, Cout, H, W, Tc, G = 2, 8, 16, 16, 16, 8, 4

    ks = jax.random.split(jax.random.PRNGKey(0), 14)
    params = {
        "gn1_w": jax.random.normal(ks[0], (Cin,), jnp.float32) * 0.1 + 1.0,
        "gn1_b": jax.random.normal(ks[1], (Cin,), jnp.float32) * 0.1,
        "w1_oihw": jax.random.normal(ks[2], (Cout, Cin, 3, 3), jnp.float32) * 0.1,
        "b1": jax.random.normal(ks[3], (Cout,), jnp.float32) * 0.1,
        "wt": jax.random.normal(ks[4], (Tc, Cout), jnp.float32) * 0.1,
        "bt": jax.random.normal(ks[5], (Cout,), jnp.float32) * 0.1,
        "gn2_w": jax.random.normal(ks[6], (Cout,), jnp.float32) * 0.1 + 1.0,
        "gn2_b": jax.random.normal(ks[7], (Cout,), jnp.float32) * 0.1,
        "w2_oihw": jax.random.normal(ks[8], (Cout, Cout, 3, 3), jnp.float32) * 0.1,
        "b2": jax.random.normal(ks[9], (Cout,), jnp.float32) * 0.1,
        "wskip_oi": jax.random.normal(ks[10], (Cout, Cin), jnp.float32) * 0.1,
        "bskip": jax.random.normal(ks[11], (Cout,), jnp.float32) * 0.1,
    }

    x = jax.random.normal(ks[12], (B, Cin, H, W), jnp.float32)   # NCHW, as in PyTorch
    t = jax.random.normal(ks[13], (B, Tc), jnp.float32)

    out = residual_block_pallas(x, t, params, G)
    out = jax.block_until_ready(out)

    ref = residual_block_ref(x, t, params, G)
    assert out.shape == (B, Cout, H, W), out.shape
    max_err = float(jnp.max(jnp.abs(out - ref)))
    assert jnp.allclose(out, ref, atol=2e-3, rtol=2e-3), max_err

    print("KERNEL_OK")
</pallas_src>

<mosaic_0001>
module attributes {stable_mosaic.version = 11 : i64} {
  func.func @_residual_block_kernel(%arg0: i32, %arg1: memref<1x8x256xf32, #tpu.memory_space<vmem>>, %arg2: memref<1x16x1xf32, #tpu.memory_space<vmem>>, %arg3: memref<9x256xf32, #tpu.memory_space<vmem>>, %arg4: memref<8x8xf32, #tpu.memory_space<vmem>>, %arg5: memref<16x16xf32, #tpu.memory_space<vmem>>, %arg6: memref<9x16x8xf32, #tpu.memory_space<vmem>>, %arg7: memref<9x16x16xf32, #tpu.memory_space<vmem>>, %arg8: memref<16x8xf32, #tpu.memory_space<vmem>>, %arg9: memref<16x8xf32, #tpu.memory_space<vmem>>, %arg10: memref<1x16x256xf32, #tpu.memory_space<vmem>>) attributes {dimension_semantics = [#tpu.dimension_semantics<parallel>], iteration_bounds = array<i64: 2>, scalar_prefetch = 0 : i64, scratch_operands = 0 : i64, tpu.core_type = #tpu.core_type<tc>, window_params = [{transform_indices = @transform_0, window_bounds = array<i64: 1, 8, 256>}, {transform_indices = @transform_1, window_bounds = array<i64: 1, 16, 1>}, {pipeline_mode = #tpu.pipeline_mode<synchronous>, transform_indices = @transform_2, window_bounds = array<i64: 9, 256>}, {pipeline_mode = #tpu.pipeline_mode<synchronous>, transform_indices = @transform_3, window_bounds = array<i64: 8, 8>}, {pipeline_mode = #tpu.pipeline_mode<synchronous>, transform_indices = @transform_4, window_bounds = array<i64: 16, 16>}, {pipeline_mode = #tpu.pipeline_mode<synchronous>, transform_indices = @transform_5, window_bounds = array<i64: 9, 16, 8>}, {pipeline_mode = #tpu.pipeline_mode<synchronous>, transform_indices = @transform_6, window_bounds = array<i64: 9, 16, 16>}, {pipeline_mode = #tpu.pipeline_mode<synchronous>, transform_indices = @transform_7, window_bounds = array<i64: 16, 8>}, {pipeline_mode = #tpu.pipeline_mode<synchronous>, transform_indices = @transform_8, window_bounds = array<i64: 16, 8>}, {transform_indices = @transform_9, window_bounds = array<i64: 1, 16, 256>}]} {
    %c0 = arith.constant 0 : index
    %c0_0 = arith.constant 0 : index
    %0 = vector.load %arg9[%c0, %c0_0] : memref<16x8xf32, #tpu.memory_space<vmem>>, vector<16x8xf32>
    %1 = vector.extract_strided_slice %0 {offsets = [0, 0], sizes = [8, 1], strides = [1, 1]} : vector<16x8xf32> to vector<8x1xf32>
    %2 = vector.extract_strided_slice %0 {offsets = [0, 1], sizes = [8, 1], strides = [1, 1]} : vector<16x8xf32> to vector<8x1xf32>
    %3 = vector.extract_strided_slice %0 {offsets = [0, 2], sizes = [16, 1], strides = [1, 1]} : vector<16x8xf32> to vector<16x1xf32>
    %4 = vector.extract_strided_slice %0 {offsets = [0, 3], sizes = [16, 1], strides = [1, 1]} : vector<16x8xf32> to vector<16x1xf32>
    %5 = vector.extract_strided_slice %0 {offsets = [0, 4], sizes = [16, 1], strides = [1, 1]} : vector<16x8xf32> to vector<16x1xf32>
    %6 = vector.extract_strided_slice %0 {offsets = [0, 5], sizes = [16, 1], strides = [1, 1]} : vector<16x8xf32> to vector<16x1xf32>
    %7 = vector.extract_strided_slice %0 {offsets = [0, 6], sizes = [16, 1], strides = [1, 1]} : vector<16x8xf32> to vector<16x1xf32>
    %c0_1 = arith.constant 0 : index
    %c0_2 = arith.constant 0 : index
    %8 = vector.load %arg4[%c0_1, %c0_2] : memref<8x8xf32, #tpu.memory_space<vmem>>, vector<8x8xf32>
    %c0_3 = arith.constant 0 : index
    %c0_4 = arith.constant 0 : index
    %9 = vector.load %arg5[%c0_3, %c0_4] : memref<16x16xf32, #tpu.memory_space<vmem>>, vector<16x16xf32>
    %c0_5 = arith.constant 0 : index
    %c0_6 = arith.constant 0 : index
    %10 = vector.load %arg8[%c0_5, %c0_6] : memref<16x8xf32, #tpu.memory_space<vmem>>, vector<16x8xf32>
    %c0_7 = arith.constant 0 : index
    %c0_8 = arith.constant 0 : index
    %11 = vector.load %arg3[%c0_7, %c0_8] : memref<9x256xf32, #tpu.memory_space<vmem>>, vector<9x256xf32>
    %c0_9 = arith.constant 0 : index
    %c0_10 = arith.constant 0 : index
    %c0_11 = arith.constant 0 : index
    %12 = vector.load %arg1[%c0_9, %c0_10, %c0_11] : memref<1x8x256xf32, #tpu.memory_space<vmem>>, vector<1x8x256xf32>
    %13 = vector.shape_cast %12 : vector<1x8x256xf32> to vector<8x256xf32>
    %cst = arith.constant dense<0.000000e+00> : vector<8xf32>
    %14 = vector.multi_reduction <add>, %13, %cst [1] : vector<8x256xf32> to vector<8xf32>
    %15 = vector.shape_cast %14 : vector<8xf32> to vector<8x1xf32>
    %16 = arith.mulf %13, %13 : vector<8x256xf32>
    %cst_12 = arith.constant dense<0.000000e+00> : vector<8xf32>
    %17 = vector.multi_reduction <add>, %16, %cst_12 [1] : vector<8x256xf32> to vector<8xf32>
    %18 = vector.shape_cast %17 : vector<8xf32> to vector<8x1xf32>
    %cst_13 = arith.constant dense<0.000000e+00> : vector<8x1xf32>
    %19 = tpu.matmul %8, %15, %cst_13 {dimension_numbers = #tpu.dot_dimension_numbers<[1], [0], [0], [1], [0, 0, 1, 1], [], []>, precision = #tpu.contract_precision<fp32>} : vector<8x8xf32>, vector<8x1xf32>, vector<8x1xf32> -> vector<8x1xf32>
    %cst_14 = arith.constant dense<0.000000e+00> : vector<8x1xf32>
    %20 = tpu.matmul %8, %18, %cst_14 {dimension_numbers = #tpu.dot_dimension_numbers<[1], [0], [0], [1], [0, 0, 1, 1], [], []>, precision = #tpu.contract_precision<fp32>} : vector<8x8xf32>, vector<8x1xf32>, vector<8x1xf32> -> vector<8x1xf32>
    %21 = arith.mulf %19, %19 : vector<8x1xf32>
    %22 = arith.subf %20, %21 : vector<8x1xf32>
    %cst_15 = arith.constant 9.99999974E-6 : f32
    %23 = vector.broadcast %cst_15 : f32 to vector<8x1xf32>
    %24 = arith.addf %22, %23 : vector<8x1xf32>
    %25 = math.rsqrt %24 : vector<8x1xf32>
    %26 = arith.mulf %25, %1 : vector<8x1xf32>
    %27 = arith.mulf %19, %26 : vector<8x1xf32>
    %28 = arith.subf %2, %27 : vector<8x1xf32>
    %29 = vector.broadcast %26 : vector<8x1xf32> to vector<8x256xf32>
    %30 = arith.mulf %13, %29 : vector<8x256xf32>
    %31 = vector.broadcast %28 : vector<8x1xf32> to vector<8x256xf32>
    %32 = arith.addf %30, %31 : vector<8x256xf32>
    %33 = arith.negf %32 : vector<8x256xf32>
    %34 = math.exp %33 : vector<8x256xf32>
    %cst_16 = arith.constant 1.000000e+00 : f32
    %35 = vector.broadcast %cst_16 : f32 to vector<8x256xf32>
    %36 = arith.addf %35, %34 : vector<8x256xf32>
    %37 = arith.divf %35, %36 : vector<8x256xf32>
    %38 = arith.mulf %32, %37 : vector<8x256xf32>
    %c17_i32 = arith.constant 17 : i32
    %39 = tpu.dynamic_rotate %38 by %c17_i32 dim 1 : vector<8x256xf32>, i32 -> vector<8x256xf32>
    %40 = vector.extract_strided_slice %11 {offsets = [0, 0], sizes = [1, 256], strides = [1, 1]} : vector<9x256xf32> to vector<1x256xf32>
    %41 = vector.broadcast %40 : vector<1x256xf32> to vector<8x256xf32>
    %42 = arith.mulf %39, %41 : vector<8x256xf32>
    %c0_17 = arith.constant 0 : index
    %c0_18 = arith.constant 0 : index
    %c0_19 = arith.constant 0 : index
    %43 = vector.load %arg6[%c0_17, %c0_18, %c0_19] : memref<9x16x8xf32, #tpu.memory_space<vmem>>, vector<1x16x8xf32>
    %44 = vector.shape_cast %43 : vector<1x16x8xf32> to vector<16x8xf32>
    %cst_20 = arith.constant dense<0.000000e+00> : vector<16x256xf32>
    %45 = tpu.matmul %44, %42, %cst_20 {dimension_numbers = #tpu.dot_dimension_numbers<[1], [0], [0], [1], [0, 0, 1, 1], [], []>, precision = #tpu.contract_precision<fp32>} : vector<16x8xf32>, vector<8x256xf32>, vector<16x256xf32> -> vector<16x256xf32>
    %c16_i32 = arith.constant 16 : i32
    %46 = tpu.dynamic_rotate %38 by %c16_i32 dim 1 : vector<8x256xf32>, i32 -> vector<8x256xf32>
    %47 = vector.extract_strided_slice %11 {offsets = [1, 0], sizes = [1, 256], strides = [1, 1]} : vector<9x256xf32> to vector<1x256xf32>
    %48 = vector.broadcast %47 : vector<1x256xf32> to vector<8x256xf32>
    %49 = arith.mulf %46, %48 : vector<8x256xf32>
    %c1 = arith.constant 1 : index
    %c0_21 = arith.constant 0 : index
    %c0_22 = arith.constant 0 : index
    %50 = vector.load %arg6[%c1, %c0_21, %c0_22] : memref<9x16x8xf32, #tpu.memory_space<vmem>>, vector<1x16x8xf32>
    %51 = vector.shape_cast %50 : vector<1x16x8xf32> to vector<16x8xf32>
    %cst_23 = arith.constant dense<0.000000e+00> : vector<16x256xf32>
    %52 = tpu.matmul %51, %49, %cst_23 {dimension_numbers = #tpu.dot_dimension_numbers<[1], [0], [0], [1], [0, 0, 1, 1], [], []>, precision = #tpu.contract_precision<fp32>} : vector<16x8xf32>, vector<8x256xf32>, vector<16x256xf32> -> vector<16x256xf32>
    %53 = arith.addf %45, %52 : vector<16x256xf32>
    %c15_i32 = arith.constant 15 : i32
    %54 = tpu.dynamic_rotate %38 by %c15_i32 dim 1 : vector<8x256xf32>, i32 -> vector<8x256xf32>
    %55 = vector.extract_strided_slice %11 {offsets = [2, 0], sizes = [1, 256], strides = [1, 1]} : vector<9x256xf32> to vector<1x256xf32>
    %56 = vector.broadcast %55 : vector<1x256xf32> to vector<8x256xf32>
    %57 = arith.mulf %54, %56 : vector<8x256xf32>
    %c2 = arith.constant 2 : index
    %c0_24 = arith.constant 0 : index
    %c0_25 = arith.constant 0 : index
    %58 = vector.load %arg6[%c2, %c0_24, %c0_25] : memref<9x16x8xf32, #tpu.memory_space<vmem>>, vector<1x16x8xf32>
    %59 = vector.shape_cast %58 : vector<1x16x8xf32> to vector<16x8xf32>
    %cst_26 = arith.constant dense<0.000000e+00> : vector<16x256xf32>
    %60 = tpu.matmul %59, %57, %cst_26 {dimension_numbers = #tpu.dot_dimension_numbers<[1], [0], [0], [1], [0, 0, 1, 1], [], []>, precision = #tpu.contract_precision<fp32>} : vector<16x8xf32>, vector<8x256xf32>, vector<16x256xf32> -> vector<16x256xf32>
    %61 = arith.addf %53, %60 : vector<16x256xf32>
    %c1_i32 = arith.constant 1 : i32
    %62 = tpu.dynamic_rotate %38 by %c1_i32 dim 1 : vector<8x256xf32>, i32 -> vector<8x256xf32>
    %63 = vector.extract_strided_slice %11 {offsets = [3, 0], sizes = [1, 256], strides = [1, 1]} : vector<9x256xf32> to vector<1x256xf32>
    %64 = vector.broadcast %63 : vector<1x256xf32> to vector<8x256xf32>
    %65 = arith.mulf %62, %64 : vector<8x256xf32>
    %c3 = arith.constant 3 : index
    %c0_27 = arith.constant 0 : index
    %c0_28 = arith.constant 0 : index
    %66 = vector.load %arg6[%c3, %c0_27, %c0_28] : memref<9x16x8xf32, #tpu.memory_space<vmem>>, vector<1x16x8xf32>
    %67 = vector.shape_cast %66 : vector<1x16x8xf32> to vector<16x8xf32>
    %cst_29 = arith.constant dense<0.000000e+00> : vector<16x256xf32>
    %68 = tpu.matmul %67, %65, %cst_29 {dimension_numbers = #tpu.dot_dimension_numbers<[1], [0], [0], [1], [0, 0, 1, 1], [], []>, precision = #tpu.contract_precision<fp32>} : vector<16x8xf32>, vector<8x256xf32>, vector<16x256xf32> -> vector<16x256xf32>
    %69 = arith.addf %61, %68 : vector<16x256xf32>
    %c4 = arith.constant 4 : index
    %c0_30 = arith.constant 0 : index
    %c0_31 = arith.constant 0 : index
    %70 = vector.load %arg6[%c4, %c0_30, %c0_31] : memref<9x16x8xf32, #tpu.memory_space<vmem>>, vector<1x16x8xf32>
    %71 = vector.shape_cast %70 : vector<1x16x8xf32> to vector<16x8xf32>
    %cst_32 = arith.constant dense<0.000000e+00> : vector<16x256xf32>
    %72 = tpu.matmul %71, %38, %cst_32 {dimension_numbers = #tpu.dot_dimension_numbers<[1], [0], [0], [1], [0, 0, 1, 1], [], []>, precision = #tpu.contract_precision<fp32>} : vector<16x8xf32>, vector<8x256xf32>, vector<16x256xf32> -> vector<16x256xf32>
    %73 = arith.addf %69, %72 : vector<16x256xf32>
    %c255_i32 = arith.constant 255 : i32
    %74 = tpu.dynamic_rotate %38 by %c255_i32 dim 1 : vector<8x256xf32>, i32 -> vector<8x256xf32>
    %75 = vector.extract_strided_slice %11 {offsets = [5, 0], sizes = [1, 256], strides = [1, 1]} : vector<9x256xf32> to vector<1x256xf32>
    %76 = vector.broadcast %75 : vector<1x256xf32> to vector<8x256xf32>
    %77 = arith.mulf %74, %76 : vector<8x256xf32>
    %c5 = arith.constant 5 : index
    %c0_33 = arith.constant 0 : index
    %c0_34 = arith.constant 0 : index
    %78 = vector.load %arg6[%c5, %c0_33, %c0_34] : memref<9x16x8xf32, #tpu.memory_space<vmem>>, vector<1x16x8xf32>
    %79 = vector.shape_cast %78 : vector<1x16x8xf32> to vector<16x8xf32>
    %cst_35 = arith.constant dense<0.000000e+00> : vector<16x256xf32>
    %80 = tpu.matmul %79, %77, %cst_35 {dimension_numbers = #tpu.dot_dimension_numbers<[1], [0], [0], [1], [0, 0, 1, 1], [], []>, precision = #tpu.contract_precision<fp32>} : vector<16x8xf32>, vector<8x256xf32>, vector<16x256xf32> -> vector<16x256xf32>
    %81 = arith.addf %73, %80 : vector<16x256xf32>
    %c241_i32 = arith.constant 241 : i32
    %82 = tpu.dynamic_rotate %38 by %c241_i32 dim 1 : vector<8x256xf32>, i32 -> vector<8x256xf32>
    %83 = vector.extract_strided_slice %11 {offsets = [6, 0], sizes = [1, 256], strides = [1, 1]} : vector<9x256xf32> to vector<1x256xf32>
    %84 = vector.broadcast %83 : vector<1x256xf32> to vector<8x256xf32>
    %85 = arith.mulf %82, %84 : vector<8x256xf32>
    %c6 = arith.constant 6 : index
    %c0_36 = arith.constant 0 : index
    %c0_37 = arith.constant 0 : index
    %86 = vector.load %arg6[%c6, %c0_36, %c0_37] : memref<9x16x8xf32, #tpu.memory_space<vmem>>, vector<1x16x8xf32>
    %87 = vector.shape_cast %86 : vector<1x16x8xf32> to vector<16x8xf32>
    %cst_38 = arith.constant dense<0.000000e+00> : vector<16x256xf32>
    %88 = tpu.matmul %87, %85, %cst_38 {dimension_numbers = #tpu.dot_dimension_numbers<[1], [0], [0], [1], [0, 0, 1, 1], [], []>, precision = #tpu.contract_precision<fp32>} : vector<16x8xf32>, vector<8x256xf32>, vector<16x256xf32> -> vector<16x256xf32>
    %89 = arith.addf %81, %88 : vector<16x256xf32>
    %c240_i32 = arith.constant 240 : i32
    %90 = tpu.dynamic_rotate %38 by %c240_i32 dim 1 : vector<8x256xf32>, i32 -> vector<8x256xf32>
    %91 = vector.extract_strided_slice %11 {offsets = [7, 0], sizes = [1, 256], strides = [1, 1]} : vector<9x256xf32> to vector<1x256xf32>
    %92 = vector.broadcast %91 : vector<1x256xf32> to vector<8x256xf32>
    %93 = arith.mulf %90, %92 : vector<8x256xf32>
    %c7 = arith.constant 7 : index
    %c0_39 = arith.constant 0 : index
    %c0_40 = arith.constant 0 : index
    %94 = vector.load %arg6[%c7, %c0_39, %c0_40] : memref<9x16x8xf32, #tpu.memory_space<vmem>>, vector<1x16x8xf32>
    %95 = vector.shape_cast %94 : vector<1x16x8xf32> to vector<16x8xf32>
    %cst_41 = arith.constant dense<0.000000e+00> : vector<16x256xf32>
    %96 = tpu.matmul %95, %93, %cst_41 {dimension_numbers = #tpu.dot_dimension_numbers<[1], [0], [0], [1], [0, 0, 1, 1], [], []>, precision = #tpu.contract_precision<fp32>} : vector<16x8xf32>, vector<8x256xf32>, vector<16x256xf32> -> vector<16x256xf32>
    %97 = arith.addf %89, %96 : vector<16x256xf32>
    %c239_i32 = arith.constant 239 : i32
    %98 = tpu.dynamic_rotate %38 by %c239_i32 dim 1 : vector<8x256xf32>, i32 -> vector<8x256xf32>
    %99 = vector.extract_strided_slice %11 {offsets = [8, 0], sizes = [1, 256], strides = [1, 1]} : vector<9x256xf32> to vector<1x256xf32>
    %100 = vector.broadcast %99 : vector<1x256xf32> to vector<8x256xf32>
    %101 = arith.mulf %98, %100 : vector<8x256xf32>
    %c8 = arith.constant 8 : index
    %c0_42 = arith.constant 0 : index
    %c0_43 = arith.constant 0 : index
    %102 = vector.load %arg6[%c8, %c0_42, %c0_43] : memref<9x16x8xf32, #tpu.memory_space<vmem>>, vector<1x16x8xf32>
    %103 = vector.shape_cast %102 : vector<1x16x8xf32> to vector<16x8xf32>
    %cst_44 = arith.constant dense<0.000000e+00> : vector<16x256xf32>
    %104 = tpu.matmul %103, %101, %cst_44 {dimension_numbers = #tpu.dot_dimension_numbers<[1], [0], [0], [1], [0, 0, 1, 1], [], []>, precision = #tpu.contract_precision<fp32>} : vector<16x8xf32>, vector<8x256xf32>, vector<16x256xf32> -> vector<16x256xf32>
    %105 = arith.addf %97, %104 : vector<16x256xf32>
    %106 = vector.broadcast %3 : vector<16x1xf32> to vector<16x256xf32>
    %107 = arith.addf %105, %106 : vector<16x256xf32>
    %c0_45 = arith.constant 0 : index
    %c0_46 = arith.constant 0 : index
    %c0_47 = arith.constant 0 : index
    %108 = vector.load %arg2[%c0_45, %c0_46, %c0_47] : memref<1x16x1xf32, #tpu.memory_space<vmem>>, vector<1x16x1xf32>
    %109 = vector.shape_cast %108 : vector<1x16x1xf32> to vector<16x1xf32>
    %110 = vector.broadcast %109 : vector<16x1xf32> to vector<16x256xf32>
    %111 = arith.addf %107, %110 : vector<16x256xf32>
    %cst_48 = arith.constant dense<0.000000e+00> : vector<16xf32>
    %112 = vector.multi_reduction <add>, %111, %cst_48 [1] : vector<16x256xf32> to vector<16xf32>
    %113 = vector.shape_cast %112 : vector<16xf32> to vector<16x1xf32>
    %114 = arith.mulf %111, %111 : vector<16x256xf32>
    %cst_49 = arith.constant dense<0.000000e+00> : vector<16xf32>
    %115 = vector.multi_reduction <add>, %114, %cst_49 [1] : vector<16x256xf32> to vector<16xf32>
    %116 = vector.shape_cast %115 : vector<16xf32> to vector<16x1xf32>
    %cst_50 = arith.constant dense<0.000000e+00> : vector<16x1xf32>
    %117 = tpu.matmul %9, %113, %cst_50 {dimension_numbers = #tpu.dot_dimension_numbers<[1], [0], [0], [1], [0, 0, 1, 1], [], []>, precision = #tpu.contract_precision<fp32>} : vector<16x16xf32>, vector<16x1xf32>, vector<16x1xf32> -> vector<16x1xf32>
    %cst_51 = arith.constant dense<0.000000e+00> : vector<16x1xf32>
    %118 = tpu.matmul %9, %116, %cst_51 {dimension_numbers = #tpu.dot_dimension_numbers<[1], [0], [0], [1], [0, 0, 1, 1], [], []>, precision = #tpu.contract_precision<fp32>} : vector<16x16xf32>, vector<16x1xf32>, vector<16x1xf32> -> vector<16x1xf32>
    %119 = arith.mulf %117, %117 : vector<16x1xf32>
    %120 = arith.subf %118, %119 : vector<16x1xf32>
    %cst_52 = arith.constant 9.99999974E-6 : f32
    %121 = vector.broadcast %cst_52 : f32 to vector<16x1xf32>
    %122 = arith.addf %120, %121 : vector<16x1xf32>
    %123 = math.rsqrt %122 : vector<16x1xf32>
    %124 = arith.mulf %123, %4 : vector<16x1xf32>
    %125 = arith.mulf %117, %124 : vector<16x1xf32>
    %126 = arith.subf %5, %125 : vector<16x1xf32>
    %127 = vector.broadcast %124 : vector<16x1xf32> to vector<16x256xf32>
    %128 = arith.mulf %111, %127 : vector<16x256xf32>
    %129 = vector.broadcast %126 : vector<16x1xf32> to vector<16x256xf32>
    %130 = arith.addf %128, %129 : vector<16x256xf32>
    %131 = arith.negf %130 : vector<16x256xf32>
    %132 = math.exp %131 : vector<16x256xf32>
    %cst_53 = arith.constant 1.000000e+00 : f32
    %133 = vector.broadcast %cst_53 : f32 to vector<16x256xf32>
    %134 = arith.addf %133, %132 : vector<16x256xf32>
    %135 = arith.divf %133, %134 : vector<16x256xf32>
    %136 = arith.mulf %130, %135 : vector<16x256xf32>
    %c17_i32_54 = arith.constant 17 : i32
    %137 = tpu.dynamic_rotate %136 by %c17_i32_54 dim 1 : vector<16x256xf32>, i32 -> vector<16x256xf32>
    %138 = vector.extract_strided_slice %11 {offsets = [0, 0], sizes = [1, 256], strides = [1, 1]} : vector<9x256xf32> to vector<1x256xf32>
    %139 = vector.broadcast %138 : vector<1x256xf32> to vector<16x256xf32>
    %140 = arith.mulf %137, %139 : vector<16x256xf32>
    %c0_55 = arith.constant 0 : index
    %c0_56 = arith.constant 0 : index
    %c0_57 = arith.constant 0 : index
    %141 = vector.load %arg7[%c0_55, %c0_56, %c0_57] : memref<9x16x16xf32, #tpu.memory_space<vmem>>, vector<1x16x16xf32>
    %142 = vector.shape_cast %141 : vector<1x16x16xf32> to vector<16x16xf32>
    %cst_58 = arith.constant dense<0.000000e+00> : vector<16x256xf32>
    %143 = tpu.matmul %142, %140, %cst_58 {dimension_numbers = #tpu.dot_dimension_numbers<[1], [0], [0], [1], [0, 0, 1, 1], [], []>, precision = #tpu.contract_precision<fp32>} : vector<16x16xf32>, vector<16x256xf32>, vector<16x256xf32> -> vector<16x256xf32>
    %c16_i32_59 = arith.constant 16 : i32
    %144 = tpu.dynamic_rotate %136 by %c16_i32_59 dim 1 : vector<16x256xf32>, i32 -> vector<16x256xf32>
    %145 = vector.extract_strided_slice %11 {offsets = [1, 0], sizes = [1, 256], strides = [1, 1]} : vector<9x256xf32> to vector<1x256xf32>
    %146 = vector.broadcast %145 : vector<1x256xf32> to vector<16x256xf32>
    %147 = arith.mulf %144, %146 : vector<16x256xf32>
    %c1_60 = arith.constant 1 : index
    %c0_61 = arith.constant 0 : index
    %c0_62 = arith.constant 0 : index
    %148 = vector.load %arg7[%c1_60, %c0_61, %c0_62] : memref<9x16x16xf32, #tpu.memory_space<vmem>>, vector<1x16x16xf32>
    %149 = vector.shape_cast %148 : vector<1x16x16xf32> to vector<16x16xf32>
    %cst_63 = arith.constant dense<0.000000e+00> : vector<16x256xf32>
    %150 = tpu.matmul %149, %147, %cst_63 {dimension_numbers = #tpu.dot_dimension_numbers<[1], [0], [0], [1], [0, 0, 1, 1], [], []>, precision = #tpu.contract_precision<fp32>} : vector<16x16xf32>, vector<16x256xf32>, vector<16x256xf32> -> vector<16x256xf32>
    %151 = arith.addf %143, %150 : vector<16x256xf32>
    %c15_i32_64 = arith.constant 15 : i32
    %152 = tpu.dynamic_rotate %136 by %c15_i32_64 dim 1 : vector<16x256xf32>, i32 -> vector<16x256xf32>
    %153 = vector.extract_strided_slice %11 {offsets = [2, 0], sizes = [1, 256], strides = [1, 1]} : vector<9x256xf32> to vector<1x256xf32>
    %154 = vector.broadcast %153 : vector<1x256xf32> to vector<16x256xf32>
    %155 = arith.mulf %152, %154 : vector<16x256xf32>
    %c2_65 = arith.constant 2 : index
    %c0_66 = arith.constant 0 : index
    %c0_67 = arith.constant 0 : index
    %156 = vector.load %arg7[%c2_65, %c0_66, %c0_67] : memref<9x16x16xf32, #tpu.memory_space<vmem>>, vector<1x16x16xf32>
    %157 = vector.shape_cast %156 : vector<1x16x16xf32> to vector<16x16xf32>
    %cst_68 = arith.constant dense<0.000000e+00> : vector<16x256xf32>
    %158 = tpu.matmul %157, %155, %cst_68 {dimension_numbers = #tpu.dot_dimension_numbers<[1], [0], [0], [1], [0, 0, 1, 1], [], []>, precision = #tpu.contract_precision<fp32>} : vector<16x16xf32>, vector<16x256xf32>, vector<16x256xf32> -> vector<16x256xf32>
    %159 = arith.addf %151, %158 : vector<16x256xf32>
    %c1_i32_69 = arith.constant 1 : i32
    %160 = tpu.dynamic_rotate %136 by %c1_i32_69 dim 1 : vector<16x256xf32>, i32 -> vector<16x256xf32>
    %161 = vector.extract_strided_slice %11 {offsets = [3, 0], sizes = [1, 256], strides = [1, 1]} : vector<9x256xf32> to vector<1x256xf32>
    %162 = vector.broadcast %161 : vector<1x256xf32> to vector<16x256xf32>
    %163 = arith.mulf %160, %162 : vector<16x256xf32>
    %c3_70 = arith.constant 3 : index
    %c0_71 = arith.constant 0 : index
    %c0_72 = arith.constant 0 : index
    %164 = vector.load %arg7[%c3_70, %c0_71, %c0_72] : memref<9x16x16xf32, #tpu.memory_space<vmem>>, vector<1x16x16xf32>
    %165 = vector.shape_cast %164 : vector<1x16x16xf32> to vector<16x16xf32>
    %cst_73 = arith.constant dense<0.000000e+00> : vector<16x256xf32>
    %166 = tpu.matmul %165, %163, %cst_73 {dimension_numbers = #tpu.dot_dimension_numbers<[1], [0], [0], [1], [0, 0, 1, 1], [], []>, precision = #tpu.contract_precision<fp32>} : vector<16x16xf32>, vector<16x256xf32>, vector<16x256xf32> -> vector<16x256xf32>
    %167 = arith.addf %159, %166 : vector<16x256xf32>
    %c4_74 = arith.constant 4 : index
    %c0_75 = arith.constant 0 : index
    %c0_76 = arith.constant 0 : index
    %168 = vector.load %arg7[%c4_74, %c0_75, %c0_76] : memref<9x16x16xf32, #tpu.memory_space<vmem>>, vector<1x16x16xf32>
    %169 = vector.shape_cast %168 : vector<1x16x16xf32> to vector<16x16xf32>
    %cst_77 = arith.constant dense<0.000000e+00> : vector<16x256xf32>
    %170 = tpu.matmul %169, %136, %cst_77 {dimension_numbers = #tpu.dot_dimension_numbers<[1], [0], [0], [1], [0, 0, 1, 1], [], []>, precision = #tpu.contract_precision<fp32>} : vector<16x16xf32>, vector<16x256xf32>, vector<16x256xf32> -> vector<16x256xf32>
    %171 = arith.addf %167, %170 : vector<16x256xf32>
    %c255_i32_78 = arith.constant 255 : i32
    %172 = tpu.dynamic_rotate %136 by %c255_i32_78 dim 1 : vector<16x256xf32>, i32 -> vector<16x256xf32>
    %173 = vector.extract_strided_slice %11 {offsets = [5, 0], sizes = [1, 256], strides = [1, 1]} : vector<9x256xf32> to vector<1x256xf32>
    %174 = vector.broadcast %173 : vector<1x256xf32> to vector<16x256xf32>
    %175 = arith.mulf %172, %174 : vector<16x256xf32>
    %c5_79 = arith.constant 5 : index
    %c0_80 = arith.constant 0 : index
    %c0_81 = arith.constant 0 : index
    %176 = vector.load %arg7[%c5_79, %c0_80, %c0_81] : memref<9x16x16xf32, #tpu.memory_space<vmem>>, vector<1x16x16xf32>
    %177 = vector.shape_cast %176 : vector<1x16x16xf32> to vector<16x16xf32>
    %cst_82 = arith.constant dense<0.000000e+00> : vector<16x256xf32>
    %178 = tpu.matmul %177, %175, %cst_82 {dimension_numbers = #tpu.dot_dimension_numbers<[1], [0], [0], [1], [0, 0, 1, 1], [], []>, precision = #tpu.contract_precision<fp32>} : vector<16x16xf32>, vector<16x256xf32>, vector<16x256xf32> -> vector<16x256xf32>
    %179 = arith.addf %171, %178 : vector<16x256xf32>
    %c241_i32_83 = arith.constant 241 : i32
    %180 = tpu.dynamic_rotate %136 by %c241_i32_83 dim 1 : vector<16x256xf32>, i32 -> vector<16x256xf32>
    %181 = vector.extract_strided_slice %11 {offsets = [6, 0], sizes = [1, 256], strides = [1, 1]} : vector<9x256xf32> to vector<1x256xf32>
    %182 = vector.broadcast %181 : vector<1x256xf32> to vector<16x256xf32>
    %183 = arith.mulf %180, %182 : vector<16x256xf32>
    %c6_84 = arith.constant 6 : index
    %c0_85 = arith.constant 0 : index
    %c0_86 = arith.constant 0 : index
    %184 = vector.load %arg7[%c6_84, %c0_85, %c0_86] : memref<9x16x16xf32, #tpu.memory_space<vmem>>, vector<1x16x16xf32>
    %185 = vector.shape_cast %184 : vector<1x16x16xf32> to vector<16x16xf32>
    %cst_87 = arith.constant dense<0.000000e+00> : vector<16x256xf32>
    %186 = tpu.matmul %185, %183, %cst_87 {dimension_numbers = #tpu.dot_dimension_numbers<[1], [0], [0], [1], [0, 0, 1, 1], [], []>, precision = #tpu.contract_precision<fp32>} : vector<16x16xf32>, vector<16x256xf32>, vector<16x256xf32> -> vector<16x256xf32>
    %187 = arith.addf %179, %186 : vector<16x256xf32>
    %c240_i32_88 = arith.constant 240 : i32
    %188 = tpu.dynamic_rotate %136 by %c240_i32_88 dim 1 : vector<16x256xf32>, i32 -> vector<16x256xf32>
    %189 = vector.extract_strided_slice %11 {offsets = [7, 0], sizes = [1, 256], strides = [1, 1]} : vector<9x256xf32> to vector<1x256xf32>
    %190 = vector.broadcast %189 : vector<1x256xf32> to vector<16x256xf32>
    %191 = arith.mulf %188, %190 : vector<16x256xf32>
    %c7_89 = arith.constant 7 : index
    %c0_90 = arith.constant 0 : index
    %c0_91 = arith.constant 0 : index
    %192 = vector.load %arg7[%c7_89, %c0_90, %c0_91] : memref<9x16x16xf32, #tpu.memory_space<vmem>>, vector<1x16x16xf32>
    %193 = vector.shape_cast %192 : vector<1x16x16xf32> to vector<16x16xf32>
    %cst_92 = arith.constant dense<0.000000e+00> : vector<16x256xf32>
    %194 = tpu.matmul %193, %191, %cst_92 {dimension_numbers = #tpu.dot_dimension_numbers<[1], [0], [0], [1], [0, 0, 1, 1], [], []>, precision = #tpu.contract_precision<fp32>} : vector<16x16xf32>, vector<16x256xf32>, vector<16x256xf32> -> vector<16x256xf32>
    %195 = arith.addf %187, %194 : vector<16x256xf32>
    %c239_i32_93 = arith.constant 239 : i32
    %196 = tpu.dynamic_rotate %136 by %c239_i32_93 dim 1 : vector<16x256xf32>, i32 -> vector<16x256xf32>
    %197 = vector.extract_strided_slice %11 {offsets = [8, 0], sizes = [1, 256], strides = [1, 1]} : vector<9x256xf32> to vector<1x256xf32>
    %198 = vector.broadcast %197 : vector<1x256xf32> to vector<16x256xf32>
    %199 = arith.mulf %196, %198 : vector<16x256xf32>
    %c8_94 = arith.constant 8 : index
    %c0_95 = arith.constant 0 : index
    %c0_96 = arith.constant 0 : index
    %200 = vector.load %arg7[%c8_94, %c0_95, %c0_96] : memref<9x16x16xf32, #tpu.memory_space<vmem>>, vector<1x16x16xf32>
    %201 = vector.shape_cast %200 : vector<1x16x16xf32> to vector<16x16xf32>
    %cst_97 = arith.constant dense<0.000000e+00> : vector<16x256xf32>
    %202 = tpu.matmul %201, %199, %cst_97 {dimension_numbers = #tpu.dot_dimension_numbers<[1], [0], [0], [1], [0, 0, 1, 1], [], []>, precision = #tpu.contract_precision<fp32>} : vector<16x16xf32>, vector<16x256xf32>, vector<16x256xf32> -> vector<16x256xf32>
    %203 = arith.addf %195, %202 : vector<16x256xf32>
    %204 = vector.broadcast %6 : vector<16x1xf32> to vector<16x256xf32>
    %205 = arith.addf %203, %204 : vector<16x256xf32>
    %cst_98 = arith.constant dense<0.000000e+00> : vector<16x256xf32>
    %206 = tpu.matmul %10, %13, %cst_98 {dimension_numbers = #tpu.dot_dimension_numbers<[1], [0], [0], [1], [0, 0, 1, 1], [], []>, precision = #tpu.contract_precision<fp32>} : vector<16x8xf32>, vector<8x256xf32>, vector<16x256xf32> -> vector<16x256xf32>
    %207 = vector.broadcast %7 : vector<16x1xf32> to vector<16x256xf32>
    %208 = arith.addf %206, %207 : vector<16x256xf32>
    %209 = arith.addf %205, %208 : vector<16x256xf32>
    %c0_99 = arith.constant 0 : index
    %c0_100 = arith.constant 0 : index
    %c0_101 = arith.constant 0 : index
    %210 = vector.load %arg10[%c0_99, %c0_100, %c0_101] : memref<1x16x256xf32, #tpu.memory_space<vmem>>, vector<1x16x256xf32>
    %211 = vector.shape_cast %210 : vector<1x16x256xf32> to vector<16x256xf32>
    %212 = vector.shape_cast %209 : vector<16x256xf32> to vector<1x16x256xf32>
    tpu.vector_store %arg10[%c0_99, %c0_100, %c0_101], %212 {strides = array<i32>} : memref<1x16x256xf32, #tpu.memory_space<vmem>>, vector<1x16x256xf32>,
    return
  }
  func.func @transform_0(%arg0: i32) -> (i32, i32, i32) {
    %c0_i32 = arith.constant 0 : i32
    %c0_i32_0 = arith.constant 0 : i32
    %c0_i32_1 = arith.constant 0 : i32
    return %arg0, %c0_i32, %c0_i32_0 : i32, i32, i32
  }
  func.func @transform_1(%arg0: i32) -> (i32, i32, i32) {
    %c0_i32 = arith.constant 0 : i32
    %c0_i32_0 = arith.constant 0 : i32
    %c0_i32_1 = arith.constant 0 : i32
    return %arg0, %c0_i32, %c0_i32_0 : i32, i32, i32
  }
  func.func @transform_2(%arg0: i32) -> (i32, i32) {
    %c0_i32 = arith.constant 0 : i32
    %c0_i32_0 = arith.constant 0 : i32
    %c0_i32_1 = arith.constant 0 : i32
    return %c0_i32, %c0_i32_0 : i32, i32
  }
  func.func @transform_3(%arg0: i32) -> (i32, i32) {
    %c0_i32 = arith.constant 0 : i32
    %c0_i32_0 = arith.constant 0 : i32
    %c0_i32_1 = arith.constant 0 : i32
    return %c0_i32, %c0_i32_0 : i32, i32
  }
  func.func @transform_4(%arg0: i32) -> (i32, i32) {
    %c0_i32 = arith.constant 0 : i32
    %c0_i32_0 = arith.constant 0 : i32
    %c0_i32_1 = arith.constant 0 : i32
    return %c0_i32, %c0_i32_0 : i32, i32
  }
  func.func @transform_5(%arg0: i32) -> (i32, i32, i32) {
    %c0_i32 = arith.constant 0 : i32
    %c0_i32_0 = arith.constant 0 : i32
    %c0_i32_1 = arith.constant 0 : i32
    %c0_i32_2 = arith.constant 0 : i32
    return %c0_i32, %c0_i32_0, %c0_i32_1 : i32, i32, i32
  }
  func.func @transform_6(%arg0: i32) -> (i32, i32, i32) {
    %c0_i32 = arith.constant 0 : i32
    %c0_i32_0 = arith.constant 0 : i32
    %c0_i32_1 = arith.constant 0 : i32
    %c0_i32_2 = arith.constant 0 : i32
    return %c0_i32, %c0_i32_0, %c0_i32_1 : i32, i32, i32
  }
  func.func @transform_7(%arg0: i32) -> (i32, i32) {
    %c0_i32 = arith.constant 0 : i32
    %c0_i32_0 = arith.constant 0 : i32
    %c0_i32_1 = arith.constant 0 : i32
    return %c0_i32, %c0_i32_0 : i32, i32
  }
  func.func @transform_8(%arg0: i32) -> (i32, i32) {
    %c0_i32 = arith.constant 0 : i32
    %c0_i32_0 = arith.constant 0 : i32
    %c0_i32_1 = arith.constant 0 : i32
    return %c0_i32, %c0_i32_0 : i32, i32
  }
  func.func @transform_9(%arg0: i32) -> (i32, i32, i32) {
    %c0_i32 = arith.constant 0 : i32
    %c0_i32_0 = arith.constant 0 : i32
    %c0_i32_1 = arith.constant 0 : i32
    return %arg0, %c0_i32, %c0_i32_0 : i32, i32, i32
  }
}

</mosaic_0001>

<bundles_post_ra>
// kernel: tpu_custom_call.1
= control target key start
LH: loop header
LB: loop body
LE: loop exit
PB: predicated region body
PF: predicated region fallthrough
CT: control target
= control target key end

     0   :  { %14 = vsyncpa [#allocation3], 0  ;;  %s16305_s0 = inlined_call_operand.vmem [shape: f32[2,8,256], index: 0, kind: input, shape index: {}]   ;;  %s16306_s1 = inlined_call_operand.vmem [shape: f32[2,16,1], index: 1, kind: input, shape index: {}]   ;;  %s16307_s2 = inlined_call_operand.vmem [shape: f32[9,256], index: 2, kind: input, shape index: {}]   ;;  %s16308_s3 = inlined_call_operand.vmem [shape: f32[8,8], index: 3, kind: input, shape index: {}]   ;;  %s16309_s4 = inlined_call_operand.vmem [shape: f32[16,16], index: 4, kind: input, shape index: {}]   ;;  %s16310_s5 = inlined_call_operand.vmem [shape: f32[9,16,8], index: 5, kind: input, shape index: {}]   ;;  %s16311_s6 = inlined_call_operand.vmem [shape: f32[9,16,16], index: 6, kind: input, shape index: {}]   ;;  %s16312_s7 = inlined_call_operand.vmem [shape: f32[16,8], index: 7, kind: input, shape index: {}]   ;;  %s16313_s8 = inlined_call_operand.vmem [shape: f32[16,8], index: 8, kind: input, shape index: {}]   ;;  %s16314_s9 = inlined_call_operand.hbm [shape: f32[2,16,256], index: 9, kind: output, shape index: {}]  }
   0x1   :  { %16 = vsyncpa [#allocation3 + $0x1], 0  ;;  %s14326_s30 = smov 0   ;;  %s14328_s10 = smov 0  }
   0x2   :  { %s14330_s11 = smov 0   ;;  %s14332_s12 = smov 0  }
   0x3 LB: > { %s14347_s13 = sadd.s32 4294967295, %s14254_s12   ;;  %s13052_s14 = sadd.s32 4294967294, %s14254_s12   ;;  %s14254_s12 = sphi %s14332_s12, %s16549_s12   ;;  %s14250_s11 = sphi %s14330_s11, %s16548_s11   ;;  %s14246_s10 = sphi %s14328_s10, %s16547_s10   ;;  %s14242_s30 = sphi %s14326_s30, %s16546_s30  }
   0x4   : > { %s14351_s15 = sadd.s32 1, %s14254_s12   ;;  %s228_s16 = sadd.s32 1, %s14250_s11 }
   0x5   : > { %s225_s17 = ssub.s32 %s14254_s12, %s14351_s15  ;;  %p238_p0 = scmp.ne.s32.totalorder %s14250_s11, %s14246_s10 }
   0x6   : > { %p226_p1 = scmp.eq.s32.totalorder %s225_s17, 0  ;;  %p239_p2 = scmp.eq.s32.totalorder %s14347_s13, 1 }
   0x7   : > { %p244_p3 = scmp.ne.s32.totalorder %s14246_s10, %s14242_s30  ;;  %p245_p4 = scmp.eq.s32.totalorder %s13052_s14, 1 }
   0x8   : > { %s14362_s18 = scalar_select %p226_p1, %s14250_s11, %s228_s16  }
   0x9   : > { %p14364_p5 = por %p239_p2, %p238_p0  ;;  %p14368_p6 = por %p245_p4, %p244_p3 }
   0xa   : > { %p13055_p7 = scmp.ge.s32.totalorder %s14254_s12, 1  ;;  %p300_p8 = scmp.lt.s32.totalorder %s14254_s12, 3 }
   0xc   : > { %p301_p9 = pnand %p13055_p7, %p300_p8 }
   0xe   : > { %304 = sbr.rel (%p301_p9) target bundleno = 3042 (0xbe2), region = 56 }
  0x15   : > { %p341_p10 = scmp.lt.s32.totalorder %s14347_s13, 1  ;;  %v16330_v6 = vmov 0.0   ;;  %vm14257_vm0 = vmmov 0   ;;  %v353_v7 = vld [vmem:[%s16308_s3] sm:$0xff]  ;;  %vm372_vm1 = vcmask 64512   ;;  %v14258_v26 = vmov 0  }
  0x16   : > { %13181 = vmatprep.subr.mxu0 %v16330_v6  ;;  %13211 = vmatprep.subr.mxu1 %v16330_v6  ;;  %v374_v8 = vsel %vm372_vm1, %v353_v7, 0  ;;  %v14259_v34 = vmov 1   ;;  %v351_v35 = vld [vmem:[%s16313_s8] sm:$0xff]  ;;  %s16317_s14 = smov 1   ;;  %v1311_v57 = vlaneseq  ;;  %s16315_s16 = smov 16   ;;  %v14469_v61 = vld [vmem:[%s16307_s2 + $0x8] sm:$0xff] }
  0x17   : > { %s14376_s21 = scalar_select %p341_p10, %s14347_s13, 1  ;;  %13183 = vmatprep.mubr.msk.f32.mxu0 %vm14257_vm0, %v16330_v6  ;;  %13213 = vmatprep.mubr.msk.f32.mxu1 %vm14257_vm0, %v16330_v6  ;;  %v442_v9 = vand.u32 4294901760, %v374_v8  ;;  %v14464_v60 = vld [vmem:[%s16307_s2] sm:$0xff]  ;;  %vm6225_vm10 = vcmask 130048  }
  0x18   : > { %14143 = vset.pattern.permute.xlu1 %v14258_v26  ;;  %14144 = vset.pattern.permute.xlu0 %v14259_v34  ;;  %s16325_s17 = smov 113   ;;  %v14454_v58 = vshrl.u32 %v1311_v57, 7  ;;  %s16323_s23 = smov 112  }
  0x19   : > { %s13106_s22 = sshll.u32 %s14376_s21, 4  ;;  %v443_v10 = vsub.f32 %v374_v8, %v442_v9  ;;  %s14264_s29 = smov 17  }
  0x1a   : > { %s14384_s25 = scalar_lea.vmem %s16305_s0, %s13106_s22  ;;  %v2397_v59 = vsub.s32 2, %v14454_v58  ;;  %s16319_s24 = smov 15   ;;  %v4556_v7 = vsub.s32 6, %v14454_v58 }
  0x1b   : > { %v14387_v0 = vld [vmem:[%s14384_s25] sm:$0xff]  ;;  %v14390_v1 = vld [vmem:[%s14384_s25 + $0x8] sm:$0xff]  ;;  %v444_v11 = vand.u32 4294901760, %v443_v10  ;;  %s14267_s26 = smov 127   ;;  %s14270_s28 = smov 4  }
  0x1c   : > { %v364_v2 = vadd.f32 %v14390_v1, %v14387_v0  ;;  %v367_v3 = vmul.f32 %v14387_v0, %v14387_v0  ;;  %v368_v4 = vmul.f32 %v14390_v1, %v14390_v1  ;;  %v14472_v62 = vrot.slane %v14464_v60, %v2397_v59  ;;  %s16390_s21 = smov 15  }
  0x1d   : > { %v445_v12 = vsub.f32 %v443_v10, %v444_v11  ;;  %v14475_v63 = vrot.slane %v14469_v61, %v2397_v59  ;;  %v14505_v8 = vrot.slane %v14464_v60, %v4556_v7 }
  0x1e   : > { %365 = vadd.xlane.f32.xlu0 %v364_v2  ;;  %v369_v5 = vadd.f32 %v368_v4, %v367_v3  ;;  %v4012_v3 = vsub.s32 5, %v14454_v58 }
  0x1f   : > { %v446_v14 = vand.u32 4294901760, %v445_v12 }
  0x20   : > { %v14496_v4 = vrot.slane %v14464_v60, %v4012_v3 }
  0x22   : > { %370 = vadd.xlane.f32.xlu0 %v369_v5  ;;  %v14499_v5 = vrot.slane %v14469_v61, %v4012_v3 }
  0xab   : > { %v366_v13 = vpop.xlane.xlu0 %365 }
  0xac   : > { %v377_v15 = vand.u32 4294901760, %v366_v13 }
  0xae   : > { %v454_v16 = vsub.f32 %v366_v13, %v377_v15  ;;  %13182 = vmatpush3.msra.mxu0 %v377_v15  ;;  %v13063_v13 = vld [vmem:[%s16310_s5 + $0x10] sm:$0xff] }
  0xaf   : > { %13184 = vmatmul.mubr.f32.vlgmr.msra.gmra.mrb[0].mxu0 %v446_v14  ;;  %v371_v17 = vpop.xlane.xlu0 %370  ;;  %13186 = vmatprep.subr.mxu0 %v16330_v6 }
  0xb0   : > { %v455_v18 = vand.u32 4294901760, %v454_v16  ;;  %v823_v19 = vand.u32 4294901760, %v371_v17  ;;  %13188 = vmatprep.mubr.msk.f32.mxu0 %vm14257_vm0, %v16330_v6 }
  0xb2   : > { %v456_v20 = vsub.f32 %v454_v16, %v455_v18  ;;  %v900_v21 = vsub.f32 %v371_v17, %v823_v19  ;;  %13212 = vmatpush3.msra.mxu1 %v823_v19 }
  0xb3   : > { %13214 = vmatmul.mubr.f32.vlgmr.msra.gmra.mrb[0].mxu1 %v446_v14  ;;  %13216 = vmatprep.subr.mxu1 %v16330_v6  ;;  %v1349_v14 = vsel %vm372_vm1, %v13063_v13, 0 }
  0xb4   : > { %v457_v22 = vand.u32 4294901760, %v456_v20  ;;  %v901_v23 = vand.u32 4294901760, %v900_v21  ;;  %13218 = vmatprep.mubr.msk.f32.mxu1 %vm14257_vm0, %v16330_v6  ;;  %v14542_v20 = vand.u32 127, %v1311_v57 }
  0xb6   : > { %v902_v24 = vsub.f32 %v900_v21, %v901_v23  ;;  %13187 = vmatpush3.msra.mxu0 %v457_v22  ;;  %vm1332_vm2 = vcmp.lt.s32.totalorder %v14542_v20, 16  ;;  %vm1313_vm3 = vcmp.lt.s32.totalorder %v14542_v20, 17  ;;  %vm2392_vm4 = vcmp.lt.s32.totalorder %v14542_v20, 15 }
  0xb7   : > { %13189 = vmatmul.mubr.f32.vlgmr.msra.gmra.mrb[0].mxu0 %v442_v9  ;;  %13191 = vmatprep.subr.mxu0 %v16330_v6  ;;  %vm2936_vm5 = vcmp.lt.s32.totalorder %v14542_v20, 1  ;;  %vm4007_vm6 = vcmp.lt.s32.totalorder %v14542_v20, 127  ;;  %vm4551_vm7 = vcmp.lt.s32.totalorder %v14542_v20, 113  ;;  %vm5095_vm8 = vcmp.lt.s32.totalorder %v14542_v20, 112 }
  0xb8   : > { %v903_v25 = vand.u32 4294901760, %v902_v24  ;;  %13192 = vmatpush3.msra.mxu0 %v454_v16  ;;  %13193 = vmatprep.mubr.msk.f32.mxu0 %vm14257_vm0, %v16330_v6  ;;  %v14536_v16 = vand.u32 4294901760, %v1349_v14  ;;  %vm5639_vm9 = vcmp.lt.s32.totalorder %v14542_v20, 111 }
  0xb9   : > { %13196 = vmatprep.subr.mxu0 %v16330_v6 }
  0xba   : > { %13217 = vmatpush3.msra.mxu1 %v903_v25 }
  0xbb   : > { %13219 = vmatmul.mubr.f32.vlgmr.msra.gmra.mrb[0].mxu1 %v442_v9  ;;  %13221 = vmatprep.subr.mxu1 %v16330_v6 }
  0xbc   : > { %13222 = vmatpush3.msra.mxu1 %v900_v21  ;;  %13223 = vmatprep.mubr.msk.f32.mxu1 %vm14257_vm0, %v16330_v6  ;;  %v1337_v21 = vsub.s32 1, %v14454_v58 }
  0xbd   : > { %13226 = vmatprep.subr.mxu1 %v16330_v6 }
  0xbe   : > { %v14550_v25 = vrot.slane %v14464_v60, %v1337_v21 }
  0xbf   : > { %13194 = vmatmul.mubr.f32.vlgmr.msra.gmra.mrb[0].mxu0 %v443_v10 }
  0xc0   : > { %13197 = vmatpush3.msra.mxu0 %v377_v15  ;;  %13198 = vmatprep.mubr.msk.f32.mxu0 %vm14257_vm0, %v16330_v6 }
  0xc1   : > { %13201 = vmatprep.subr.mxu0 %v16330_v6 }
  0xc3   : > { %13224 = vmatmul.mubr.f32.vlgmr.msra.gmra.mrb[0].mxu1 %v443_v10  ;;  %v5100_v10 = vsub.s32 7, %v14454_v58 }
  0xc4   : > { %13227 = vmatpush3.msra.mxu1 %v823_v19  ;;  %13228 = vmatprep.mubr.msk.f32.mxu1 %vm14257_vm0, %v16330_v6 }
  0xc5   : > { %13231 = vmatprep.subr.mxu1 %v16330_v6  ;;  %v14517_v12 = vrot.slane %v14469_v61, %v5100_v10 }
  0xc7   : > { %13199 = vmatmul.mubr.f32.vlgmr.msra.gmra.mrb[0].mxu0 %v444_v11 }
  0xc8   : > { %13202 = vmatpush3.msra.mxu0 %v455_v18  ;;  %13203 = vmatprep.mubr.msk.f32.mxu0 %vm14257_vm0, %v16330_v6  ;;  %v1422_v18 = vsub.f32 %v1349_v14, %v14536_v16 }
  0xc9   : > { %13206 = vmatprep.subr.mxu0 %v16330_v6 }
  0xcb   : > { %13229 = vmatmul.mubr.f32.vlgmr.msra.gmra.mrb[0].mxu1 %v444_v11  ;;  %v14514_v11 = vrot.slane %v14464_v60, %v5100_v10 }
  0xcc   : > { %13232 = vmatpush3.msra.mxu1 %v901_v23  ;;  %13233 = vmatprep.mubr.msk.f32.mxu1 %vm14257_vm0, %v16330_v6  ;;  %v1423_v23 = vand.u32 4294901760, %v1422_v18 }
  0xcd   : > { %13236 = vmatprep.subr.mxu1 %v16330_v6 }
  0xcf   : > { %13204 = vmatmul.mubr.f32.vlgmr.msra.gmra.mrb[0].mxu0 %v442_v9 }
  0xd0   : > { %13207 = vmatpush3.msra.mxu0 %v377_v15  ;;  %13208 = vmatprep.mubr.msk.f32.mxu0 %vm14257_vm0, %v16330_v6  ;;  %v13064_v15 = vld [vmem:[%s16310_s5 + $0x18] sm:$0xff] }
  0xd1   : > { %v1352_v17 = vsel %vm372_vm1, %v13064_v15, 0 }
  0xd3   : > { %13234 = vmatmul.mubr.f32.vlgmr.msra.gmra.mrb[0].mxu1 %v442_v9 }
  0xd4   : > { %13237 = vmatpush3.msra.mxu1 %v823_v19  ;;  %13238 = vmatprep.mubr.msk.f32.mxu1 %vm14257_vm0, %v16330_v6  ;;  %v14540_v19 = vand.u32 4294901760, %v1352_v17 }
  0xd6   : > { %v14546_v24 = vsub.f32 %v1352_v17, %v14540_v19 }
  0xd7   : > { %13209 = vmatmul.mubr.f32.vlgmr.msra.gmra.mrb[0].mxu0 %v442_v9 }
  0xd8   : > { %1420 = vmatprep.mubr.f32.mxu0 %v16330_v6 }
  0xdb   : > { %13239 = vmatmul.mubr.f32.vlgmr.msra.gmra.mrb[0].mxu1 %v442_v9  ;;  %v14508_v9 = vrot.slane %v14469_v61, %v4556_v7 }
 0x1aa   : > { %v818_v27 = vpop.f32.mrb[0].mxu0 }
 0x1ab   : > { %v13210_v28 = vpop.f32.mrb[1].mxu0  ;;  %v1268_v29 = vmul.f32 %v818_v27, %v818_v27 }
 0x1ae   : > { %v1264_v30 = vpop.f32.mrb[0].mxu1 }
 0x1af   : > { %v1269_v31 = vsub.f32 %v1264_v30, %v1268_v29  ;;  %v13240_v32 = vpop.f32.mrb[1].mxu1  ;;  %v1424_v29 = vsub.f32 %v1422_v18, %v1423_v23  ;;  %v1434_v30 = vand.u32 4294901760, %v14546_v24 }
 0x1b1   : > { %v1270_v33 = vadd.f32 1e-05, %v1269_v31 }
 0x1b3   : > { %14155 = vrsqrt.f32 %v1270_v33 }
 0x1bd   : > { %v14156_v36 = vpop.eup %14155 }
 0x1be   : > { %v1272_v37 = vmul.f32 %v14156_v36, %v351_v35 }
 0x1c0   : > { %v1273_v38 = vmul.f32 %v1272_v37, %v818_v27  ;;  %v14553_v27 = vrot.slane %v14469_v61, %v1337_v21 }
 0x1c2   : > { %1275 = vrot.lane.b32.xlu1 %v1273_v38, %s16317_s14  ;;  %v1435_v38 = vsub.f32 %v14546_v24, %v1434_v30 }
 0x1c6   : > { %1281 = vperm.xlu1 %14143, %v1272_v37   ;;  %v1425_v37 = vand.u32 4294901760, %v1424_v29 }
 0x234   : > { %v1276_v39 = vpop.permute.xlu1 %1275 }
 0x235   : > { %v1278_v40 = vsub.f32 %v351_v35, %v1276_v39 }
 0x237   : > { %1288 = vperm.xlu0 %14144, %v1278_v40  }
 0x245   : > { %v1282_v41 = vpop.permute.xlu1 %1281 }
 0x246   : > { %v1284_v42 = vmul.f32 %v1282_v41, %v14387_v0  ;;  %v1285_v43 = vmul.f32 %v1282_v41, %v14390_v1  ;;  %v2941_v0 = vsub.s32 3, %v14454_v58 }
 0x248   : > { %v14485_v1 = vrot.slane %v14464_v60, %v2941_v0  ;;  %v14488_v2 = vrot.slane %v14469_v61, %v2941_v0  ;;  %v1327_v0 = vld [vmem:[%s16310_s5 + $0x8] sm:$0xff] }
 0x249   : > { %v1872_v10 = vsel %vm372_vm1, %v1327_v0, 0 }
 0x24a   : > { %v14605_v17 = vand.u32 4294901760, %v1872_v10 }
 0x2b6   : > { %v1289_v44 = vpop.permute.xlu0 %1288 }
 0x2b7   : > { %v1291_v45 = vadd.f32 %v1289_v44, %v1284_v42  ;;  %v1292_v46 = vadd.f32 %v1289_v44, %v1285_v43  ;;  %v1436_v42 = vand.u32 4294901760, %v1435_v38  ;;  %v13065_v38 = vld [vmem:[%s16310_s5 + $0x20] sm:$0xff] }
 0x2b9   : > { %v13061_v47 = vmul.f32 -1.442695, %v1291_v45  ;;  %v13062_v48 = vmul.f32 -1.442695, %v1292_v46 }
 0x2bb   : > { %14157 = vpow2.f32 %v13061_v47 }
 0x2bc   : > { %14159 = vpow2.f32 %v13062_v48 }
 0x2c5   : > { %v14158_v49 = vpop.eup %14157 }
 0x2c6   : > { %v14160_v50 = vpop.eup %14159  ;;  %v1299_v51 = vadd.f32 1.0, %v14158_v49  ;;  %v1318_v49 = vsub.s32 0, %v14454_v58 }
 0x2c7   : > { %v1300_v52 = vadd.f32 1.0, %v14160_v50 }
 0x2c8   : > { %14161 = vrcp.f32 %v1299_v51  ;;  %v14572_v51 = vrot.slane %v14469_v61, %v1318_v49  ;;  %v14584_v57 = vrot.slane %v14464_v60, %v1318_v49 }
 0x2c9   : > { %14163 = vrcp.f32 %v1300_v52 }
 0x2d2   : > { %v14162_v53 = vpop.eup %14161 }
 0x2d3   : > { %v14164_v54 = vpop.eup %14163  ;;  %v14446_v55 = vmul.f32 %v14162_v53, %v1291_v45 }
 0x2d4   : > { %v14448_v56 = vmul.f32 %v14164_v54, %v1292_v46  ;;  %v1326_v54 = vld [vmem:[%s16310_s5] sm:$0xff] }
 0x2d5   : > { %1328 = vrot.lane.b32.xlu1 %v14446_v55, %s16315_s16  ;;  %v1869_v61 = vsel %vm372_vm1, %v1326_v54, 0 }
 0x2d6   : > { %4549 = vrot.lane.b32.xlu0 %v14448_v56, %s16325_s17  ;;  %v14597_v7 = vand.u32 4294901760, %v1869_v61 }
 0x2d8   : > { %v1942_v15 = vsub.f32 %v1869_v61, %v14597_v7 }
 0x2d9   : > { %1330 = vrot.lane.b32.xlu1 %v14448_v56, %s16315_s16  ;;  %s16321_s16 = smov 111  }
 0x2da   : > { %5093 = vrot.lane.b32.xlu0 %v14448_v56, %s16323_s23 }
 0x2dd   : > { %1307 = vrot.lane.b32.xlu1 %v14446_v55, %s14264_s29 }
 0x2de   : > { %5637 = vrot.lane.b32.xlu0 %v14448_v56, %s16321_s16 }
 0x2e1   : > { %1309 = vrot.lane.b32.xlu1 %v14448_v56, %s14264_s29 }
 0x2e5   : > { %2388 = vrot.lane.b32.xlu1 %v14446_v55, %s16319_s24 }
 0x2e9   : > { %2390 = vrot.lane.b32.xlu1 %v14448_v56, %s16319_s24 }
 0x2ed   : > { %2932 = vrot.lane.b32.xlu1 %v14446_v55, %s16317_s14 }
 0x2f1   : > { %2934 = vrot.lane.b32.xlu1 %v14448_v56, %s16317_s14  ;;  %s14269_s14 = smov 125  }
 0x2f5   : > { %4003 = vrot.lane.b32.xlu1 %v14446_v55, %s14267_s26 }
 0x2f9   : > { %4005 = vrot.lane.b32.xlu1 %v14448_v56, %s14267_s26 }
 0x2fd   : > { %4547 = vrot.lane.b32.xlu1 %v14446_v55, %s16325_s17  ;;  %s16402_s17 = smov 111  }
 0x301   : > { %5091 = vrot.lane.b32.xlu1 %v14446_v55, %s16323_s23  ;;  %s16403_s23 = smov 16  }
 0x305   : > { %5635 = vrot.lane.b32.xlu1 %v14446_v55, %s16321_s16  ;;  %s350_s16 = scalar_lea.vmem %s16306_s1, %s13106_s22  ;;  %s16397_s22 = smov 1  }
 0x347   : > { %v1329_v22 = vpop.permute.xlu1 %1328 }
 0x34b   : > { %v1331_v28 = vpop.permute.xlu1 %1330 }
 0x34c   : > { %v1333_v31 = vsel %vm1332_vm2, %v1329_v22, %v1331_v28  ;;  %v1334_v32 = vsel %vm1332_vm2, %v1331_v28, %v1329_v22  ;;  %v1943_v22 = vand.u32 4294901760, %v1942_v15 }
 0x34d   : > { %v1343_v33 = vmul.f32 %v14550_v25, %v1334_v32  ;;  %v1344_v34 = vmul.f32 %v14553_v27, %v1333_v31 }
 0x34e   : > { %v1944_v29 = vsub.f32 %v1942_v15, %v1943_v22 }
 0x34f   : > { %v1354_v35 = vand.u32 4294901760, %v1344_v34  ;;  %v1356_v36 = vand.u32 4294901760, %v1343_v33  ;;  %v1308_v48 = vpop.permute.xlu1 %1307 }
 0x350   : > { %v1945_v32 = vand.u32 4294901760, %v1944_v29  ;;  %v13068_v29 = vld [vmem:[%s16310_s5 + $0x38] sm:$0xff] }
 0x351   : > { %v1444_v39 = vsub.f32 %v1344_v34, %v1354_v35  ;;  %v1450_v40 = vsub.f32 %v1343_v33, %v1356_v36  ;;  %1355 = vmatprep.subr.mxu0 %v1354_v35 }
 0x352   : > { %1357 = vmatpush1.msra.mxu0 %v1356_v36 }
 0x353   : > { %v1451_v41 = vand.u32 4294901760, %v1450_v40  ;;  %1426 = vmatmul.mubr.f32.vlgmr.msra.gmra.mrb[2].mxu0 %v1425_v37  ;;  %v1445_v43 = vand.u32 4294901760, %v1444_v39  ;;  %v1310_v50 = vpop.permute.xlu1 %1309 }
 0x354   : > { %1431 = vmatprep.mubr.f32.mxu0 %v16330_v6  ;;  %v1314_v52 = vsel %vm1313_vm3, %v1308_v48, %v1310_v50  ;;  %v1315_v58 = vsel %vm1313_vm3, %v1310_v50, %v1308_v48 }
 0x355   : > { %v1446_v44 = vsub.f32 %v1444_v39, %v1445_v43  ;;  %v1452_v45 = vsub.f32 %v1450_v40, %v1451_v41  ;;  %v1325_v53 = vmul.f32 %v14572_v51, %v1314_v52  ;;  %v1324_v3 = vmul.f32 %v14584_v57, %v1315_v58 }
 0x357   : > { %1437 = vmatmul.mubr.f32.gmra.mrb[4].mxu0 %v1436_v42  ;;  %v1447_v46 = vand.u32 4294901760, %v1446_v44  ;;  %v1453_v47 = vand.u32 4294901760, %v1452_v45  ;;  %v14588_v59 = vand.u32 4294901760, %v1325_v53  ;;  %v14601_v13 = vand.u32 4294901760, %v1324_v3  ;;  %v13066_v42 = vld [vmem:[%s16310_s5 + $0x28] sm:$0xff] }
 0x358   : > { %1517 = vmatprep.mubr.f32.mxu0 %v16330_v6 }
 0x359   : > { %1448 = vmatprep.subr.mxu0 %v1447_v46  ;;  %v1964_v60 = vsub.f32 %v1325_v53, %v14588_v59  ;;  %v2412_v46 = vsel %vm372_vm1, %v13066_v42, 0 }
 0x35a   : > { %1454 = vmatpush1.msra.mxu0 %v1453_v47  ;;  %v14655_v50 = vand.u32 4294901760, %v2412_v46 }
 0x35b   : > { %1519 = vmatmul.mubr.f32.vlgmr.msra.gmra.mrb[2].mxu0 %v14536_v16  ;;  %1534 = vmatprep.subr.mxu0 %v1444_v39  ;;  %v1965_v14 = vand.u32 4294901760, %v1964_v60 }
 0x35c   : > { %1537 = vmatpush1.msra.mxu0 %v1450_v40  ;;  %1524 = vmatprep.mubr.f32.mxu0 %v16330_v6  ;;  %v2493_v58 = vsub.f32 %v2412_v46, %v14655_v50 }
 0x35d   : > { %1618 = vmatprep.subr.mxu0 %v1354_v35  ;;  %v1966_v21 = vsub.f32 %v1964_v60, %v1965_v14 }
 0x35f   : > { %1526 = vmatmul.mubr.f32.gmra.mrb[4].mxu0 %v14540_v19  ;;  %v1967_v28 = vand.u32 4294901760, %v1966_v21 }
 0x360   : > { %1600 = vmatprep.mubr.f32.mxu0 %v16330_v6 }
 0x363   : > { %1603 = vmatmul.mubr.f32.vlgmr.msra.gmra.mrb[2].mxu0 %v1422_v18  ;;  %v1970_v18 = vsub.f32 %v1324_v3, %v14601_v13  ;;  %v2494_v3 = vand.u32 4294901760, %v2493_v58 }
 0x364   : > { %1620 = vmatpush1.msra.mxu0 %v1356_v36  ;;  %1608 = vmatprep.mubr.f32.mxu0 %v16330_v6 }
 0x365   : > { %1705 = vmatprep.subr.mxu0 %v1445_v43 }
 0x367   : > { %1611 = vmatmul.mubr.f32.gmra.mrb[4].mxu0 %v14546_v24  ;;  %v1971_v24 = vand.u32 4294901760, %v1970_v18 }
 0x368   : > { %1683 = vmatprep.mubr.f32.mxu0 %v16330_v6 }
 0x369   : > { %v1972_v31 = vsub.f32 %v1970_v18, %v1971_v24 }
 0x36b   : > { %1687 = vmatmul.mubr.f32.vlgmr.msra.gmra.mrb[2].mxu0 %v1423_v23  ;;  %v1953_v23 = vsub.f32 %v1872_v10, %v14605_v17  ;;  %v1973_v34 = vand.u32 4294901760, %v1972_v31 }
 0x36c   : > { %1709 = vmatpush1.msra.mxu0 %v1451_v41  ;;  %1692 = vmatprep.mubr.f32.mxu0 %v16330_v6  ;;  %v2409_v41 = vsel %vm372_vm1, %v13065_v38, 0 }
 0x36d   : > { %1788 = vmatprep.subr.mxu0 %v1354_v35  ;;  %v14647_v45 = vand.u32 4294901760, %v2409_v41 }
 0x36f   : > { %1696 = vmatmul.mubr.f32.gmra.mrb[4].mxu0 %v1434_v30  ;;  %v1954_v30 = vand.u32 4294901760, %v1953_v23  ;;  %v2482_v49 = vsub.f32 %v2409_v41, %v14647_v45 }
 0x370   : > { %1772 = vmatprep.mubr.f32.mxu0 %v16330_v6 }
 0x371   : > { %v1955_v33 = vsub.f32 %v1953_v23, %v1954_v30  ;;  %v2483_v54 = vand.u32 4294901760, %v2482_v49 }
 0x373   : > { %1774 = vmatmul.mubr.f32.vlgmr.msra.gmra.mrb[2].mxu0 %v14536_v16  ;;  %v1956_v35 = vand.u32 4294901760, %v1955_v33  ;;  %v2484_v0 = vsub.f32 %v2482_v49, %v2483_v54  ;;  %v2956_v33 = vsel %vm372_vm1, %v13068_v29, 0 }
 0x374   : > { %1790 = vmatpush1.msra.mxu0 %v1356_v36  ;;  %1779 = vmatprep.mubr.f32.mxu0 %v16330_v6 }
 0x375   : > { %1875 = vmatprep.subr.mxu0 %v14588_v59  ;;  %v2485_v10 = vand.u32 4294901760, %v2484_v0 }
 0x377   : > { %1781 = vmatmul.mubr.f32.gmra.mrb[4].mxu0 %v14540_v19 }
 0x378   : > { %1853 = vmatprep.mubr.f32.mxu0 %v16330_v6 }
 0x37b   : > { %1855 = vmatmul.mubr.f32.vlgmr.msra.gmra.mrb[2].mxu0 %v14536_v16  ;;  %v2389_v16 = vpop.permute.xlu1 %2388 }
 0x37c   : > { %1877 = vmatpush1.msra.mxu0 %v14601_v13  ;;  %1860 = vmatprep.mubr.f32.mxu0 %v16330_v6 }
 0x37d   : > { %1968 = vmatprep.subr.mxu0 %v1967_v28 }
 0x37f   : > { %1862 = vmatmul.mubr.f32.gmra.mrb[4].mxu0 %v14540_v19  ;;  %v2391_v19 = vpop.permute.xlu1 %2390 }
 0x380   : > { %1940 = vmatprep.mubr.f32.mxu0 %v16330_v6  ;;  %v2393_v36 = vsel %vm2392_vm4, %v2389_v16, %v2391_v19  ;;  %v2394_v39 = vsel %vm2392_vm4, %v2391_v19, %v2389_v16  ;;  %v14706_v19 = vand.u32 4294901760, %v2956_v33 }
 0x381   : > { %v2404_v37 = vmul.f32 %v14475_v63, %v2393_v36  ;;  %v2403_v43 = vmul.f32 %v14472_v62, %v2394_v39 }
 0x382   : > { %v3037_v39 = vsub.f32 %v2956_v33, %v14706_v19 }
 0x383   : > { %1946 = vmatmul.mubr.f32.vlgmr.msra.gmra.mrb[2].mxu0 %v1945_v32  ;;  %v14637_v40 = vand.u32 4294901760, %v2404_v37  ;;  %v14651_v47 = vand.u32 4294901760, %v2403_v43 }
 0x384   : > { %1974 = vmatpush1.msra.mxu0 %v1973_v34  ;;  %1951 = vmatprep.mubr.f32.mxu0 %v16330_v6 }
 0x385   : > { %2054 = vmatprep.subr.mxu0 %v1964_v60  ;;  %v2504_v44 = vsub.f32 %v2404_v37, %v14637_v40  ;;  %v2510_v52 = vsub.f32 %v2403_v43, %v14651_v47  ;;  %v3038_v43 = vand.u32 4294901760, %v3037_v39 }
 0x387   : > { %1957 = vmatmul.mubr.f32.gmra.mrb[4].mxu0 %v1956_v35  ;;  %v2505_v48 = vand.u32 4294901760, %v2504_v44 }
 0x388   : > { %2037 = vmatprep.mubr.f32.mxu0 %v16330_v6 }
 0x389   : > { %v2506_v53 = vsub.f32 %v2504_v44, %v2505_v48 }
 0x38b   : > { %2039 = vmatmul.mubr.f32.vlgmr.msra.gmra.mrb[2].mxu0 %v14597_v7  ;;  %v2507_v61 = vand.u32 4294901760, %v2506_v53  ;;  %v13070_v53 = vld [vmem:[%s16310_s5 + $0x48] sm:$0xff] }
 0x38c   : > { %2057 = vmatpush1.msra.mxu0 %v1970_v18  ;;  %2044 = vmatprep.mubr.f32.mxu0 %v16330_v6 }
 0x38d   : > { %2138 = vmatprep.subr.mxu0 %v14588_v59 }
 0x38f   : > { %2046 = vmatmul.mubr.f32.gmra.mrb[4].mxu0 %v14605_v17 }
 0x390   : > { %2120 = vmatprep.mubr.f32.mxu0 %v16330_v6 }
 0x393   : > { %2123 = vmatmul.mubr.f32.vlgmr.msra.gmra.mrb[2].mxu0 %v1942_v15 }
 0x394   : > { %2140 = vmatpush1.msra.mxu0 %v14601_v13  ;;  %2128 = vmatprep.mubr.f32.mxu0 %v16330_v6 }
 0x395   : > { %2225 = vmatprep.subr.mxu0 %v1965_v14 }
 0x397   : > { %2131 = vmatmul.mubr.f32.gmra.mrb[4].mxu0 %v1953_v23 }
 0x398   : > { %2203 = vmatprep.mubr.f32.mxu0 %v16330_v6 }
 0x39b   : > { %2207 = vmatmul.mubr.f32.vlgmr.msra.gmra.mrb[2].mxu0 %v1943_v22  ;;  %v13067_v22 = vld [vmem:[%s16310_s5 + $0x30] sm:$0xff] }
 0x39c   : > { %2229 = vmatpush1.msra.mxu0 %v1971_v24  ;;  %2212 = vmatprep.mubr.f32.mxu0 %v16330_v6  ;;  %v2953_v28 = vsel %vm372_vm1, %v13067_v22, 0 }
 0x39d   : > { %2308 = vmatprep.subr.mxu0 %v14588_v59  ;;  %v2511_v59 = vand.u32 4294901760, %v2510_v52  ;;  %v14698_v32 = vand.u32 4294901760, %v2953_v28 }
 0x39f   : > { %2216 = vmatmul.mubr.f32.gmra.mrb[4].mxu0 %v1954_v30  ;;  %v2512_v60 = vsub.f32 %v2510_v52, %v2511_v59  ;;  %v3026_v16 = vsub.f32 %v2953_v28, %v14698_v32 }
 0x3a0   : > { %2292 = vmatprep.mubr.f32.mxu0 %v16330_v6 }
 0x3a1   : > { %v2513_v14 = vand.u32 4294901760, %v2512_v60  ;;  %v3027_v38 = vand.u32 4294901760, %v3026_v16 }
 0x3a3   : > { %2294 = vmatmul.mubr.f32.vlgmr.msra.gmra.mrb[2].mxu0 %v14597_v7  ;;  %v3028_v42 = vsub.f32 %v3026_v16, %v3027_v38 }
 0x3a4   : > { %2310 = vmatpush1.msra.mxu0 %v14601_v13  ;;  %2299 = vmatprep.mubr.f32.mxu0 %v16330_v6  ;;  %v2495_v13 = vsub.f32 %v2493_v58, %v2494_v3 }
 0x3a5   : > { %2415 = vmatprep.subr.mxu0 %v14637_v40  ;;  %v3029_v46 = vand.u32 4294901760, %v3028_v42 }
 0x3a6   : > { %v2496_v15 = vand.u32 4294901760, %v2495_v13 }
 0x3a7   : > { %2301 = vmatmul.mubr.f32.gmra.mrb[4].mxu0 %v14605_v17 }
 0x3a8   : > { %2373 = vmatprep.mubr.f32.mxu0 %v16330_v6 }
 0x3ab   : > { %2375 = vmatmul.mubr.f32.vlgmr.msra.gmra.mrb[2].mxu0 %v14597_v7  ;;  %v2933_v7 = vpop.permute.xlu1 %2932 }
 0x3ac   : > { %2417 = vmatpush1.msra.mxu0 %v14651_v47  ;;  %2380 = vmatprep.mubr.f32.mxu0 %v16330_v6 }
 0x3ad   : > { %2508 = vmatprep.subr.mxu0 %v2507_v61  ;;  %v14749_v61 = vand.u32 4294901760, %v14446_v55 }
 0x3af   : > { %2382 = vmatmul.mubr.f32.gmra.mrb[4].mxu0 %v14605_v17  ;;  %v2935_v17 = vpop.permute.xlu1 %2934 }
 0x3b0   : > { %2480 = vmatprep.mubr.f32.mxu0 %v16330_v6  ;;  %v2937_v18 = vsel %vm2936_vm5, %v2933_v7, %v2935_v17  ;;  %v2938_v23 = vsel %vm2936_vm5, %v2935_v17, %v2933_v7 }
 0x3b1   : > { %v2948_v21 = vmul.f32 %v14488_v2, %v2937_v18  ;;  %v2947_v30 = vmul.f32 %v14485_v1, %v2938_v23 }
 0x3b3   : > { %2486 = vmatmul.mubr.f32.vlgmr.msra.gmra.mrb[2].mxu0 %v2485_v10  ;;  %v14688_v24 = vand.u32 4294901760, %v2948_v21  ;;  %v14702_v34 = vand.u32 4294901760, %v2947_v30  ;;  %v4004_v28 = vpop.permute.xlu1 %4003 }
 0x3b4   : > { %2514 = vmatpush1.msra.mxu0 %v2513_v14  ;;  %2491 = vmatprep.mubr.f32.mxu0 %v16330_v6 }
 0x3b5   : > { %2594 = vmatprep.subr.mxu0 %v2504_v44  ;;  %v3048_v31 = vsub.f32 %v2948_v21, %v14688_v24  ;;  %v3054_v36 = vsub.f32 %v2947_v30, %v14702_v34 }
 0x3b7   : > { %2497 = vmatmul.mubr.f32.gmra.mrb[4].mxu0 %v2496_v15  ;;  %v3049_v35 = vand.u32 4294901760, %v3048_v31  ;;  %v4006_v29 = vpop.permute.xlu1 %4005 }
 0x3b8   : > { %2577 = vmatprep.mubr.f32.mxu0 %v16330_v6  ;;  %v4009_v30 = vsel %vm4007_vm6, %v4006_v29, %v4004_v28  ;;  %v4008_v33 = vsel %vm4007_vm6, %v4004_v28, %v4006_v29 }
 0x3b9   : > { %v3050_v37 = vsub.f32 %v3048_v31, %v3049_v35 }
 0x3bb   : > { %2579 = vmatmul.mubr.f32.vlgmr.msra.gmra.mrb[2].mxu0 %v14647_v45  ;;  %v3051_v41 = vand.u32 4294901760, %v3050_v37 }
 0x3bc   : > { %2597 = vmatpush1.msra.mxu0 %v2510_v52  ;;  %2584 = vmatprep.mubr.f32.mxu0 %v16330_v6 }
 0x3bd   : > { %2678 = vmatprep.subr.mxu0 %v14637_v40 }
 0x3bf   : > { %2586 = vmatmul.mubr.f32.gmra.mrb[4].mxu0 %v14655_v50 }
 0x3c0   : > { %2660 = vmatprep.mubr.f32.mxu0 %v16330_v6 }
 0x3c3   : > { %2663 = vmatmul.mubr.f32.vlgmr.msra.gmra.mrb[2].mxu0 %v2482_v49 }
 0x3c4   : > { %2680 = vmatpush1.msra.mxu0 %v14651_v47  ;;  %2668 = vmatprep.mubr.f32.mxu0 %v16330_v6 }
 0x3c5   : > { %2765 = vmatprep.subr.mxu0 %v2505_v48 }
 0x3c7   : > { %2671 = vmatmul.mubr.f32.gmra.mrb[4].mxu0 %v2493_v58 }
 0x3c8   : > { %2743 = vmatprep.mubr.f32.mxu0 %v16330_v6 }
 0x3cb   : > { %2747 = vmatmul.mubr.f32.vlgmr.msra.gmra.mrb[2].mxu0 %v2483_v54 }
 0x3cc   : > { %2769 = vmatpush1.msra.mxu0 %v2511_v59  ;;  %2752 = vmatprep.mubr.f32.mxu0 %v16330_v6  ;;  %v3483_v59 = vsel %vm372_vm1, %v13070_v53, 0 }
 0x3cd   : > { %2848 = vmatprep.subr.mxu0 %v14637_v40  ;;  %v3055_v40 = vand.u32 4294901760, %v3054_v36  ;;  %v14753_v60 = vand.u32 4294901760, %v3483_v59 }
 0x3cf   : > { %2756 = vmatmul.mubr.f32.gmra.mrb[4].mxu0 %v2494_v3  ;;  %v3056_v44 = vsub.f32 %v3054_v36, %v3055_v40  ;;  %v3564_v14 = vsub.f32 %v3483_v59, %v14753_v60 }
 0x3d0   : > { %2832 = vmatprep.mubr.f32.mxu0 %v16330_v6 }
 0x3d1   : > { %v3057_v48 = vand.u32 4294901760, %v3056_v44  ;;  %v3565_v18 = vand.u32 4294901760, %v3564_v14 }
 0x3d3   : > { %2834 = vmatmul.mubr.f32.vlgmr.msra.gmra.mrb[2].mxu0 %v14647_v45  ;;  %v3566_v22 = vsub.f32 %v3564_v14, %v3565_v18 }
 0x3d4   : > { %2850 = vmatpush1.msra.mxu0 %v14651_v47  ;;  %2839 = vmatprep.mubr.f32.mxu0 %v16330_v6  ;;  %v3039_v47 = vsub.f32 %v3037_v39, %v3038_v43 }
 0x3d5   : > { %2959 = vmatprep.subr.mxu0 %v14688_v24 }
 0x3d6   : > { %v3040_v49 = vand.u32 4294901760, %v3039_v47 }
 0x3d7   : > { %2841 = vmatmul.mubr.f32.gmra.mrb[4].mxu0 %v14655_v50 }
 0x3d8   : > { %2913 = vmatprep.mubr.f32.mxu0 %v16330_v6 }
 0x3db   : > { %2915 = vmatmul.mubr.f32.vlgmr.msra.gmra.mrb[2].mxu0 %v14647_v45  ;;  %v13069_v45 = vld [vmem:[%s16310_s5 + $0x40] sm:$0xff] }
 0x3dc   : > { %2961 = vmatpush1.msra.mxu0 %v14702_v34  ;;  %2920 = vmatprep.mubr.f32.mxu0 %v16330_v6  ;;  %v3480_v52 = vsel %vm372_vm1, %v13069_v45, 0 }
 0x3dd   : > { %3052 = vmatprep.subr.mxu0 %v3051_v41  ;;  %v14744_v58 = vand.u32 4294901760, %v3480_v52 }
 0x3df   : > { %2922 = vmatmul.mubr.f32.gmra.mrb[4].mxu0 %v14655_v50  ;;  %v14734_v50 = vand.u32 4294901760, %v14448_v56  ;;  %v3553_v3 = vsub.f32 %v3480_v52, %v14744_v58 }
 0x3e0   : > { %3024 = vmatprep.mubr.f32.mxu0 %v16330_v6 }
 0x3e1   : > { %v3575_v54 = vsub.f32 %v14448_v56, %v14734_v50  ;;  %v3581_v56 = vsub.f32 %v14446_v55, %v14749_v61  ;;  %v3554_v13 = vand.u32 4294901760, %v3553_v3 }
 0x3e3   : > { %3030 = vmatmul.mubr.f32.vlgmr.msra.gmra.mrb[2].mxu0 %v3029_v46  ;;  %v3576_v0 = vand.u32 4294901760, %v3575_v54  ;;  %v3582_v15 = vand.u32 4294901760, %v3581_v56  ;;  %v3555_v17 = vsub.f32 %v3553_v3, %v3554_v13 }
 0x3e4   : > { %3058 = vmatpush1.msra.mxu0 %v3057_v48  ;;  %3035 = vmatprep.mubr.f32.mxu0 %v16330_v6 }
 0x3e5   : > { %3138 = vmatprep.subr.mxu0 %v3048_v31  ;;  %v3577_v10 = vsub.f32 %v3575_v54, %v3576_v0  ;;  %v3583_v55 = vsub.f32 %v3581_v56, %v3582_v15  ;;  %v3556_v21 = vand.u32 4294901760, %v3555_v17  ;;  %v4019_v31 = vmul.f32 %v14499_v5, %v4009_v30 }
 0x3e7   : > { %3041 = vmatmul.mubr.f32.gmra.mrb[4].mxu0 %v3040_v49  ;;  %v3578_v7 = vand.u32 4294901760, %v3577_v10  ;;  %v3584_v23 = vand.u32 4294901760, %v3583_v55 }
 0x3e8   : > { %3121 = vmatprep.mubr.f32.mxu0 %v16330_v6 }
 0x3eb   : > { %3123 = vmatmul.mubr.f32.vlgmr.msra.gmra.mrb[2].mxu0 %v14698_v32 }
 0x3ec   : > { %3141 = vmatpush1.msra.mxu0 %v3054_v36  ;;  %3128 = vmatprep.mubr.f32.mxu0 %v16330_v6 }
 0x3ed   : > { %3222 = vmatprep.subr.mxu0 %v14688_v24 }
 0x3ef   : > { %3130 = vmatmul.mubr.f32.gmra.mrb[4].mxu0 %v14706_v19 }
 0x3f0   : > { %3204 = vmatprep.mubr.f32.mxu0 %v16330_v6 }
 0x3f3   : > { %3207 = vmatmul.mubr.f32.vlgmr.msra.gmra.mrb[2].mxu0 %v3026_v16  ;;  %v13072_v16 = vld [vmem:[%s16310_s5 + $0x58] sm:$0xff] }
 0x3f4   : > { %3224 = vmatpush1.msra.mxu0 %v14702_v34  ;;  %3212 = vmatprep.mubr.f32.mxu0 %v16330_v6 }
 0x3f5   : > { %3309 = vmatprep.subr.mxu0 %v3049_v35 }
 0x3f7   : > { %3215 = vmatmul.mubr.f32.gmra.mrb[4].mxu0 %v3037_v39 }
 0x3f8   : > { %3287 = vmatprep.mubr.f32.mxu0 %v16330_v6 }
 0x3fb   : > { %3291 = vmatmul.mubr.f32.vlgmr.msra.gmra.mrb[2].mxu0 %v3027_v38  ;;  %v4027_v38 = vsel %vm372_vm1, %v13072_v16, 0 }
 0x3fc   : > { %3313 = vmatpush1.msra.mxu0 %v3055_v40  ;;  %3296 = vmatprep.mubr.f32.mxu0 %v16330_v6  ;;  %v14805_v42 = vand.u32 4294901760, %v4027_v38 }
 0x3fd   : > { %3392 = vmatprep.subr.mxu0 %v14688_v24  ;;  %v3567_v24 = vand.u32 4294901760, %v3566_v22 }
 0x3fe   : > { %v4108_v47 = vsub.f32 %v4027_v38, %v14805_v42 }
 0x3ff   : > { %3300 = vmatmul.mubr.f32.gmra.mrb[4].mxu0 %v3038_v43 }
 0x400   : > { %3376 = vmatprep.mubr.f32.mxu0 %v16330_v6 }
 0x403   : > { %3378 = vmatmul.mubr.f32.vlgmr.msra.gmra.mrb[2].mxu0 %v14698_v32 }
 0x404   : > { %3394 = vmatpush1.msra.mxu0 %v14702_v34  ;;  %3383 = vmatprep.mubr.f32.mxu0 %v16330_v6  ;;  %v14787_v34 = vand.u32 4294901760, %v4019_v31 }
 0x405   : > { %3486 = vmatprep.subr.mxu0 %v14734_v50 }
 0x406   : > { %v4119_v36 = vsub.f32 %v4019_v31, %v14787_v34 }
 0x407   : > { %3385 = vmatmul.mubr.f32.gmra.mrb[4].mxu0 %v14706_v19 }
 0x408   : > { %3457 = vmatprep.mubr.f32.mxu0 %v16330_v6  ;;  %v4120_v40 = vand.u32 4294901760, %v4119_v36 }
 0x40a   : > { %v4121_v44 = vsub.f32 %v4119_v36, %v4120_v40 }
 0x40b   : > { %3459 = vmatmul.mubr.f32.vlgmr.msra.gmra.mrb[2].mxu0 %v14698_v32  ;;  %v13071_v32 = vld [vmem:[%s16310_s5 + $0x50] sm:$0xff] }
 0x40c   : > { %3488 = vmatpush1.msra.mxu0 %v14749_v61  ;;  %3464 = vmatprep.mubr.f32.mxu0 %v16330_v6  ;;  %v4024_v35 = vsel %vm372_vm1, %v13071_v32, 0  ;;  %v4122_v49 = vand.u32 4294901760, %v4121_v44  ;;  %v6193_v44 = vld [vmem:[%s350_s16] sm:$0xff] }
 0x40d   : > { %3579 = vmatprep.subr.mxu0 %v3578_v7  ;;  %v14797_v37 = vand.u32 4294901760, %v4024_v35 }
 0x40f   : > { %3466 = vmatmul.mubr.f32.gmra.mrb[4].mxu0 %v14706_v19  ;;  %v4018_v19 = vmul.f32 %v14496_v4, %v4008_v33  ;;  %v4097_v41 = vsub.f32 %v4024_v35, %v14797_v37 }
 0x410   : > { %3551 = vmatprep.mubr.f32.mxu0 %v16330_v6 }
 0x411   : > { %v14801_v39 = vand.u32 4294901760, %v4018_v19  ;;  %v4098_v46 = vand.u32 4294901760, %v4097_v41 }
 0x413   : > { %3557 = vmatmul.mubr.f32.vlgmr.msra.gmra.mrb[2].mxu0 %v3556_v21  ;;  %v4125_v43 = vsub.f32 %v4018_v19, %v14801_v39  ;;  %v4099_v45 = vsub.f32 %v4097_v41, %v4098_v46 }
 0x414   : > { %3585 = vmatpush1.msra.mxu0 %v3584_v23  ;;  %3562 = vmatprep.mubr.f32.mxu0 %v16330_v6 }
 0x415   : > { %3665 = vmatprep.subr.mxu0 %v3575_v54  ;;  %v4126_v48 = vand.u32 4294901760, %v4125_v43  ;;  %v4100_v53 = vand.u32 4294901760, %v4099_v45 }
 0x417   : > { %3568 = vmatmul.mubr.f32.gmra.mrb[4].mxu0 %v3567_v24  ;;  %v4127_v52 = vsub.f32 %v4125_v43, %v4126_v48 }
 0x418   : > { %3648 = vmatprep.mubr.f32.mxu0 %v16330_v6 }
 0x419   : > { %v4128_v59 = vand.u32 4294901760, %v4127_v52  ;;  %v13076_v52 = vld [vmem:[%s16310_s5 + $0x78] sm:$0xff] }
 0x41b   : > { %3650 = vmatmul.mubr.f32.vlgmr.msra.gmra.mrb[2].mxu0 %v14744_v58 }
 0x41c   : > { %3668 = vmatpush1.msra.mxu0 %v3581_v56  ;;  %3655 = vmatprep.mubr.f32.mxu0 %v16330_v6  ;;  %v13073_v56 = vld [vmem:[%s16310_s5 + $0x60] sm:$0xff] }
 0x41d   : > { %3749 = vmatprep.subr.mxu0 %v14734_v50 }
 0x41f   : > { %3657 = vmatmul.mubr.f32.gmra.mrb[4].mxu0 %v14753_v60 }
 0x420   : > { %3731 = vmatprep.mubr.f32.mxu0 %v16330_v6 }
 0x423   : > { %3734 = vmatmul.mubr.f32.vlgmr.msra.gmra.mrb[2].mxu0 %v3553_v3 }
 0x424   : > { %3751 = vmatpush1.msra.mxu0 %v14749_v61  ;;  %3739 = vmatprep.mubr.f32.mxu0 %v16330_v6 }
 0x425   : > { %3836 = vmatprep.subr.mxu0 %v3576_v0  ;;  %v4550_v0 = vpop.permute.xlu0 %4549 }
 0x427   : > { %3742 = vmatmul.mubr.f32.gmra.mrb[4].mxu0 %v3564_v14  ;;  %v4568_v14 = vsel %vm372_vm1, %v13073_v56, 0 }
 0x428   : > { %3814 = vmatprep.mubr.f32.mxu0 %v16330_v6 }
 0x42b   : > { %3818 = vmatmul.mubr.f32.vlgmr.msra.gmra.mrb[2].mxu0 %v3554_v13 }
 0x42c   : > { %3840 = vmatpush1.msra.mxu0 %v3582_v15  ;;  %3823 = vmatprep.mubr.f32.mxu0 %v16330_v6  ;;  %v13074_v15 = vld [vmem:[%s16310_s5 + $0x68] sm:$0xff] }
 0x42d   : > { %3919 = vmatprep.subr.mxu0 %v14734_v50  ;;  %v4109_v50 = vand.u32 4294901760, %v4108_v47  ;;  %v4571_v55 = vsel %vm372_vm1, %v13074_v15, 0 }
 0x42e   : > { %v14858_v24 = vand.u32 4294901760, %v4571_v55 }
 0x42f   : > { %3827 = vmatmul.mubr.f32.gmra.mrb[4].mxu0 %v3565_v18  ;;  %v4110_v54 = vsub.f32 %v4108_v47, %v4109_v50  ;;  %v14848_v18 = vand.u32 4294901760, %v4568_v14 }
 0x430   : > { %3903 = vmatprep.mubr.f32.mxu0 %v16330_v6  ;;  %v14867_v31 = vsub.f32 %v4571_v55, %v14858_v24 }
 0x431   : > { %v14856_v23 = vsub.f32 %v4568_v14, %v14848_v18 }
 0x432   : > { %v4653_v35 = vand.u32 4294901760, %v14867_v31 }
 0x433   : > { %3905 = vmatmul.mubr.f32.vlgmr.msra.gmra.mrb[2].mxu0 %v14744_v58  ;;  %v4642_v30 = vand.u32 4294901760, %v14856_v23 }
 0x434   : > { %3921 = vmatpush1.msra.mxu0 %v14749_v61  ;;  %3910 = vmatprep.mubr.f32.mxu0 %v16330_v6  ;;  %v4111_v61 = vand.u32 4294901760, %v4110_v54 }
 0x435   : > { %4030 = vmatprep.subr.mxu0 %v14787_v34 }
 0x437   : > { %3912 = vmatmul.mubr.f32.gmra.mrb[4].mxu0 %v14753_v60 }
 0x438   : > { %3984 = vmatprep.mubr.f32.mxu0 %v16330_v6 }
 0x43b   : > { %3986 = vmatmul.mubr.f32.vlgmr.msra.gmra.mrb[2].mxu0 %v14744_v58  ;;  %v4548_v58 = vpop.permute.xlu1 %4547 }
 0x43c   : > { %4032 = vmatpush1.msra.mxu0 %v14801_v39  ;;  %3991 = vmatprep.mubr.f32.mxu0 %v16330_v6  ;;  %v4553_v3 = vsel %vm4551_vm7, %v4550_v0, %v4548_v58  ;;  %v4552_v10 = vsel %vm4551_vm7, %v4548_v58, %v4550_v0 }
 0x43d   : > { %4123 = vmatprep.subr.mxu0 %v4122_v49  ;;  %v4562_v7 = vmul.f32 %v14505_v8, %v4552_v10  ;;  %v13075_v49 = vld [vmem:[%s16310_s5 + $0x70] sm:$0xff] }
 0x43f   : > { %3993 = vmatmul.mubr.f32.gmra.mrb[4].mxu0 %v14753_v60  ;;  %v4563_v60 = vmul.f32 %v14508_v9, %v4553_v3  ;;  %v14852_v21 = vand.u32 4294901760, %v4562_v7 }
 0x440   : > { %4095 = vmatprep.mubr.f32.mxu0 %v16330_v6 }
 0x441   : > { %v14838_v13 = vand.u32 4294901760, %v4563_v60  ;;  %v4669_v28 = vsub.f32 %v4562_v7, %v14852_v21 }
 0x443   : > { %4101 = vmatmul.mubr.f32.vlgmr.msra.gmra.mrb[2].mxu0 %v4100_v53  ;;  %v4663_v17 = vsub.f32 %v4563_v60, %v14838_v13  ;;  %v4670_v32 = vand.u32 4294901760, %v4669_v28 }
 0x444   : > { %4129 = vmatpush1.msra.mxu0 %v4128_v59  ;;  %4106 = vmatprep.mubr.f32.mxu0 %v16330_v6 }
 0x445   : > { %4209 = vmatprep.subr.mxu0 %v4119_v36  ;;  %v4664_v22 = vand.u32 4294901760, %v4663_v17  ;;  %v4671_v16 = vsub.f32 %v4669_v28, %v4670_v32  ;;  %v4654_v36 = vsub.f32 %v14867_v31, %v4653_v35 }
 0x447   : > { %4112 = vmatmul.mubr.f32.gmra.mrb[4].mxu0 %v4111_v61  ;;  %v4665_v29 = vsub.f32 %v4663_v17, %v4664_v22  ;;  %v4672_v38 = vand.u32 4294901760, %v4671_v16  ;;  %v5115_v61 = vsel %vm372_vm1, %v13076_v52, 0 }
 0x448   : > { %4192 = vmatprep.mubr.f32.mxu0 %v16330_v6  ;;  %v14936_v60 = vand.u32 4294901760, %v5115_v61 }
 0x449   : > { %v4666_v33 = vand.u32 4294901760, %v4665_v29 }
 0x44a   : > { %v5196_v14 = vsub.f32 %v5115_v61, %v14936_v60 }
 0x44b   : > { %4194 = vmatmul.mubr.f32.vlgmr.msra.gmra.mrb[2].mxu0 %v14797_v37 }
 0x44c   : > { %4212 = vmatpush1.msra.mxu0 %v4125_v43  ;;  %4199 = vmatprep.mubr.f32.mxu0 %v16330_v6  ;;  %v5094_v43 = vpop.permute.xlu0 %5093  ;;  %v5197_v55 = vand.u32 4294901760, %v5196_v14 }
 0x44d   : > { %4293 = vmatprep.subr.mxu0 %v14787_v34 }
 0x44f   : > { %4201 = vmatmul.mubr.f32.gmra.mrb[4].mxu0 %v14805_v42 }
 0x450   : > { %4275 = vmatprep.mubr.f32.mxu0 %v16330_v6 }
 0x453   : > { %4278 = vmatmul.mubr.f32.vlgmr.msra.gmra.mrb[2].mxu0 %v4097_v41  ;;  %v5092_v41 = vpop.permute.xlu1 %5091 }
 0x454   : > { %4295 = vmatpush1.msra.mxu0 %v14801_v39  ;;  %4283 = vmatprep.mubr.f32.mxu0 %v16330_v6  ;;  %v5096_v45 = vsel %vm5095_vm8, %v5092_v41, %v5094_v43 }
 0x455   : > { %4380 = vmatprep.subr.mxu0 %v4120_v40  ;;  %v14268_v40 = vmov 2   ;;  %v5106_v53 = vmul.f32 %v14514_v11, %v5096_v45 }
 0x456   : > { %14145 = vset.pattern.permute.xlu1 %v14268_v40  ;;  %14146 = vset.pattern.permute.xlu0 %v14268_v40 }
 0x457   : > { %4286 = vmatmul.mubr.f32.gmra.mrb[4].mxu0 %v4108_v47  ;;  %v14932_v58 = vand.u32 4294901760, %v5106_v53 }
 0x458   : > { %4358 = vmatprep.mubr.f32.mxu0 %v16330_v6 }
 0x459   : > { %v5213_v56 = vsub.f32 %v5106_v53, %v14932_v58 }
 0x45b   : > { %4362 = vmatmul.mubr.f32.vlgmr.msra.gmra.mrb[2].mxu0 %v4098_v46  ;;  %v5097_v46 = vsel %vm5095_vm8, %v5094_v43, %v5092_v41  ;;  %v5214_v15 = vand.u32 4294901760, %v5213_v56 }
 0x45c   : > { %4384 = vmatpush1.msra.mxu0 %v4126_v48  ;;  %4367 = vmatprep.mubr.f32.mxu0 %v16330_v6  ;;  %v5107_v47 = vmul.f32 %v14517_v12, %v5097_v46  ;;  %v6194_v48 = vld [vmem:[%s350_s16 + $0x8] sm:$0xff]  ;;  %s16401_s16 = smov 112  }
 0x45d   : > { %4463 = vmatprep.subr.mxu0 %v14787_v34  ;;  %v4643_v34 = vsub.f32 %v14856_v23, %v4642_v30 }
 0x45f   : > { %4371 = vmatmul.mubr.f32.gmra.mrb[4].mxu0 %v4109_v50  ;;  %v4644_v19 = vand.u32 4294901760, %v4643_v34  ;;  %v14918_v50 = vand.u32 4294901760, %v5107_v47  ;;  %v13077_v34 = vld [vmem:[%s16307_s2 + $0x10] ss:$0 sm:$0xff] }
 0x460   : > { %4447 = vmatprep.mubr.f32.mxu0 %v16330_v6 }
 0x461   : > { %v5207_v54 = vsub.f32 %v5107_v47, %v14918_v50 }
 0x463   : > { %4449 = vmatmul.mubr.f32.vlgmr.msra.gmra.mrb[2].mxu0 %v14797_v37  ;;  %v5208_v0 = vand.u32 4294901760, %v5207_v54 }
 0x464   : > { %4465 = vmatpush1.msra.mxu0 %v14801_v39  ;;  %4454 = vmatprep.mubr.f32.mxu0 %v16330_v6  ;;  %v14887_v39 = vld [vmem:[%s16313_s8 + $0x8] sm:$0xff] }
 0x465   : > { %4574 = vmatprep.subr.mxu0 %v14838_v13  ;;  %6186 = vperm.xlu0 %14146, %v14887_v39   ;;  %v5209_v10 = vsub.f32 %v5207_v54, %v5208_v0 }
 0x467   : > { %4456 = vmatmul.mubr.f32.gmra.mrb[4].mxu0 %v14805_v42  ;;  %v5210_v7 = vand.u32 4294901760, %v5209_v10 }
 0x468   : > { %4528 = vmatprep.mubr.f32.mxu0 %v16330_v6 }
 0x469   : > { %14148 = vset.pattern.permute.xlu0 %v14258_v26 }
 0x46b   : > { %4530 = vmatmul.mubr.f32.vlgmr.msra.gmra.mrb[2].mxu0 %v14797_v37  ;;  %v4655_v37 = vand.u32 4294901760, %v4654_v36  ;;  %v13080_v36 = vld [vmem:[%s16310_s5 + $0x88] sm:$0xff] }
 0x46c   : > { %4576 = vmatpush1.msra.mxu0 %v14852_v21  ;;  %4535 = vmatprep.mubr.f32.mxu0 %v16330_v6  ;;  %v5659_v41 = vsel %vm372_vm1, %v13080_v36, 0  ;;  %v354_v36 = vld [vmem:[%s16309_s4] sm:$0xff] }
 0x46d   : > { %4667 = vmatprep.subr.mxu0 %v4666_v33  ;;  %v13079_v33 = vld [vmem:[%s16310_s5 + $0x80] sm:$0xff]  ;;  %v5739_v47 = vand.u32 4294901760, %v5659_v41 }
 0x46f   : > { %4537 = vmatmul.mubr.f32.gmra.mrb[4].mxu0 %v14805_v42  ;;  %v14899_v42 = vld [vmem:[%s16313_s8] sm:$0xff] }
 0x470   : > { %4639 = vmatprep.mubr.f32.mxu0 %v16330_v6  ;;  %6181 = vperm.xlu1 %14145, %v14899_v42  }
 0x473   : > { %4645 = vmatmul.mubr.f32.vlgmr.msra.gmra.mrb[2].mxu0 %v4644_v19  ;;  %v5656_v19 = vsel %vm372_vm1, %v13079_v33, 0 }
 0x474   : > { %4673 = vmatpush1.msra.mxu0 %v4672_v38  ;;  %4650 = vmatprep.mubr.f32.mxu0 %v16330_v6  ;;  %v5728_v40 = vand.u32 4294901760, %v5656_v19 }
 0x475   : > { %4753 = vmatprep.subr.mxu0 %v4663_v17  ;;  %14147 = vset.pattern.permute.xlu1 %v14258_v26  ;;  %v5112_v26 = vsel %vm372_vm1, %v13075_v49, 0 }
 0x476   : > { %6197 = vperm.xlu1 %14147, %v6193_v44   ;;  %v14928_v59 = vand.u32 4294901760, %v5112_v26  ;;  %v5729_v46 = vsub.f32 %v5656_v19, %v5728_v40 }
 0x477   : > { %4656 = vmatmul.mubr.f32.gmra.mrb[4].mxu0 %v4655_v37 }
 0x478   : > { %4736 = vmatprep.mubr.f32.mxu0 %v16330_v6  ;;  %v5185_v3 = vsub.f32 %v5112_v26, %v14928_v59  ;;  %v5730_v45 = vand.u32 4294901760, %v5729_v46 }
 0x47a   : > { %6202 = vperm.xlu1 %14147, %v6194_v48   ;;  %v5731_v53 = vsub.f32 %v5729_v46, %v5730_v45 }
 0x47b   : > { %4738 = vmatmul.mubr.f32.vlgmr.msra.gmra.mrb[2].mxu0 %v14848_v18 }
 0x47c   : > { %4756 = vmatpush1.msra.mxu0 %v4669_v28  ;;  %4743 = vmatprep.mubr.f32.mxu0 %v16330_v6 }
 0x47d   : > { %4837 = vmatprep.subr.mxu0 %v14838_v13 }
 0x47f   : > { %4745 = vmatmul.mubr.f32.gmra.mrb[4].mxu0 %v14858_v24 }
 0x480   : > { %4819 = vmatprep.mubr.f32.mxu0 %v16330_v6 }
 0x483   : > { %4822 = vmatmul.mubr.f32.vlgmr.msra.gmra.mrb[2].mxu0 %v14856_v23  ;;  %v5198_v23 = vsub.f32 %v5196_v14, %v5197_v55 }
 0x484   : > { %4839 = vmatpush1.msra.mxu0 %v14852_v21  ;;  %4827 = vmatprep.mubr.f32.mxu0 %v16330_v6 }
 0x485   : > { %4924 = vmatprep.subr.mxu0 %v4664_v22  ;;  %v5199_v29 = vand.u32 4294901760, %v5198_v23 }
 0x487   : > { %4830 = vmatmul.mubr.f32.gmra.mrb[4].mxu0 %v14867_v31 }
 0x488   : > { %4902 = vmatprep.mubr.f32.mxu0 %v16330_v6 }
 0x48b   : > { %4906 = vmatmul.mubr.f32.vlgmr.msra.gmra.mrb[2].mxu0 %v4642_v30  ;;  %v13078_v30 = vld [vmem:[%s16307_s2 + $0x18] ss:$0 sm:$0xff] }
 0x48c   : > { %4928 = vmatpush1.msra.mxu0 %v4670_v32  ;;  %4911 = vmatprep.mubr.f32.mxu0 %v16330_v6 }
 0x48d   : > { %5007 = vmatprep.subr.mxu0 %v14838_v13  ;;  %v5186_v13 = vand.u32 4294901760, %v5185_v3 }
 0x48f   : > { %4915 = vmatmul.mubr.f32.gmra.mrb[4].mxu0 %v4653_v35  ;;  %v5187_v17 = vsub.f32 %v5185_v3, %v5186_v13 }
 0x490   : > { %4991 = vmatprep.mubr.f32.mxu0 %v16330_v6 }
 0x491   : > { %v5188_v22 = vand.u32 4294901760, %v5187_v17 }
 0x493   : > { %4993 = vmatmul.mubr.f32.vlgmr.msra.gmra.mrb[2].mxu0 %v14848_v18 }
 0x494   : > { %5009 = vmatpush1.msra.mxu0 %v14852_v21  ;;  %4998 = vmatprep.mubr.f32.mxu0 %v16330_v6  ;;  %v5215_v21 = vsub.f32 %v5213_v56, %v5214_v15 }
 0x495   : > { %5118 = vmatprep.subr.mxu0 %v14918_v50 }
 0x496   : > { %v5216_v28 = vand.u32 4294901760, %v5215_v21 }
 0x497   : > { %5000 = vmatmul.mubr.f32.gmra.mrb[4].mxu0 %v14858_v24 }
 0x498   : > { %5072 = vmatprep.mubr.f32.mxu0 %v16330_v6 }
 0x49b   : > { %5074 = vmatmul.mubr.f32.vlgmr.msra.gmra.mrb[2].mxu0 %v14848_v18  ;;  %v5636_v18 = vpop.permute.xlu1 %5635 }
 0x49c   : > { %5120 = vmatpush1.msra.mxu0 %v14932_v58  ;;  %5079 = vmatprep.mubr.f32.mxu0 %v16330_v6 }
 0x49d   : > { %5211 = vmatprep.subr.mxu0 %v5210_v7 }
 0x49f   : > { %5081 = vmatmul.mubr.f32.gmra.mrb[4].mxu0 %v14858_v24  ;;  %v5638_v24 = vpop.permute.xlu0 %5637 }
 0x4a0   : > { %5183 = vmatprep.mubr.f32.mxu0 %v16330_v6  ;;  %v5641_v31 = vsel %vm5639_vm9, %v5638_v24, %v5636_v18  ;;  %v5640_v35 = vsel %vm5639_vm9, %v5636_v18, %v5638_v24 }
 0x4a1   : > { %v5651_v32 = vmul.f32 %v13078_v30, %v5641_v31  ;;  %v5650_v38 = vmul.f32 %v13077_v34, %v5640_v35 }
 0x4a3   : > { %5189 = vmatmul.mubr.f32.vlgmr.msra.gmra.mrb[2].mxu0 %v5188_v22  ;;  %v5661_v16 = vand.u32 4294901760, %v5651_v32  ;;  %v5663_v43 = vand.u32 4294901760, %v5650_v38 }
 0x4a4   : > { %5217 = vmatpush1.msra.mxu0 %v5216_v28  ;;  %5194 = vmatprep.mubr.f32.mxu0 %v16330_v6 }
 0x4a5   : > { %5297 = vmatprep.subr.mxu0 %v5207_v54  ;;  %v5751_v37 = vsub.f32 %v5651_v32, %v5661_v16  ;;  %v5757_v48 = vsub.f32 %v5650_v38, %v5663_v43  ;;  %v6227_v38 = vsel %vm6225_vm10, %v354_v36, 0 }
 0x4a7   : > { %5200 = vmatmul.mubr.f32.gmra.mrb[4].mxu0 %v5199_v29  ;;  %v5752_v44 = vand.u32 4294901760, %v5751_v37  ;;  %v5758_v26 = vand.u32 4294901760, %v5757_v48 }
 0x4a8   : > { %5280 = vmatprep.mubr.f32.mxu0 %v16330_v6 }
 0x4a9   : > { %v5753_v49 = vsub.f32 %v5751_v37, %v5752_v44  ;;  %v5759_v61 = vsub.f32 %v5757_v48, %v5758_v26 }
 0x4ab   : > { %5282 = vmatmul.mubr.f32.vlgmr.msra.gmra.mrb[2].mxu0 %v14928_v59  ;;  %v5754_v52 = vand.u32 4294901760, %v5753_v49 }
 0x4ac   : > { %5300 = vmatpush1.msra.mxu0 %v5213_v56  ;;  %5287 = vmatprep.mubr.f32.mxu0 %v16330_v6 }
 0x4ad   : > { %5381 = vmatprep.subr.mxu0 %v14918_v50 }
 0x4af   : > { %5289 = vmatmul.mubr.f32.gmra.mrb[4].mxu0 %v14936_v60 }
 0x4b0   : > { %5363 = vmatprep.mubr.f32.mxu0 %v16330_v6 }
 0x4b3   : > { %5366 = vmatmul.mubr.f32.vlgmr.msra.gmra.mrb[2].mxu0 %v5185_v3  ;;  %v5760_v3 = vand.u32 4294901760, %v5759_v61 }
 0x4b4   : > { %5383 = vmatpush1.msra.mxu0 %v14932_v58  ;;  %5371 = vmatprep.mubr.f32.mxu0 %v16330_v6 }
 0x4b5   : > { %5468 = vmatprep.subr.mxu0 %v5208_v0 }
 0x4b7   : > { %5374 = vmatmul.mubr.f32.gmra.mrb[4].mxu0 %v5196_v14 }
 0x4b8   : > { %5446 = vmatprep.mubr.f32.mxu0 %v16330_v6 }
 0x4bb   : > { %5450 = vmatmul.mubr.f32.vlgmr.msra.gmra.mrb[2].mxu0 %v5186_v13 }
 0x4bc   : > { %5472 = vmatpush1.msra.mxu0 %v5214_v15  ;;  %5455 = vmatprep.mubr.f32.mxu0 %v16330_v6 }
 0x4bd   : > { %5551 = vmatprep.subr.mxu0 %v14918_v50  ;;  %v5740_v50 = vsub.f32 %v5659_v41, %v5739_v47 }
 0x4bf   : > { %5459 = vmatmul.mubr.f32.gmra.mrb[4].mxu0 %v5197_v55  ;;  %v5741_v54 = vand.u32 4294901760, %v5740_v50 }
 0x4c0   : > { %5535 = vmatprep.mubr.f32.mxu0 %v16330_v6 }
 0x4c1   : > { %v5742_v0 = vsub.f32 %v5740_v50, %v5741_v54 }
 0x4c3   : > { %5537 = vmatmul.mubr.f32.vlgmr.msra.gmra.mrb[2].mxu0 %v14928_v59  ;;  %v5743_v56 = vand.u32 4294901760, %v5742_v0 }
 0x4c4   : > { %5553 = vmatpush1.msra.mxu0 %v14932_v58  ;;  %5542 = vmatprep.mubr.f32.mxu0 %v16330_v6  ;;  %v5732_v58 = vand.u32 4294901760, %v5731_v53 }
 0x4c5   : > { %5662 = vmatprep.subr.mxu0 %v5661_v16 }
 0x4c7   : > { %5544 = vmatmul.mubr.f32.gmra.mrb[4].mxu0 %v14936_v60 }
 0x4c8   : > { %5616 = vmatprep.mubr.f32.mxu0 %v16330_v6 }
 0x4cb   : > { %5618 = vmatmul.mubr.f32.vlgmr.msra.gmra.mrb[2].mxu0 %v14928_v59 }
 0x4cc   : > { %5664 = vmatpush1.msra.mxu0 %v5663_v43  ;;  %5623 = vmatprep.mubr.f32.mxu0 %v16330_v6 }
 0x4cd   : > { %5755 = vmatprep.subr.mxu0 %v5754_v52 }
 0x4cf   : > { %5625 = vmatmul.mubr.f32.gmra.mrb[4].mxu0 %v14936_v60 }
 0x4d0   : > { %5727 = vmatprep.mubr.f32.mxu0 %v16330_v6 }
 0x4d3   : > { %5733 = vmatmul.mubr.f32.vlgmr.msra.gmra.mrb[2].mxu0 %v5732_v58 }
 0x4d4   : > { %5761 = vmatpush1.msra.mxu0 %v5760_v3  ;;  %5738 = vmatprep.mubr.f32.mxu0 %v16330_v6 }
 0x4d5   : > { %5841 = vmatprep.subr.mxu0 %v5751_v37  ;;  %v15027_v37 = vand.u32 4294901760, %v6227_v38 }
 0x4d7   : > { %5744 = vmatmul.mubr.f32.gmra.mrb[4].mxu0 %v5743_v56 }
 0x4d8   : > { %5824 = vmatprep.mubr.f32.mxu0 %v16330_v6 }
 0x4db   : > { %5826 = vmatmul.mubr.f32.vlgmr.msra.gmra.mrb[2].mxu0 %v5728_v40 }
 0x4dc   : > { %5844 = vmatpush1.msra.mxu0 %v5757_v48  ;;  %5831 = vmatprep.mubr.f32.mxu0 %v16330_v6 }
 0x4dd   : > { %5925 = vmatprep.subr.mxu0 %v5661_v16 }
 0x4df   : > { %5833 = vmatmul.mubr.f32.gmra.mrb[4].mxu0 %v5739_v47 }
 0x4e0   : > { %5907 = vmatprep.mubr.f32.mxu0 %v16330_v6 }
 0x4e3   : > { %5910 = vmatmul.mubr.f32.vlgmr.msra.gmra.mrb[2].mxu0 %v5729_v46  ;;  %v355_v46 = vld [vmem:[%s16309_s4 + $0x8] sm:$0xff] }
 0x4e4   : > { %5927 = vmatpush1.msra.mxu0 %v5663_v43  ;;  %5915 = vmatprep.mubr.f32.mxu0 %v16330_v6  ;;  %v6187_v7 = vpop.permute.xlu0 %6186 }
 0x4e5   : > { %6012 = vmatprep.subr.mxu0 %v5752_v44 }
 0x4e7   : > { %5918 = vmatmul.mubr.f32.gmra.mrb[4].mxu0 %v5740_v50 }
 0x4e8   : > { %5990 = vmatprep.mubr.f32.mxu0 %v16330_v6 }
 0x4eb   : > { %5994 = vmatmul.mubr.f32.vlgmr.msra.gmra.mrb[2].mxu0 %v5730_v45 }
 0x4ec   : > { %6016 = vmatpush1.msra.mxu0 %v5758_v26  ;;  %5999 = vmatprep.mubr.f32.mxu0 %v16330_v6 }
 0x4ed   : > { %6095 = vmatprep.subr.mxu0 %v5661_v16 }
 0x4ef   : > { %6003 = vmatmul.mubr.f32.gmra.mrb[4].mxu0 %v5741_v54  ;;  %v6182_v59 = vpop.permute.xlu1 %6181 }
 0x4f0   : > { %6079 = vmatprep.mubr.f32.mxu0 %v16330_v6 }
 0x4f3   : > { %6081 = vmatmul.mubr.f32.vlgmr.msra.gmra.mrb[2].mxu0 %v5728_v40 }
 0x4f4   : > { %6097 = vmatpush1.msra.mxu0 %v5663_v43  ;;  %6086 = vmatprep.mubr.f32.mxu0 %v16330_v6 }
 0x4f5   : > { %v6198_v10 = vpop.permute.xlu1 %6197 }
 0x4f7   : > { %6088 = vmatmul.mubr.f32.gmra.mrb[4].mxu0 %v5739_v47 }
 0x4f8   : > { %6160 = vmatprep.mubr.f32.mxu0 %v16330_v6 }
 0x4f9   : > { %v6203_v28 = vpop.permute.xlu1 %6202 }
 0x4fb   : > { %6162 = vmatmul.mubr.f32.vlgmr.msra.gmra.mrb[2].mxu0 %v5728_v40  ;;  %v15030_v40 = vsub.f32 %v6227_v38, %v15027_v37 }
 0x4fc   : > { %6167 = vmatprep.mubr.f32.mxu0 %v16330_v6 }
 0x4fd   : > { %v15033_v41 = vand.u32 4294901760, %v15030_v40 }
 0x4ff   : > { %6169 = vmatmul.mubr.f32.gmra.mrb[4].mxu0 %v5739_v47  ;;  %v6302_v43 = vsub.f32 %v15030_v40, %v15033_v41  ;;  %v6230_v47 = vsel %vm6225_vm10, %v355_v46, 0 }
 0x500   : > { %7431 = vmatprep.mubr.f32.mxu0 %v16330_v6  ;;  %v15046_v48 = vand.u32 4294901760, %v6230_v47 }
 0x501   : > { %v15037_v44 = vand.u32 4294901760, %v6302_v43 }
 0x502   : > { %v15049_v49 = vsub.f32 %v6230_v47, %v15046_v48 }
 0x503   : > { %13245 = vmatprep.mubr.f32.mxu1 %v15037_v44 }
 0x504   : > { %v15052_v26 = vand.u32 4294901760, %v15049_v49 }
 0x506   : > { %v6312_v58 = vsub.f32 %v15049_v49, %v15052_v26 }
 0x5ce   : > { %v6163_v60 = vpop.f32.mrb[2].mxu0 }
 0x5cf   : > { %v6189_v13 = vadd.f32 %v6182_v59, %v6163_v60  ;;  %v6165_v14 = vpop.f32.mrb[3].mxu0  ;;  %v6313_v60 = vand.u32 4294901760, %v6312_v58 }
 0x5d0   : > { %v6190_v15 = vadd.f32 %v6182_v59, %v6165_v14 }
 0x5d1   : > { %v15003_v17 = vadd.f32 %v6198_v10, %v6189_v13 }
 0x5d2   : > { %v15005_v55 = vadd.f32 %v6198_v10, %v6190_v15  ;;  %v6170_v21 = vpop.f32.mrb[4].mxu0 }
 0x5d3   : > { %v6191_v22 = vadd.f32 %v6187_v7, %v6170_v21  ;;  %v6172_v23 = vpop.f32.mrb[5].mxu0  ;;  %v6215_v24 = vmul.f32 %v15003_v17, %v15003_v17 }
 0x5d4   : > { %v6192_v29 = vadd.f32 %v6187_v7, %v6172_v23  ;;  %v6209_v18 = vadd.f32 %v15005_v55, %v15003_v17  ;;  %v6216_v30 = vmul.f32 %v15005_v55, %v15005_v55 }
 0x5d5   : > { %v15013_v31 = vadd.f32 %v6203_v28, %v6191_v22 }
 0x5d6   : > { %v15015_v32 = vadd.f32 %v6203_v28, %v6192_v29  ;;  %6210 = vadd.xlane.f32.xlu0 %v6209_v18  ;;  %v6219_v33 = vadd.f32 %v6216_v30, %v6215_v24 }
 0x5d7   : > { %v6217_v35 = vmul.f32 %v15013_v31, %v15013_v31 }
 0x5d8   : > { %v6212_v34 = vadd.f32 %v15015_v32, %v15013_v31  ;;  %v6218_v16 = vmul.f32 %v15015_v32, %v15015_v32 }
 0x5da   : > { %6220 = vadd.xlane.f32.xlu0 %v6219_v33  ;;  %6213 = vadd.xlane.f32.xlu1 %v6212_v34  ;;  %v6222_v19 = vadd.f32 %v6218_v16, %v6217_v35 }
 0x5de   : > { %6223 = vadd.xlane.f32.xlu0 %v6222_v19 }
 0x5eb   : > { %7244 = vrot.lane.b32.xlu1 %v14899_v42, %s14269_s14 }
 0x5f4   : > { %7246 = vrot.lane.b32.xlu0 %v14887_v39, %s14269_s14  ;;  %s13108_s14 = sshll.u32 %s14347_s13, 9 }
 0x663   : > { %v6211_v45 = vpop.xlane.xlu0 %6210 }
 0x664   : > { %v6233_v50 = vand.u32 4294901760, %v6211_v45 }
 0x666   : > { %v6321_v52 = vsub.f32 %v6211_v45, %v6233_v50 }
 0x667   : > { %v6214_v53 = vpop.xlane.xlu1 %6213  ;;  %v6221_v21 = vpop.xlane.xlu0 %6220 }
 0x668   : > { %v6322_v54 = vand.u32 4294901760, %v6321_v52  ;;  %v6236_v61 = vand.u32 4294901760, %v6214_v53  ;;  %v6735_v29 = vand.u32 4294901760, %v6221_v21 }
 0x66a   : > { %v13325_v0 = vpack.c.bf16 %v6236_v61, %v6233_v50  ;;  %v6328_v3 = vsub.f32 %v6214_v53, %v6236_v61  ;;  %v6323_v56 = vsub.f32 %v6321_v52, %v6322_v54  ;;  %v6823_v24 = vsub.f32 %v6221_v21, %v6735_v29 }
 0x66b   : > { %v6224_v23 = vpop.xlane.xlu0 %6223  ;;  %v7245_v61 = vpop.permute.xlu1 %7244 }
 0x66c   : > { %v6329_v59 = vand.u32 4294901760, %v6328_v3  ;;  %13326 = vmatprep.subr.bf16.mxu1 %v13325_v0  ;;  %v6324_v13 = vand.u32 4294901760, %v6323_v56  ;;  %v13333_v7 = vpack.c.bf16 %v6328_v3, %v6321_v52  ;;  %v6738_v28 = vand.u32 4294901760, %v6224_v23 }
 0x66d   : > { %13328 = vmatpush3.bf16.msra.mxu1 %v13325_v0  ;;  %v6824_v33 = vand.u32 4294901760, %v6823_v24 }
 0x66e   : > { %v6330_v10 = vsub.f32 %v6328_v3, %v6329_v59  ;;  %v13341_v22 = vpack.c.bf16 %v6329_v59, %v6322_v54  ;;  %v6830_v18 = vsub.f32 %v6224_v23, %v6738_v28  ;;  %v13349_v34 = vpack.c.bf16 %v6738_v28, %v6735_v29 }
 0x66f   : > { %v6825_v16 = vsub.f32 %v6823_v24, %v6824_v33  ;;  %v7247_v54 = vpop.permute.xlu0 %7246  ;;  %v14271_v59 = vmov 4  }
 0x670   : > { %13246 = vmatmul.mubr.f32.vlgmr.msra.gmra.mrb[2].mxu1 %v6313_v60  ;;  %v6331_v14 = vand.u32 4294901760, %v6330_v10  ;;  %v6831_v30 = vand.u32 4294901760, %v6830_v18  ;;  %v13357_v43 = vpack.c.bf16 %v6830_v18, %v6823_v24 }
 0x671   : > { %13252 = vmatprep.mubr.f32.mxu1 %v15027_v37  ;;  %v6826_v36 = vand.u32 4294901760, %v6825_v16 }
 0x672   : > { %v13329_v15 = vpack.c.bf16 %v6331_v14, %v6324_v13  ;;  %v6832_v35 = vsub.f32 %v6830_v18, %v6831_v30  ;;  %v13365_v46 = vpack.c.bf16 %v6831_v30, %v6824_v33 }
 0x674   : > { %13330 = vmatprep.subr.bf16.mxu1 %v13329_v15  ;;  %v6833_v19 = vand.u32 4294901760, %v6832_v35 }
 0x675   : > { %13332 = vmatpush3.bf16.msra.mxu1 %v13329_v15 }
 0x676   : > { %13334 = vmatprep.subr.bf16.mxu1 %v13333_v7  ;;  %v13353_v38 = vpack.c.bf16 %v6833_v19, %v6826_v36 }
 0x678   : > { %13253 = vmatmul.mubr.f32.vlgmr.msra.gmra.mrb[2].mxu1 %v15046_v48 }
 0x679   : > { %13336 = vmatpush3.bf16.msra.mxu1 %v13333_v7  ;;  %13259 = vmatprep.mubr.f32.mxu1 %v15030_v40 }
 0x67a   : > { %13338 = vmatprep.subr.bf16.mxu1 %v13325_v0 }
 0x680   : > { %13260 = vmatmul.mubr.f32.vlgmr.msra.gmra.mrb[2].mxu1 %v15049_v49 }
 0x681   : > { %13340 = vmatpush3.bf16.msra.mxu1 %v13325_v0  ;;  %13266 = vmatprep.mubr.f32.mxu1 %v15033_v41 }
 0x682   : > { %13342 = vmatprep.subr.bf16.mxu1 %v13341_v22 }
 0x688   : > { %13267 = vmatmul.mubr.f32.vlgmr.msra.gmra.mrb[2].mxu1 %v15052_v26 }
 0x689   : > { %13344 = vmatpush3.bf16.msra.mxu1 %v13341_v22  ;;  %13273 = vmatprep.mubr.f32.mxu1 %v15027_v37 }
 0x68a   : > { %13346 = vmatprep.subr.bf16.mxu1 %v13325_v0 }
 0x690   : > { %13274 = vmatmul.mubr.f32.vlgmr.msra.gmra.mrb[2].mxu1 %v15046_v48 }
 0x691   : > { %13348 = vmatpush3.bf16.msra.mxu1 %v13325_v0  ;;  %13280 = vmatprep.mubr.f32.mxu1 %v15027_v37 }
 0x692   : > { %13350 = vmatprep.subr.bf16.mxu1 %v13349_v34 }
 0x698   : > { %13281 = vmatmul.mubr.f32.vlgmr.msra.gmra.mrb[2].mxu1 %v15046_v48 }
 0x699   : > { %13352 = vmatpush3.bf16.msra.mxu1 %v13349_v34  ;;  %13287 = vmatprep.mubr.f32.mxu1 %v15037_v44 }
 0x69a   : > { %13354 = vmatprep.subr.bf16.mxu1 %v13353_v38 }
 0x69c   : > { %13288 = vmatmul.mubr.f32.vlgmr.msra.gmra.mrb[4].mxu1 %v6313_v60 }
 0x69d   : > { %13356 = vmatpush3.bf16.msra.mxu1 %v13353_v38  ;;  %13294 = vmatprep.mubr.f32.mxu1 %v15027_v37 }
 0x69e   : > { %13358 = vmatprep.subr.bf16.mxu1 %v13357_v43 }
 0x6a4   : > { %13295 = vmatmul.mubr.f32.vlgmr.msra.gmra.mrb[4].mxu1 %v15046_v48 }
 0x6a5   : > { %13360 = vmatpush3.bf16.msra.mxu1 %v13357_v43  ;;  %13301 = vmatprep.mubr.f32.mxu1 %v15030_v40 }
 0x6a6   : > { %13362 = vmatprep.subr.bf16.mxu1 %v13349_v34 }
 0x6ac   : > { %13302 = vmatmul.mubr.f32.vlgmr.msra.gmra.mrb[4].mxu1 %v15049_v49 }
 0x6ad   : > { %13364 = vmatpush3.bf16.msra.mxu1 %v13349_v34  ;;  %13308 = vmatprep.mubr.f32.mxu1 %v15033_v41 }
 0x6ae   : > { %13366 = vmatprep.subr.bf16.mxu1 %v13365_v46 }
 0x6b4   : > { %13309 = vmatmul.mubr.f32.vlgmr.msra.gmra.mrb[4].mxu1 %v15052_v26 }
 0x6b5   : > { %13368 = vmatpush3.bf16.msra.mxu1 %v13365_v46  ;;  %13315 = vmatprep.mubr.f32.mxu1 %v15027_v37 }
 0x6b6   : > { %13370 = vmatprep.subr.bf16.mxu1 %v13349_v34 }
 0x6bc   : > { %13316 = vmatmul.mubr.f32.vlgmr.msra.gmra.mrb[4].mxu1 %v15046_v48 }
 0x6bd   : > { %13372 = vmatpush3.bf16.msra.mxu1 %v13349_v34  ;;  %13322 = vmatprep.mubr.f32.mxu1 %v15027_v37 }
 0x6c4   : > { %13323 = vmatmul.mubr.f32.vlgmr.msra.gmra.mrb[4].mxu1 %v15046_v48 }
 0x6c5   : > { %7977 = vmatprep.mubr.f32.mxu1 %v16330_v6 }
 0x76b   : > { %v13282_v40 = vpop.f32.mrb[2].mxu1 }
 0x76c   : > { %v6724_v44 = vpop.f32.mrb[3].mxu1  ;;  %v7237_v47 = vmul.f32 %v13282_v40, %v13282_v40 }
 0x76d   : > { %v7236_v41 = vmul.f32 %v6724_v44, %v6724_v44 }
 0x797   : > { %v13324_v49 = vpop.f32.mrb[4].mxu1 }
 0x798   : > { %v7239_v45 = vsub.f32 %v13324_v49, %v7237_v47  ;;  %v7226_v50 = vpop.f32.mrb[5].mxu1 }
 0x799   : > { %v7238_v26 = vsub.f32 %v7226_v50, %v7236_v41 }
 0x79a   : > { %v7241_v52 = vadd.f32 1e-05, %v7239_v45 }
 0x79b   : > { %v7240_v53 = vadd.f32 1e-05, %v7238_v26 }
 0x79c   : > { %14165 = vrsqrt.f32 %v7241_v52 }
 0x79d   : > { %14167 = vrsqrt.f32 %v7240_v53 }
 0x7a6   : > { %v14166_v58 = vpop.eup %14165 }
 0x7a7   : > { %v14168_v37 = vpop.eup %14167  ;;  %v7251_v0 = vmul.f32 %v14166_v58, %v7247_v54 }
 0x7a8   : > { %v7250_v48 = vmul.f32 %v14168_v37, %v7245_v61 }
 0x7a9   : > { %v7253_v3 = vmul.f32 %v13282_v40, %v7251_v0 }
 0x7aa   : > { %v7252_v56 = vmul.f32 %v7250_v48, %v6724_v44  ;;  %7266 = vperm.xlu0 %14148, %v7250_v48  }
 0x7ac   : > { %7256 = vrot.lane.b32.xlu1 %v7252_v56, %s14270_s28 }
 0x7ae   : > { %14150 = vset.pattern.permute.xlu0 %v14271_v59 }
 0x7b0   : > { %7258 = vrot.lane.b32.xlu1 %v7253_v3, %s14270_s28  ;;  %s16261_s28 = scalar_lea.hbm %s16314_s9, %s13108_s14 }
 0x7b4   : > { %7271 = vperm.xlu1 %14147, %v7251_v0  }
 0x7b8   : > { %14149 = vset.pattern.permute.xlu1 %v14271_v59 }
 0x81e   : > { %v7257_v60 = vpop.permute.xlu1 %7256 }
 0x81f   : > { %v7262_v10 = vsub.f32 %v14899_v42, %v7257_v60 }
 0x821   : > { %7280 = vperm.xlu1 %14149, %v7262_v10  }
 0x822   : > { %v7259_v13 = vpop.permute.xlu1 %7258 }
 0x823   : > { %v7263_v14 = vsub.f32 %v14887_v39, %v7259_v13 }
 0x825   : > { %7285 = vperm.xlu0 %14150, %v7263_v14  }
 0x829   : > { %v7267_v15 = vpop.permute.xlu0 %7266 }
 0x82a   : > { %v7274_v21 = vmul.f32 %v7267_v15, %v15003_v17  ;;  %v7275_v22 = vmul.f32 %v7267_v15, %v15005_v55 }
 0x833   : > { %v7272_v7 = vpop.permute.xlu1 %7271 }
 0x834   : > { %v7276_v18 = vmul.f32 %v7272_v7, %v15013_v31  ;;  %v7277_v24 = vmul.f32 %v7272_v7, %v15015_v32 }
 0x8a0   : > { %v7281_v23 = vpop.permute.xlu1 %7280 }
 0x8a1   : > { %v7288_v28 = vadd.f32 %v7281_v23, %v7274_v21  ;;  %v7289_v29 = vadd.f32 %v7281_v23, %v7275_v22 }
 0x8a3   : > { %v13081_v30 = vmul.f32 -1.442695, %v7288_v28  ;;  %v13082_v42 = vmul.f32 -1.442695, %v7289_v29 }
 0x8a4   : > { %v7286_v33 = vpop.permute.xlu0 %7285 }
 0x8a5   : > { %14169 = vpow2.f32 %v13081_v30  ;;  %v7290_v34 = vadd.f32 %v7286_v33, %v7276_v18  ;;  %v7291_v39 = vadd.f32 %v7286_v33, %v7277_v24 }
 0x8a6   : > { %14171 = vpow2.f32 %v13082_v42 }
 0x8a7   : > { %v13083_v35 = vmul.f32 -1.442695, %v7290_v34  ;;  %v13084_v16 = vmul.f32 -1.442695, %v7291_v39 }
 0x8a9   : > { %14173 = vpow2.f32 %v13083_v35  ;;  %v7337_v35 = vld [vmem:[%s16311_s6 + $0x8] sm:$0xff] }
 0x8aa   : > { %14175 = vpow2.f32 %v13084_v16  ;;  %v13087_v16 = vld [vmem:[%s16311_s6 + $0x20] sm:$0xff] }
 0x8af   : > { %v14170_v17 = vpop.eup %14169 }
 0x8b0   : > { %v14172_v55 = vpop.eup %14171  ;;  %v7304_v19 = vadd.f32 1.0, %v14170_v17 }
 0x8b1   : > { %v7305_v36 = vadd.f32 1.0, %v14172_v55  ;;  %v7907_v55 = vsel %vm6225_vm10, %v7337_v35, 0 }
 0x8b2   : > { %14177 = vrcp.f32 %v7304_v19  ;;  %v8469_v19 = vsel %vm6225_vm10, %v13087_v16, 0 }
 0x8b3   : > { %v14174_v38 = vpop.eup %14173  ;;  %14179 = vrcp.f32 %v7305_v36 }
 0x8b4   : > { %v14176_v31 = vpop.eup %14175  ;;  %v7306_v32 = vadd.f32 1.0, %v14174_v38  ;;  %v13088_v38 = vld [vmem:[%s16311_s6 + $0x28] sm:$0xff] }
 0x8b5   : > { %v7307_v43 = vadd.f32 1.0, %v14176_v31 }
 0x8b6   : > { %14181 = vrcp.f32 %v7306_v32  ;;  %v15168_v32 = vand.u32 4294901760, %v7907_v55 }
 0x8b7   : > { %14183 = vrcp.f32 %v7307_v43  ;;  %v15170_v43 = vand.u32 4294901760, %v8469_v19 }
 0x8b9   : > { %16404 = vst [vmem:[#allocation15_spill] sm:$0xff] %v15170_v43 }
 0x8bc   : > { %v14178_v46 = vpop.eup %14177 }
 0x8bd   : > { %v14180_v40 = vpop.eup %14179  ;;  %v7316_v44 = vmul.f32 %v14178_v46, %v7288_v28 }
 0x8be   : > { %v7317_v47 = vmul.f32 %v14180_v40, %v7289_v29 }
 0x8bf   : > { %v9598_v41 = vand.u32 4294901760, %v7316_v44 }
 0x8c0   : > { %v14182_v49 = vpop.eup %14181  ;;  %7324 = vrot.lane.b32.xlu0 %v7317_v47, %s14264_s29  ;;  %v9596_v45 = vand.u32 4294901760, %v7317_v47 }
 0x8c1   : > { %v14184_v50 = vpop.eup %14183  ;;  %v7318_v26 = vmul.f32 %v14182_v49, %v7290_v34  ;;  %v15085_v52 = vsub.f32 %v7316_v44, %v9598_v41  ;;  %v7336_v34 = vld [vmem:[%s16311_s6] sm:$0xff] }
 0x8c2   : > { %v7319_v53 = vmul.f32 %v14184_v50, %v7291_v39  ;;  %v15087_v54 = vsub.f32 %v7317_v47, %v9596_v45  ;;  %v7904_v39 = vsel %vm6225_vm10, %v7336_v34, 0  ;;  %v15184_v50 = vsub.f32 %v8469_v19, %v15170_v43 }
 0x8c3   : > { %16388 = vst [vmem:[#allocation5_spill] sm:$0xff] %v15085_v52  ;;  %7322 = vrot.lane.b32.xlu1 %v7318_v26, %s14264_s29  ;;  %v9602_v61 = vand.u32 4294901760, %v7318_v26  ;;  %v9695_v58 = vand.u32 4294901760, %v15085_v52  ;;  %v15158_v17 = vand.u32 4294901760, %v7904_v39 }
 0x8c4   : > { %16389 = vst [vmem:[#allocation6_spill] sm:$0xff] %v15087_v54  ;;  %8449 = vrot.lane.b32.xlu0 %v7316_v44, %s16390_s21  ;;  %v9600_v37 = vand.u32 4294901760, %v7319_v53  ;;  %v9689_v0 = vand.u32 4294901760, %v15087_v54  ;;  %16405 = vst [vmem:[#allocation16_spill] sm:$0xff] %v15184_v50 }
 0x8c5   : > { %v15093_v48 = vpack.c.bf16 %v9602_v61, %v9598_v41  ;;  %v15095_v3 = vsub.f32 %v7318_v26, %v9602_v61  ;;  %v9696_v60 = vsub.f32 %v15085_v52, %v9695_v58  ;;  %v15166_v31 = vsub.f32 %v7904_v39, %v15158_v17  ;;  %v13086_v41 = vld [vmem:[%s16311_s6 + $0x18] sm:$0xff] }
 0x8c6   : > { %v15097_v56 = vpack.c.bf16 %v9600_v37, %v9596_v45  ;;  %v15099_v59 = vsub.f32 %v7319_v53, %v9600_v37  ;;  %v9690_v14 = vsub.f32 %v15087_v54, %v9689_v0  ;;  %v15181_v45 = vsub.f32 %v7907_v55, %v15168_v32 }
 0x8c7   : > { %16391 = vst [vmem:[#allocation7_spill] sm:$0xff] %v15093_v48  ;;  %16392 = vst [vmem:[#allocation8_spill] sm:$0xff] %v15095_v3  ;;  %7320 = vrot.lane.b32.xlu1 %v7316_v44, %s14264_s29  ;;  %v9707_v10 = vand.u32 4294901760, %v15095_v3  ;;  %v9697_v29 = vand.u32 4294901760, %v9696_v60  ;;  %v16329_v49 = vand.u32 4294901760, %v15166_v31  ;;  %v7361_v60 = vsel %vm6225_vm10, %v13086_v41, 0 }
 0x8c8   : > { %16393 = vst [vmem:[#allocation9_spill] sm:$0xff] %v15097_v56  ;;  %16394 = vst [vmem:[#allocation10_spill] sm:$0xff] %v15099_v59  ;;  %8453 = vrot.lane.b32.xlu0 %v7317_v47, %s16390_s21  ;;  %v9701_v15 = vand.u32 4294901760, %v15099_v59  ;;  %v9691_v24 = vand.u32 4294901760, %v9690_v14  ;;  %v15208_v39 = vand.u32 4294901760, %v7361_v60 }
 0x8c9   : > { %v9708_v21 = vsub.f32 %v15095_v3, %v9707_v10  ;;  %v15112_v22 = vpack.c.bf16 %v9707_v10, %v9695_v58 }
 0x8ca   : > { %v9702_v23 = vsub.f32 %v15099_v59, %v9701_v15  ;;  %v15115_v28 = vpack.c.bf16 %v9701_v15, %v9689_v0  ;;  %v15199_v15 = vsub.f32 %v15166_v31, %v16329_v49  ;;  %16409 = vst [vmem:[#allocation20_spill] sm:$0xff] %v15208_v39 }
 0x8cb   : > { %16395 = vst [vmem:[#allocation11_spill] sm:$0xff] %v15112_v22  ;;  %7326 = vrot.lane.b32.xlu1 %v7319_v53, %s14264_s29  ;;  %v9709_v18 = vand.u32 4294901760, %v9708_v21  ;;  %s16400_s29 = smov 113   ;;  %v16328_v21 = vand.u32 4294901760, %v15181_v45 }
 0x8cc   : > { %16396 = vst [vmem:[#allocation12_spill] sm:$0xff] %v15115_v28  ;;  %9018 = vrot.lane.b32.xlu0 %v7316_v44, %s16397_s22  ;;  %v9703_v30 = vand.u32 4294901760, %v9702_v23  ;;  %v16327_v23 = vand.u32 4294901760, %v15184_v50  ;;  %v16414_v28 = vmov 0.0  }
 0x8cd   : > { %v15119_v42 = vpack.c.bf16 %v9709_v18, %v9697_v29 }
 0x8ce   : > { %v15121_v33 = vpack.c.bf16 %v9703_v30, %v9691_v24 }
 0x8cf   : > { %16398 = vst [vmem:[#allocation13_spill] sm:$0xff] %v15119_v42  ;;  %8451 = vrot.lane.b32.xlu1 %v7318_v26, %s16390_s21 }
 0x8d0   : > { %16399 = vst [vmem:[#allocation14_spill] sm:$0xff] %v15121_v33  ;;  %9022 = vrot.lane.b32.xlu0 %v7317_v47, %s16397_s22 }
 0x8d3   : > { %8455 = vrot.lane.b32.xlu1 %v7319_v53, %s16390_s21 }
 0x8d4   : > { %10140 = vrot.lane.b32.xlu0 %v7316_v44, %s14267_s26 }
 0x8d7   : > { %9020 = vrot.lane.b32.xlu1 %v7318_v26, %s16397_s22 }
 0x8d8   : > { %10144 = vrot.lane.b32.xlu0 %v7317_v47, %s14267_s26 }
 0x8db   : > { %9024 = vrot.lane.b32.xlu1 %v7319_v53, %s16397_s22  ;;  %s14274_s22 = smov [#allocation2]  }
 0x8dc   : > { %10709 = vrot.lane.b32.xlu0 %v7316_v44, %s16400_s29 }
 0x8df   : > { %10142 = vrot.lane.b32.xlu1 %v7318_v26, %s14267_s26 }
 0x8e0   : > { %10713 = vrot.lane.b32.xlu0 %v7317_v47, %s16400_s29 }
 0x8e3   : > { %10146 = vrot.lane.b32.xlu1 %v7319_v53, %s14267_s26 }
 0x8e4   : > { %11278 = vrot.lane.b32.xlu0 %v7316_v44, %s16401_s16 }
 0x8e7   : > { %10711 = vrot.lane.b32.xlu1 %v7318_v26, %s16400_s29 }
 0x8e8   : > { %11282 = vrot.lane.b32.xlu0 %v7317_v47, %s16401_s16 }
 0x8eb   : > { %10715 = vrot.lane.b32.xlu1 %v7319_v53, %s16400_s29  ;;  %s14196_s29 = sshll.u32 %s14274_s22, 4  ;;  %s14197_s29 = int_to_ptr.vmem [resolvable:$false] %s14196_s29 }
 0x8ec   : > { %11847 = vrot.lane.b32.xlu0 %v7316_v44, %s16402_s17 }
 0x8ef   : > { %11280 = vrot.lane.b32.xlu1 %v7318_v26, %s16401_s16 }
 0x8f0   : > { %11851 = vrot.lane.b32.xlu0 %v7317_v47, %s16402_s17 }
 0x8f3   : > { %11284 = vrot.lane.b32.xlu1 %v7319_v53, %s16401_s16 }
 0x8f4   : > { %7338 = vrot.lane.b32.xlu0 %v7316_v44, %s16403_s23  ;;  %v8472_v44 = vsel %vm6225_vm10, %v13088_v38, 0 }
 0x8f7   : > { %11849 = vrot.lane.b32.xlu1 %v7318_v26, %s16402_s17 }
 0x8f8   : > { %7342 = vrot.lane.b32.xlu0 %v7317_v47, %s16403_s23  ;;  %v13085_v47 = vld [vmem:[%s16311_s6 + $0x10] sm:$0xff] }
 0x8f9   : > { %v7358_v61 = vsel %vm6225_vm10, %v13085_v47, 0 }
 0x8fa   : > { %v15203_v29 = vand.u32 4294901760, %v7358_v61 }
 0x8fb   : > { %11853 = vrot.lane.b32.xlu1 %v7319_v53, %s16402_s17 }
 0x8fc   : > { %16407 = vst [vmem:[#allocation18_spill] sm:$0xff] %v15203_v29 }
 0x8ff   : > { %7340 = vrot.lane.b32.xlu1 %v7318_v26, %s16403_s23 }
 0x903   : > { %7344 = vrot.lane.b32.xlu1 %v7319_v53, %s16403_s23  ;;  %v15186_v53 = vand.u32 4294901760, %v8472_v44 }
 0x905   : > { %16406 = vst [vmem:[#allocation17_spill] sm:$0xff] %v15186_v53  ;;  %v15206_v34 = vsub.f32 %v8472_v44, %v15186_v53 }
 0x907   : > { %16408 = vst [vmem:[#allocation19_spill] sm:$0xff] %v15206_v34 }
 0x932   : > { %v7325_v36 = vpop.permute.xlu0 %7324 }
 0x935   : > { %v7323_v46 = vpop.permute.xlu1 %7322 }
 0x936   : > { %v8450_v40 = vpop.permute.xlu0 %8449 }
 0x939   : > { %v7321_v26 = vpop.permute.xlu1 %7320 }
 0x93a   : > { %v8454_v58 = vpop.permute.xlu0 %8453  ;;  %v7328_v37 = vsel %vm1313_vm3, %v7321_v26, %v7325_v36  ;;  %v7330_v0 = vsel %vm1313_vm3, %v7325_v36, %v7321_v26  ;;  %v7982_v26 = vand.u32 4294901760, %v15199_v15 }
 0x93b   : > { %v7332_v10 = vmul.f32 %v7330_v0, %v14584_v57  ;;  %v7333_v14 = vmul.f32 %v7328_v37, %v14572_v51  ;;  %v8457_v35 = vsel %vm2392_vm4, %v8450_v40, %v8454_v58  ;;  %v8459_v16 = vsel %vm2392_vm4, %v8454_v58, %v8450_v40 }
 0x93c   : > { %v15228_v40 = vsub.f32 %v15181_v45, %v16328_v21  ;;  %v15231_v58 = vsub.f32 %v7358_v61, %v15203_v29  ;;  %v15246_v61 = vsub.f32 %v15184_v50, %v16327_v23 }
 0x93d   : > { %v7909_v18 = vand.u32 4294901760, %v7333_v14  ;;  %v7911_v24 = vand.u32 4294901760, %v7332_v10  ;;  %v7327_v30 = vpop.permute.xlu1 %7326 }
 0x93e   : > { %v9019_v55 = vpop.permute.xlu0 %9018  ;;  %v7329_v19 = vsel %vm1313_vm3, %v7323_v46, %v7327_v30  ;;  %v7331_v36 = vsel %vm1313_vm3, %v7327_v30, %v7323_v46  ;;  %16410 = vst [vmem:[#allocation21_spill] sm:$0xff] %v15231_v58  ;;  %v15234_v46 = vmul.f32 %v8459_v16, %v14472_v62  ;;  %v16336_v30 = vand.u32 4294901760, %v15206_v34 }
 0x93f   : > { %v15218_v38 = vsub.f32 %v7333_v14, %v7909_v18  ;;  %v15220_v47 = vsub.f32 %v7332_v10, %v7911_v24  ;;  %v7334_v44 = vmul.f32 %v7331_v36, %v14584_v57  ;;  %v7335_v41 = vmul.f32 %v7329_v19, %v14572_v51 }
 0x940   : > { %v15237_v57 = vsub.f32 %v7361_v60, %v15208_v39  ;;  %v15240_v51 = vmul.f32 %v8457_v35, %v14475_v63  ;;  %v16337_v23 = vand.u32 4294901760, %v15231_v58 }
 0x941   : > { %v7913_v37 = vand.u32 4294901760, %v7335_v41  ;;  %v7915_v0 = vand.u32 4294901760, %v7334_v44  ;;  %v8452_v10 = vpop.permute.xlu1 %8451  ;;  %v16332_v15 = vand.u32 4294901760, %v15218_v38  ;;  %v16333_v16 = vand.u32 4294901760, %v15220_v47 }
 0x942   : > { %16411 = vst [vmem:[#allocation22_spill] sm:$0xff] %v15237_v57  ;;  %v9023_v14 = vpop.permute.xlu0 %9022 }
 0x943   : > { %v15250_v19 = vpack.c.bf16 %v7915_v0, %v7911_v24  ;;  %v15252_v36 = vsub.f32 %v7335_v41, %v7913_v37  ;;  %v15254_v60 = vsub.f32 %v7334_v44, %v7915_v0  ;;  %v9026_v35 = vsel %vm2936_vm5, %v9019_v55, %v9023_v14 }
 0x944   : > { %v9028_v13 = vsel %vm2936_vm5, %v9023_v14, %v9019_v55  ;;  %v15260_v7 = vpack.c.bf16 %v7913_v37, %v7909_v18  ;;  %v8003_v37 = vsub.f32 %v15218_v38, %v16332_v15  ;;  %v8009_v44 = vsub.f32 %v15220_v47, %v16333_v16 }
 0x945   : > { %v16334_v49 = vand.u32 4294901760, %v15254_v60  ;;  %v15266_v24 = vmul.f32 %v9028_v13, %v14485_v1  ;;  %v8456_v41 = vpop.permute.xlu1 %8455  ;;  %v16335_v14 = vand.u32 4294901760, %v15252_v36  ;;  %v15297_v16 = vsub.f32 %v15206_v34, %v16336_v30 }
 0x946   : > { %v10141_v0 = vpop.permute.xlu0 %10140  ;;  %13398 = vmatprep.subr.bf16.mxu1 %v15260_v7  ;;  %v8458_v55 = vsel %vm2392_vm4, %v8452_v10, %v8456_v41  ;;  %v8460_v18 = vsel %vm2392_vm4, %v8456_v41, %v8452_v10  ;;  %v7993_v10 = vand.u32 4294901760, %v15228_v40  ;;  %v15306_v40 = vsub.f32 %v15231_v58, %v16337_v23 }
 0x947   : > { %v8021_v6 = vsub.f32 %v15254_v60, %v16334_v49  ;;  %v15286_v21 = vmul.f32 %v8460_v18, %v14472_v62  ;;  %13400 = vmatpush1.bf16.msra.mxu1 %v15250_v19  ;;  %v8015_v41 = vsub.f32 %v15252_v36, %v16335_v14  ;;  %v15300_v49 = vmul.f32 %v8458_v55, %v14475_v63 }
 0x948   : > { %v16412_v14 = vand.u32 4294901760, %v15234_v46  ;;  %v9045_v30 = vand.u32 4294901760, %v15266_v24  ;;  %v8004_v63 = vand.u32 4294901760, %v8003_v37  ;;  %v16413_v62 = vand.u32 4294901760, %v15240_v51 }
 0x949   : > { %v9021_v18 = vpop.permute.xlu1 %9020  ;;  %v8022_v13 = vand.u32 4294901760, %v8021_v6  ;;  %v8016_v55 = vand.u32 4294901760, %v8015_v41  ;;  %v8010_v52 = vand.u32 4294901760, %v8009_v44  ;;  %v16342_v54 = vand.u32 4294901760, %v15300_v49 }
 0x94a   : > { %v15311_v15 = vsub.f32 %v15234_v46, %v16412_v14  ;;  %v10145_v22 = vpop.permute.xlu0 %10144  ;;  %7983 = vmatmul.mubr.f32.vlgmr.msra.gmra.mrb[6].mxu1 %v7982_v26  ;;  %v15317_v6 = vsub.f32 %v15240_v51, %v16413_v62  ;;  %v16415_v14 = vand.u32 4294901760, %v15237_v57  ;;  %v15328_v26 = vmul.f32 %v9026_v35, %v14488_v2 }
 0x94b   : > { %v10148_v23 = vsel %vm4007_vm6, %v10141_v0, %v10145_v22  ;;  %7988 = vmatprep.mubr.f32.mxu1 %v16414_v28  ;;  %v10150_v37 = vsel %vm4007_vm6, %v10145_v22, %v10141_v0  ;;  %v13401_v62 = vpack.c.bf16 %v8016_v55, %v8004_v63  ;;  %v16417_v59 = vand.u32 4294901760, %v15286_v21 }
 0x94c   : > { %v15325_v3 = vsub.f32 %v15237_v57, %v16415_v14  ;;  %v15333_v41 = vmul.f32 %v10148_v23, %v14496_v4  ;;  %v13403_v14 = vpack.c.bf16 %v8022_v13, %v8010_v52  ;;  %v13405_v35 = vpack.c.bf16 %v15252_v36, %v15218_v38 }
 0x94d   : > { %v15339_v44 = vsub.f32 %v15286_v21, %v16417_v59  ;;  %v9025_v42 = vpop.permute.xlu1 %9024  ;;  %v16343_v33 = vand.u32 4294901760, %v15311_v15  ;;  %v15345_v22 = vsub.f32 %v15266_v24, %v9045_v30  ;;  %13402 = vmatprep.subr.bf16.mxu1 %v13401_v62  ;;  %v15358_v55 = vmul.f32 %v10150_v37, %v14499_v5 }
 0x94e   : > { %16416 = vst [vmem:[#allocation23_spill] sm:$0xff] %v15325_v3  ;;  %v10710_v23 = vpop.permute.xlu0 %10709  ;;  %7994 = vmatmul.mubr.f32.gmra.mrb[8].mxu1 %v7993_v10  ;;  %v9027_v0 = vsel %vm2936_vm5, %v9021_v18, %v9025_v42  ;;  %v9029_v59 = vsel %vm2936_vm5, %v9025_v42, %v9021_v18  ;;  %v16345_v63 = vand.u32 4294901760, %v15333_v41  ;;  %v9043_v10 = vand.u32 4294901760, %v15328_v26 }
 0x94f   : > { %16418 = vst [vmem:[#allocation24_spill] sm:$0xff] %v15345_v22  ;;  %v9032_v52 = vmul.f32 %v9029_v59, %v14485_v1  ;;  %v9033_v13 = vmul.f32 %v9027_v0, %v14488_v2  ;;  %13404 = vmatpush1.bf16.msra.mxu1 %v13403_v14  ;;  %8084 = vmatprep.mubr.f32.mxu1 %v16414_v28  ;;  %v16426_v48 = vand.u32 4294901760, %v15339_v44 }
 0x950   : > { %13406 = vmatprep.subr.bf16.mxu1 %v13405_v35  ;;  %v15365_v1 = vsub.f32 %v15300_v49, %v16342_v54  ;;  %v13407_v0 = vpack.c.bf16 %v15254_v60, %v15220_v47  ;;  %v15373_v37 = vsub.f32 %v15311_v15, %v16343_v33  ;;  %v15381_v24 = vsub.f32 %v15333_v41, %v16345_v63 }
 0x951   : > { %v9049_v18 = vand.u32 4294901760, %v9032_v52  ;;  %v10143_v14 = vpop.permute.xlu1 %10142  ;;  %v9047_v59 = vand.u32 4294901760, %v9033_v13  ;;  %v15390_v35 = vsub.f32 %v15328_v26, %v9043_v10  ;;  %v16424_v63 = vand.u32 4294901760, %v15234_v46 }
 0x952   : > { %v10714_v42 = vpop.permute.xlu0 %10713  ;;  %8086 = vmatmul.mubr.f32.vlgmr.msra.gmra.mrb[6].mxu1 %v15158_v17  ;;  %v8586_v56 = vsub.f32 %v15339_v44, %v16426_v48 }
 0x953   : > { %v15383_v54 = vpack.c.bf16 %v9049_v18, %v9045_v30  ;;  %v15385_v2 = vsub.f32 %v9032_v52, %v9049_v18  ;;  %v10717_v33 = vsel %vm4551_vm7, %v10710_v23, %v10714_v42  ;;  %13408 = vmatpush1.bf16.msra.mxu1 %v13407_v0  ;;  %16421 = vst [vmem:[#allocation27_spill] sm:$0xff] %v15390_v35  ;;  %v16422_v30 = vand.u32 4294901760, %v15218_v38 }
 0x954   : > { %v10719_v62 = vsel %vm4551_vm7, %v10714_v42, %v10710_v23  ;;  %13410 = vmatprep.subr.bf16.mxu1 %v15260_v7  ;;  %8091 = vmatprep.mubr.f32.mxu1 %v16414_v28  ;;  %v16423_v52 = vand.u32 4294901760, %v15252_v36  ;;  %v16425_v0 = vand.u32 4294901760, %v15286_v21  ;;  %v15412_v57 = vsub.f32 %v9033_v13, %v9047_v59 }
 0x955   : > { %16419 = vst [vmem:[#allocation25_spill] sm:$0xff] %v15383_v54  ;;  %16420 = vst [vmem:[#allocation26_spill] sm:$0xff] %v15385_v2  ;;  %v16356_v23 = vand.u32 4294901760, %v15385_v2  ;;  %v10147_v42 = vpop.permute.xlu1 %10146  ;;  %v16428_v36 = vand.u32 4294901760, %v15317_v6  ;;  %v16432_v13 = vand.u32 4294901760, %v15254_v60  ;;  %v15457_v50 = vpack.c.bf16 %v9047_v59, %v9043_v10 }
 0x956   : > { %v13413_v18 = vpack.c.bf16 %v16423_v52, %v16422_v30  ;;  %v15405_v26 = vpack.c.bf16 %v16425_v0, %v16424_v63  ;;  %16427 = vst [vmem:[#allocation28_spill] sm:$0xff] %v15412_v57  ;;  %v11279_v38 = vpop.permute.xlu0 %11278  ;;  %8093 = vmatmul.mubr.f32.gmra.mrb[8].mxu1 %v15168_v32  ;;  %v10149_v46 = vsel %vm4007_vm6, %v10143_v14, %v10147_v42  ;;  %v16429_v63 = vand.u32 4294901760, %v15345_v22 }
 0x957   : > { %v10151_v21 = vsel %vm4007_vm6, %v10147_v42, %v10143_v14  ;;  %v15422_v48 = vsub.f32 %v15317_v6, %v16428_v36  ;;  %v15429_v52 = vmul.f32 %v10717_v33, %v14505_v8  ;;  %v10154_v0 = vmul.f32 %v10149_v46, %v14496_v4  ;;  %8171 = vmatprep.mubr.f32.mxu1 %v16414_v28 }
 0x958   : > { %v9143_v30 = vsub.f32 %v15345_v22, %v16429_v63  ;;  %v16430_v14 = vand.u32 4294901760, %v15358_v55  ;;  %v9155_v36 = vsub.f32 %v15385_v2, %v16356_v23  ;;  %v16431_v63 = vand.u32 4294901760, %v15220_v47  ;;  %16436 = vst [vmem:[#allocation29_spill] sm:$0xff] %v15457_v50 }
 0x959   : > { %v16433_v33 = vand.u32 4294901760, %v15240_v51  ;;  %v16434_v4 = vand.u32 4294901760, %v15300_v49  ;;  %v10171_v58 = vand.u32 4294901760, %v10154_v0  ;;  %v10712_v34 = vpop.permute.xlu1 %10711  ;;  %v8575_v23 = vand.u32 4294901760, %v15373_v37 }
 0x95a   : > { %v15436_v42 = vsub.f32 %v15358_v55, %v16430_v14  ;;  %v13415_v54 = vpack.c.bf16 %v16432_v13, %v16431_v63  ;;  %v16435_v14 = vand.u32 4294901760, %v15365_v1  ;;  %v11283_v47 = vpop.permute.xlu0 %11282  ;;  %8174 = vmatmul.mubr.f32.vlgmr.msra.gmra.mrb[6].mxu1 %v15166_v31  ;;  %v8587_v60 = vand.u32 4294901760, %v8586_v56 }
 0x95b   : > { %v15449_v46 = vpack.c.bf16 %v16434_v4, %v16433_v33  ;;  %v9136_v49 = vand.u32 4294901760, %v15390_v35  ;;  %v9148_v13 = vand.u32 4294901760, %v15412_v57  ;;  %v16437_v63 = vand.u32 4294901760, %v15381_v24  ;;  %13412 = vmatpush1.bf16.msra.mxu1 %v15250_v19  ;;  %8179 = vmatprep.mubr.f32.mxu1 %v16414_v28 }
 0x95c   : > { %v15454_v39 = vsub.f32 %v15365_v1, %v16435_v14  ;;  %v10736_v4 = vand.u32 4294901760, %v15429_v52  ;;  %v16438_v10 = vand.u32 4294901760, %v15333_v41  ;;  %v11286_v59 = vsel %vm5095_vm8, %v11279_v38, %v11283_v47  ;;  %13414 = vmatprep.subr.bf16.mxu1 %v13413_v18 }
 0x95d   : > { %v15466_v33 = vsub.f32 %v15381_v24, %v16437_v63  ;;  %v11288_v56 = vsel %vm5095_vm8, %v11283_v47, %v11279_v38  ;;  %v15479_v14 = vmul.f32 %v11286_v59, %v14514_v11  ;;  %v9144_v63 = vand.u32 4294901760, %v9143_v30 }
 0x95e   : > { %v15471_v37 = vpack.c.bf16 %v10171_v58, %v16438_v10  ;;  %v9156_v51 = vand.u32 4294901760, %v9155_v36  ;;  %v15483_v41 = vmul.f32 %v10719_v62, %v14508_v9  ;;  %v10716_v10 = vpop.permute.xlu1 %10715  ;;  %v9137_v50 = vsub.f32 %v15390_v35, %v9136_v49  ;;  %v11848_v53 = vpop.permute.xlu0 %11847  ;;  %8182 = vmatmul.mubr.f32.gmra.mrb[8].mxu1 %v15181_v45 }
 0x95f   : > { %v9149_v29 = vsub.f32 %v15412_v57, %v9148_v13  ;;  %v10718_v18 = vsel %vm4551_vm7, %v10712_v34, %v10716_v10  ;;  %v10720_v38 = vsel %vm4551_vm7, %v10716_v10, %v10712_v34  ;;  %v15493_v30 = vpack.c.bf16 %v8587_v60, %v8575_v23  ;;  %8256 = vmatprep.mubr.f32.mxu1 %v16414_v28 }
 0x960   : > { %16439 = vst [vmem:[#allocation30_spill] sm:$0xff] %v15471_v37  ;;  %v8581_v37 = vand.u32 4294901760, %v15454_v39  ;;  %v15495_v62 = vpack.c.bf16 %v9156_v51, %v9144_v63  ;;  %v10155_v36 = vmul.f32 %v10151_v21, %v14499_v5  ;;  %v16368_v39 = vand.u32 4294901760, %v15479_v14 }
 0x961   : > { %v10723_v47 = vmul.f32 %v10718_v18, %v14505_v8  ;;  %v15504_v3 = vsub.f32 %v15429_v52, %v10736_v4  ;;  %v9138_v43 = vand.u32 4294901760, %v9137_v50  ;;  %v9150_v34 = vand.u32 4294901760, %v9149_v29 }
 0x962   : > { %16440 = vst [vmem:[#allocation31_spill] sm:$0xff] %v15495_v62  ;;  %v15508_v51 = vsub.f32 %v10154_v0, %v10171_v58  ;;  %v15511_v5 = vmul.f32 %v11288_v56, %v14517_v12  ;;  %v11281_v8 = vpop.permute.xlu1 %11280  ;;  %v15516_v63 = vmul.f32 %v10720_v38, %v14508_v9  ;;  %v11852_v52 = vpop.permute.xlu0 %11851  ;;  %v16441_v50 = vand.u32 4294901760, %v15166_v31 }
 0x963   : > { %v10740_v21 = vand.u32 4294901760, %v10723_v47  ;;  %v15520_v29 = vpack.c.bf16 %v9150_v34, %v9138_v43  ;;  %v15522_v10 = vpack.c.bf16 %v9148_v13, %v9136_v49  ;;  %v16443_v58 = vand.u32 4294901760, %v15345_v22  ;;  %v14186_v34 = vld [vmem:[%s16307_s2 + $0x10] ss:$0 sm:$0xff] }
 0x964   : > { %8260 = vmatmul.mubr.f32.vlgmr.msra.gmra.mrb[6].mxu1 %v16441_v50  ;;  %v16444_v0 = vand.u32 4294901760, %v15385_v2  ;;  %v16370_v18 = vand.u32 4294901760, %v15483_v41  ;;  %v15534_v9 = vsub.f32 %v15479_v14, %v16368_v39  ;;  %v11855_v31 = vsel %vm5639_vm9, %v11848_v53, %v11852_v52 }
 0x965   : > { %16442 = vst [vmem:[#allocation32_spill] sm:$0xff] %v15522_v10  ;;  %v15536_v38 = vpack.c.bf16 %v10740_v21, %v10736_v4  ;;  %13416 = vmatpush1.bf16.msra.mxu1 %v13415_v54  ;;  %v16369_v43 = vand.u32 4294901760, %v15504_v3  ;;  %v10169_v49 = vand.u32 4294901760, %v10155_v36  ;;  %v11857_v13 = vsel %vm5639_vm9, %v11852_v52, %v11848_v53  ;;  %8265 = vmatprep.mubr.f32.mxu1 %v16414_v28  ;;  %v14187_v53 = vld [vmem:[%s16307_s2 + $0x18] ss:$0 sm:$0xff] }
 0x966   : > { %v15528_v56 = vpack.c.bf16 %v16444_v0, %v16443_v58  ;;  %v15546_v50 = vmul.f32 %v14186_v34, %v11855_v31  ;;  %13418 = vmatprep.subr.bf16.mxu1 %v15260_v7  ;;  %v16372_v4 = vand.u32 4294901760, %v15508_v51  ;;  %v16371_v54 = vand.u32 4294901760, %v15511_v5  ;;  %v11285_v0 = vpop.permute.xlu1 %11284  ;;  %v7339_v7 = vpop.permute.xlu0 %7338 }
 0x967   : > { %16446 = vst [vmem:[#allocation34_spill] sm:$0xff] %v15536_v38  ;;  %v15552_v58 = vsub.f32 %v10723_v47, %v10740_v21  ;;  %v15557_v52 = vmul.f32 %v14187_v53, %v11857_v13  ;;  %v16447_v23 = vand.u32 4294901760, %v15181_v45  ;;  %v11287_v59 = vsel %vm5095_vm8, %v11281_v8, %v11285_v0 }
 0x968   : > { %16445 = vst [vmem:[#allocation33_spill] sm:$0xff] %v15528_v56  ;;  %v11289_v47 = vsel %vm5095_vm8, %v11285_v0, %v11281_v8  ;;  %v16374_v21 = vand.u32 4294901760, %v15534_v9  ;;  %v11292_v13 = vmul.f32 %v11287_v59, %v14514_v11  ;;  %v16448_v60 = vand.u32 4294901760, %v15422_v48 }
 0x969   : > { %8269 = vmatmul.mubr.f32.gmra.mrb[8].mxu1 %v16447_v23  ;;  %v15570_v39 = vmul.f32 %v11289_v47, %v14517_v12  ;;  %v15578_v45 = vsub.f32 %v15483_v41, %v16370_v18  ;;  %v15580_v23 = vsub.f32 %v10155_v36, %v10169_v49  ;;  %v16449_v11 = vand.u32 4294901760, %v15358_v55 }
 0x96a   : > { %8351 = vmatprep.mubr.f32.mxu1 %v16414_v28  ;;  %v13425_v31 = vpack.c.bf16 %v8581_v37, %v16448_v60  ;;  %v15591_v12 = vsub.f32 %v15504_v3, %v16369_v43  ;;  %v11309_v60 = vand.u32 4294901760, %v11292_v13  ;;  %v11850_v0 = vpop.permute.xlu1 %11849  ;;  %v10277_v36 = vsub.f32 %v15508_v51, %v16372_v4  ;;  %v7343_v43 = vpop.permute.xlu0 %7342 }
 0x96b   : > { %v15586_v59 = vpack.c.bf16 %v10169_v49, %v16449_v11  ;;  %v15601_v55 = vsub.f32 %v15511_v5, %v16371_v54  ;;  %v16451_v49 = vand.u32 4294901760, %v15516_v63  ;;  %v16452_v11 = vand.u32 4294901760, %v15546_v50 }
 0x96c   : > { %v15617_v18 = vsub.f32 %v15534_v9, %v16374_v21  ;;  %v16453_v4 = vand.u32 4294901760, %v15479_v14  ;;  %v7348_v48 = vsel %vm1332_vm2, %v7343_v43, %v7339_v7  ;;  %v10258_v14 = vand.u32 4294901760, %v15436_v42 }
 0x96d   : > { %16450 = vst [vmem:[#allocation35_spill] sm:$0xff] %v15586_v59  ;;  %v15606_v47 = vsub.f32 %v15516_v63, %v16451_v49  ;;  %v15611_v8 = vsub.f32 %v15546_v50, %v16452_v11  ;;  %8353 = vmatmul.mubr.f32.vlgmr.msra.gmra.mrb[6].mxu1 %v15158_v17  ;;  %v7346_v49 = vsel %vm1332_vm2, %v7339_v7, %v7343_v43  ;;  %v10278_v2 = vand.u32 4294901760, %v10277_v36 }
 0x96e   : > { %v15622_v37 = vpack.c.bf16 %v11309_v60, %v16453_v4  ;;  %13420 = vmatpush1.bf16.msra.mxu1 %v15250_v19  ;;  %v15627_v11 = vsub.f32 %v11292_v13, %v11309_v60  ;;  %v15632_v38 = vmul.f32 %v7346_v49, %v14553_v27  ;;  %8358 = vmatprep.mubr.f32.mxu1 %v16414_v28  ;;  %v16455_v4 = vand.u32 4294901760, %v15552_v58  ;;  %v11854_v7 = vpop.permute.xlu1 %11853 }
 0x96f   : > { %13422 = vmatprep.subr.bf16.mxu1 %v15449_v46  ;;  %v16456_v19 = vand.u32 4294901760, %v15557_v52  ;;  %v15648_v43 = vmul.f32 %v7348_v48, %v14550_v25  ;;  %v10270_v60 = vand.u32 4294901760, %v15580_v23  ;;  %v16459_v57 = vand.u32 4294901760, %v15546_v50 }
 0x970   : > { %16454 = vst [vmem:[#allocation36_spill] sm:$0xff] %v15622_v37  ;;  %v15640_v21 = vsub.f32 %v15552_v58, %v16455_v4  ;;  %v16379_v54 = vand.u32 4294901760, %v15632_v38  ;;  %v11856_v4 = vsel %vm5639_vm9, %v11850_v0, %v11854_v7  ;;  %v11858_v37 = vsel %vm5639_vm9, %v11854_v7, %v11850_v0 }
 0x971   : > { %v15645_v13 = vsub.f32 %v15557_v52, %v16456_v19  ;;  %8360 = vmatmul.mubr.f32.gmra.mrb[8].mxu1 %v15168_v32  ;;  %v16457_v19 = vand.u32 4294901760, %v15570_v39  ;;  %v7365_v59 = vand.u32 4294901760, %v15648_v43  ;;  %v11861_v56 = vmul.f32 %v14186_v34, %v11856_v4 }
 0x972   : > { %v15664_v10 = vmul.f32 %v14187_v53, %v11858_v37  ;;  %8434 = vmatprep.mubr.f32.mxu1 %v16414_v28  ;;  %v15671_v22 = vsub.f32 %v15632_v38, %v16379_v54  ;;  %v10259_v0 = vsub.f32 %v15436_v42, %v10258_v14  ;;  %v10266_v7 = vand.u32 4294901760, %v15466_v33  ;;  %v7341_v37 = vpop.permute.xlu1 %7340 }
 0x973   : > { %v15661_v48 = vsub.f32 %v15570_v39, %v16457_v19  ;;  %v15676_v19 = vsub.f32 %v15648_v43, %v7365_v59  ;;  %v11878_v53 = vand.u32 4294901760, %v11861_v56  ;;  %v10271_v4 = vsub.f32 %v15580_v23, %v10270_v60 }
 0x974   : > { %v16458_v43 = vand.u32 4294901760, %v15611_v8  ;;  %v10260_v36 = vand.u32 4294901760, %v10259_v0  ;;  %v15700_v54 = vpack.c.bf16 %v10278_v2, %v10266_v7  ;;  %v15702_v49 = vpack.c.bf16 %v10270_v60, %v10258_v14 }
 0x975   : > { %8436 = vmatmul.mubr.f32.vlgmr.msra.gmra.mrb[6].mxu1 %v15158_v17  ;;  %v15694_v62 = vpack.c.bf16 %v11878_v53, %v16459_v57  ;;  %v15696_v17 = vsub.f32 %v11861_v56, %v11878_v53  ;;  %v10272_v33 = vand.u32 4294901760, %v10271_v4  ;;  %v16462_v57 = vand.u32 4294901760, %v15664_v10 }
 0x976   : > { %v15689_v35 = vsub.f32 %v15611_v8, %v16458_v43  ;;  %13424 = vmatpush1.bf16.msra.mxu1 %v15405_v26  ;;  %8441 = vmatprep.mubr.f32.mxu1 %v16414_v28  ;;  %v16461_v43 = vand.u32 4294901760, %v15627_v11  ;;  %v7345_v50 = vpop.permute.xlu1 %7344  ;;  %v16463_v53 = vand.u32 4294901760, %v15381_v24  ;;  %v16465_v2 = vand.u32 4294901760, %v15483_v41 }
 0x977   : > { %16460 = vst [vmem:[#allocation37_spill] sm:$0xff] %v15694_v62  ;;  %13426 = vmatprep.subr.bf16.mxu1 %v13425_v31  ;;  %v15712_v56 = vsub.f32 %v15664_v10, %v16462_v57  ;;  %v16464_v31 = vand.u32 4294901760, %v15508_v51  ;;  %v16466_v14 = vand.u32 4294901760, %v15516_v63  ;;  %v7347_v7 = vsel %vm1332_vm2, %v7341_v37, %v7345_v50 }
 0x978   : > { %v15707_v34 = vsub.f32 %v15627_v11, %v16461_v43  ;;  %v7349_v4 = vsel %vm1332_vm2, %v7345_v50, %v7341_v37  ;;  %v16467_v43 = vand.u32 4294901760, %v15671_v22  ;;  %v16468_v41 = vand.u32 4294901760, %v15676_v19 }
 0x979   : > { %v15718_v0 = vpack.c.bf16 %v16464_v31, %v16463_v53  ;;  %v15724_v60 = vpack.c.bf16 %v16466_v14, %v16465_v2  ;;  %8443 = vmatmul.mubr.f32.gmra.mrb[8].mxu1 %v15168_v32  ;;  %v15736_v53 = vpack.c.bf16 %v10272_v33, %v10260_v36  ;;  %v7352_v31 = vmul.f32 %v7349_v4, %v14550_v25 }
 0x97a   : > { %v15734_v57 = vsub.f32 %v15671_v22, %v16467_v43  ;;  %v15741_v63 = vsub.f32 %v15676_v19, %v16468_v41  ;;  %v7353_v2 = vmul.f32 %v7347_v7, %v14553_v27  ;;  %8542 = vmatprep.mubr.f32.mxu1 %v16414_v28  ;;  %v10827_v20 = vand.u32 4294901760, %v15578_v45 }
 0x97b   : > { %v10839_v37 = vand.u32 4294901760, %v15606_v47  ;;  %v10835_v33 = vand.u32 4294901760, %v15591_v12  ;;  %v10847_v36 = vand.u32 4294901760, %v15640_v21  ;;  %v7369_v14 = vand.u32 4294901760, %v7352_v31 }
 0x97c   : > { %v7367_v50 = vand.u32 4294901760, %v7353_v2  ;;  %v16469_v27 = vand.u32 4294901760, %v15246_v61  ;;  %v10828_v7 = vsub.f32 %v15578_v45, %v10827_v20  ;;  %v11396_v61 = vand.u32 4294901760, %v15601_v55 }
 0x97d   : > { %v10840_v4 = vsub.f32 %v15606_v47, %v10839_v37  ;;  %v15759_v41 = vpack.c.bf16 %v10847_v36, %v10835_v33  ;;  %v15761_v12 = vpack.c.bf16 %v10839_v37, %v10827_v20  ;;  %v15763_v21 = vpack.c.bf16 %v7369_v14, %v7365_v59 }
 0x97e   : > { %8548 = vmatmul.mubr.f32.vlgmr.msra.gmra.mrb[6].mxu1 %v16469_v27  ;;  %v15765_v32 = vsub.f32 %v7353_v2, %v7367_v50  ;;  %v15767_v62 = vsub.f32 %v7352_v31, %v7369_v14  ;;  %v16471_v27 = vpack.c.bf16 %v15365_v1, %v15317_v6  ;;  %v16472_v33 = vand.u32 4294901760, %v15632_v38 }
 0x97f   : > { %16470 = vst [vmem:[#allocation38_spill] sm:$0xff] %v15761_v12  ;;  %13428 = vmatpush1.bf16.msra.mxu1 %v15493_v30  ;;  %8553 = vmatprep.mubr.f32.mxu1 %v16414_v28  ;;  %v10829_v59 = vand.u32 4294901760, %v10828_v7  ;;  %v10841_v37 = vand.u32 4294901760, %v10840_v4  ;;  %v16473_v2 = vand.u32 4294901760, %v15504_v3  ;;  %v16474_v31 = vand.u32 4294901760, %v15552_v58 }
 0x980   : > { %13430 = vmatprep.subr.bf16.mxu1 %v16471_v27  ;;  %v15777_v20 = vpack.c.bf16 %v7367_v50, %v16472_v33  ;;  %v16476_v30 = vand.u32 4294901760, %v15696_v17  ;;  %v16383_v25 = vand.u32 4294901760, %v15767_v62  ;;  %v7458_v27 = vand.u32 4294901760, %v15734_v57 }
 0x981   : > { %v15783_v36 = vpack.c.bf16 %v16474_v31, %v16473_v2  ;;  %v16384_v38 = vand.u32 4294901760, %v15765_v32  ;;  %v16477_v50 = vand.u32 4294901760, %v15297_v16  ;;  %v15794_v7 = vpack.c.bf16 %v10841_v37, %v10829_v59 }
 0x982   : > { %v11984_v14 = vsub.f32 %v15696_v17, %v16476_v30  ;;  %13374 = vmatprep.subr.bf16.mxu0 %v15777_v20  ;;  %v16478_v4 = vand.u32 4294901760, %v15511_v5  ;;  %v16479_v33 = vand.u32 4294901760, %v15570_v39  ;;  %v11397_v31 = vsub.f32 %v15601_v55, %v11396_v61 }
 0x983   : > { %16475 = vst [vmem:[#allocation39_spill] sm:$0xff] %v15783_v36  ;;  %8559 = vmatmul.mubr.f32.gmra.mrb[8].mxu1 %v16477_v50  ;;  %v11408_v30 = vand.u32 4294901760, %v15661_v48  ;;  %v7475_v57 = vsub.f32 %v15767_v62, %v16383_v25  ;;  %13376 = vmatpush1.bf16.msra.mxu0 %v15763_v21  ;;  %v7469_v16 = vsub.f32 %v15765_v32, %v16384_v38  ;;  %v7464_v39 = vand.u32 4294901760, %v15741_v63 }
 0x984   : > { %v15800_v2 = vpack.c.bf16 %v16479_v33, %v16478_v4  ;;  %8649 = vmatprep.mubr.f32.mxu1 %v16414_v28  ;;  %v13381_v5 = vpack.c.bf16 %v15765_v32, %v15671_v22  ;;  %v11398_v59 = vand.u32 4294901760, %v11397_v31  ;;  %v11404_v50 = vand.u32 4294901760, %v15617_v18 }
 0x985   : > { %v11409_v37 = vsub.f32 %v15661_v48, %v11408_v30  ;;  %v11416_v4 = vand.u32 4294901760, %v15707_v34  ;;  %v7470_v33 = vand.u32 4294901760, %v7469_v16  ;;  %v7476_v43 = vand.u32 4294901760, %v7475_v57 }
 0x986   : > { %16480 = vst [vmem:[#allocation40_spill] sm:$0xff] %v15800_v2  ;;  %v13549_v25 = vpack.c.bf16 %v15661_v48, %v15601_v55  ;;  %v13551_v38 = vpack.c.bf16 %v15627_v11, %v15534_v9  ;;  %v16481_v63 = vand.u32 4294901760, %v15306_v40  ;;  %v16482_v2 = vld [vmem:[#allocation15_spill] sm:$0xff]  ;;  %v15827_v12 = vpack.c.bf16 %v11408_v30, %v11396_v61  ;;  %v14188_v55 = vld [vmem:[%s16313_s8 + $0x8] sm:$0xff] }
 0x987   : > { %8651 = vmatmul.mubr.f32.vlgmr.msra.gmra.mrb[6].mxu1 %v16482_v2  ;;  %v11410_v31 = vand.u32 4294901760, %v11409_v37  ;;  %v15825_v36 = vpack.c.bf16 %v11416_v4, %v11404_v50  ;;  %v16483_v18 = vand.u32 4294901760, %v15534_v9  ;;  %v16484_v34 = vand.u32 4294901760, %v15627_v11  ;;  %v14189_v9 = vld [vmem:[%s16313_s8] sm:$0xff] }
 0x988   : > { %7437 = vmatmul.mubr.f32.vlgmr.msra.gmra.mrb[6].mxu0 %v16481_v63  ;;  %v16485_v16 = vpack.c.bf16 %v15339_v44, %v15311_v15  ;;  %v13377_v40 = vpack.c.bf16 %v7470_v33, %v7458_v27  ;;  %v13379_v63 = vpack.c.bf16 %v7476_v43, %v7464_v39  ;;  %v16486_v37 = vand.u32 4294901760, %v15557_v52  ;;  %8656 = vmatprep.mubr.f32.mxu1 %v16414_v28 }
 0x989   : > { %v15833_v57 = vpack.c.bf16 %v16484_v34, %v16483_v18  ;;  %7442 = vmatprep.mubr.f32.mxu0 %v16414_v28  ;;  %v16487_v50 = vand.u32 4294901760, %v15664_v10  ;;  %v11965_v30 = vand.u32 4294901760, %v15645_v13  ;;  %v15848_v4 = vpack.c.bf16 %v11410_v31, %v11398_v59  ;;  %v16490_v31 = vld [vmem:[#allocation23_spill] sm:$0xff] }
 0x98a   : > { %13432 = vmatpush1.bf16.msra.mxu1 %v16485_v16  ;;  %v11977_v18 = vand.u32 4294901760, %v15712_v56  ;;  %v11973_v34 = vand.u32 4294901760, %v15689_v35  ;;  %v11985_v27 = vand.u32 4294901760, %v11984_v14  ;;  %13378 = vmatprep.subr.bf16.mxu0 %v13377_v40  ;;  %v13573_v10 = vpack.c.bf16 %v15712_v56, %v15645_v13  ;;  %v16492_v35 = vld [vmem:[#allocation17_spill] sm:$0xff] }
 0x98b   : > { %v15843_v61 = vpack.c.bf16 %v16487_v50, %v16486_v37  ;;  %13434 = vmatprep.subr.bf16.mxu1 %v15449_v46  ;;  %v11966_v52 = vsub.f32 %v15645_v13, %v11965_v30  ;;  %v13575_v43 = vpack.c.bf16 %v15696_v17, %v15611_v8  ;;  %v16488_v39 = vand.u32 4294901760, %v15611_v8  ;;  %8658 = vmatmul.mubr.f32.gmra.mrb[8].mxu1 %v16492_v35  ;;  %v14190_v8 = vld [vmem:[%s14384_s25 + $0x8] sm:$0xff] }
 0x98c   : > { %v16489_v33 = vand.u32 4294901760, %v15696_v17  ;;  %v16491_v16 = vand.u32 4294901760, %v16490_v31  ;;  %v11978_v14 = vsub.f32 %v15712_v56, %v11977_v18  ;;  %v15867_v40 = vpack.c.bf16 %v11985_v27, %v11973_v34  ;;  %13380 = vmatpush1.bf16.msra.mxu0 %v13379_v63  ;;  %8736 = vmatprep.mubr.f32.mxu1 %v16414_v28  ;;  %v16493_v31 = vld [vmem:[#allocation18_spill] sm:$0xff]  ;;  %v16498_v27 = vld [vmem:[#allocation19_spill] sm:$0xff]  ;;  %v356_v17 = vld [vmem:[%s16312_s7] sm:$0xff] }
 0x98d   : > { %v15869_v37 = vpack.c.bf16 %v11977_v18, %v11965_v30  ;;  %13382 = vmatprep.subr.bf16.mxu0 %v13381_v5  ;;  %v11967_v50 = vand.u32 4294901760, %v11966_v52  ;;  %v16495_v34 = vand.u32 4294901760, %v15317_v6  ;;  %v16496_v30 = vand.u32 4294901760, %v15365_v1  ;;  %v16497_v5 = vld [vmem:[#allocation20_spill] sm:$0xff]  ;;  %v13089_v6 = vld [vmem:[%s16311_s6 + $0x30] sm:$0xff] }
 0x98e   : > { %v15861_v59 = vpack.c.bf16 %v16489_v33, %v16488_v39  ;;  %7448 = vmatmul.mubr.f32.gmra.mrb[8].mxu0 %v16491_v16  ;;  %v11979_v39 = vand.u32 4294901760, %v11978_v14  ;;  %v13383_v33 = vpack.c.bf16 %v15767_v62, %v15676_v19  ;;  %v16494_v16 = vld [vmem:[#allocation16_spill] sm:$0xff]  ;;  %v16499_v1 = vand.u32 4294901760, %v15311_v15 }
 0x98f   : > { %7538 = vmatprep.mubr.f32.mxu0 %v16414_v28  ;;  %8739 = vmatmul.mubr.f32.vlgmr.msra.gmra.mrb[6].mxu1 %v16494_v16  ;;  %v13437_v18 = vpack.c.bf16 %v16496_v30, %v16495_v34  ;;  %v16500_v52 = vand.u32 4294901760, %v15339_v44  ;;  %v16504_v34 = vand.u32 4294901760, %v15765_v32  ;;  %v13090_v15 = vld [vmem:[%s16311_s6 + $0x38] sm:$0xff]  ;;  %v16505_v44 = vld [vmem:[#allocation22_spill] sm:$0xff]  ;;  %v14273_v11 = vmov 6  }
 0x990   : > { %v15881_v63 = vpack.c.bf16 %v11979_v39, %v11967_v50  ;;  %13436 = vmatpush1.bf16.msra.mxu1 %v15405_v26  ;;  %8744 = vmatprep.mubr.f32.mxu1 %v16414_v28  ;;  %v16501_v50 = vld [vmem:[#allocation21_spill] sm:$0xff]  ;;  %v16502_v39 = vand.u32 4294901760, %v16494_v16  ;;  %v16507_v16 = vand.u32 4294901760, %v15676_v19  ;;  %v16211_v13 = vand.u32 4294901760, %v14190_v8 }
 0x991   : > { %13438 = vmatprep.subr.bf16.mxu1 %v13437_v18  ;;  %v13439_v14 = vpack.c.bf16 %v16500_v52, %v16499_v1  ;;  %v9038_v18 = vsel %vm6225_vm10, %v13089_v6, 0  ;;  %v16508_v6 = vand.u32 4294901760, %v15767_v62  ;;  %v16509_v52 = vand.u32 4294901760, %v16501_v50 }
 0x992   : > { %7540 = vmatmul.mubr.f32.vlgmr.msra.gmra.mrb[6].mxu0 %v16493_v31  ;;  %v15916_v32 = vand.u32 4294901760, %v9038_v18  ;;  %v16511_v62 = vand.u32 4294901760, %v16505_v44  ;;  %v12437_v56 = vsel %vm372_vm1, %v356_v17, 0 }
 0x993   : > { %13384 = vmatpush1.bf16.msra.mxu0 %v13383_v33  ;;  %7545 = vmatprep.mubr.f32.mxu0 %v16414_v28  ;;  %v16503_v33 = vand.u32 4294901760, %v15671_v22  ;;  %v16506_v22 = vand.u32 4294901760, %v16498_v27  ;;  %v13391_v1 = vpack.c.bf16 %v16508_v6, %v16507_v16  ;;  %v13092_v6 = vld [vmem:[%s16311_s6 + $0x48] sm:$0xff] }
 0x994   : > { %13386 = vmatprep.subr.bf16.mxu0 %v15777_v20  ;;  %8747 = vmatmul.mubr.f32.gmra.mrb[8].mxu1 %v16498_v27  ;;  %v9113_v27 = vsub.f32 %v9038_v18, %v15916_v32  ;;  %v16515_v18 = vld [vmem:[#allocation27_spill] sm:$0xff] }
 0x995   : > { %8821 = vmatprep.mubr.f32.mxu1 %v16414_v28  ;;  %v13389_v30 = vpack.c.bf16 %v16504_v34, %v16503_v33  ;;  %v16512_v33 = vld [vmem:[#allocation25_spill] sm:$0xff] }
 0x996   : > { %7547 = vmatmul.mubr.f32.gmra.mrb[8].mxu0 %v16497_v5  ;;  %v9114_v19 = vand.u32 4294901760, %v9113_v27 }
 0x997   : > { %7625 = vmatprep.mubr.f32.mxu0 %v16414_v28 }
 0x998   : > { %8825 = vmatmul.mubr.f32.vlgmr.msra.gmra.mrb[6].mxu1 %v16502_v39  ;;  %v16510_v39 = vld [vmem:[#allocation29_spill] sm:$0xff] }
 0x999   : > { %13440 = vmatpush1.bf16.msra.mxu1 %v13439_v14  ;;  %8830 = vmatprep.mubr.f32.mxu1 %v16414_v28 }
 0x99a   : > { %7628 = vmatmul.mubr.f32.vlgmr.msra.gmra.mrb[6].mxu0 %v16501_v50  ;;  %13442 = vmatprep.subr.bf16.mxu1 %v15449_v46  ;;  %v9041_v46 = vsel %vm6225_vm10, %v13090_v15, 0 }
 0x99b   : > { %13388 = vmatpush1.bf16.msra.mxu0 %v15763_v21  ;;  %7633 = vmatprep.mubr.f32.mxu0 %v16414_v28  ;;  %v15929_v14 = vand.u32 4294901760, %v9041_v46 }
 0x99c   : > { %13390 = vmatprep.subr.bf16.mxu0 %v13389_v30  ;;  %8834 = vmatmul.mubr.f32.gmra.mrb[8].mxu1 %v16506_v22  ;;  %v13091_v22 = vld [vmem:[%s16311_s6 + $0x40] sm:$0xff] }
 0x99d   : > { %8916 = vmatprep.mubr.f32.mxu1 %v16414_v28  ;;  %v9124_v50 = vsub.f32 %v9041_v46, %v15929_v14  ;;  %v16521_v46 = vld [vmem:[#allocation33_spill] sm:$0xff]  ;;  %v9591_v16 = vsel %vm6225_vm10, %v13091_v22, 0  ;;  %v16533_v22 = vld [vmem:[#allocation11_spill] sm:$0xff] }
 0x99e   : > { %7636 = vmatmul.mubr.f32.gmra.mrb[8].mxu0 %v16505_v44  ;;  %v16518_v44 = vld [vmem:[#allocation24_spill] sm:$0xff] }
 0x99f   : > { %7710 = vmatprep.mubr.f32.mxu0 %v16414_v28 }
 0x9a0   : > { %8918 = vmatmul.mubr.f32.vlgmr.msra.gmra.mrb[6].mxu1 %v16482_v2 }
 0x9a1   : > { %13444 = vmatpush1.bf16.msra.mxu1 %v15405_v26  ;;  %8923 = vmatprep.mubr.f32.mxu1 %v16414_v28  ;;  %v9115_v26 = vsub.f32 %v9113_v27, %v9114_v19 }
 0x9a2   : > { %7714 = vmatmul.mubr.f32.vlgmr.msra.gmra.mrb[6].mxu0 %v16509_v52  ;;  %13446 = vmatprep.subr.bf16.mxu1 %v16510_v39  ;;  %v9594_v52 = vsel %vm6225_vm10, %v13092_v6, 0 }
 0x9a3   : > { %13392 = vmatpush1.bf16.msra.mxu0 %v13391_v1  ;;  %7719 = vmatprep.mubr.f32.mxu0 %v16414_v28  ;;  %v9116_v34 = vand.u32 4294901760, %v9115_v26  ;;  %v9665_v1 = vand.u32 4294901760, %v9591_v16 }
 0x9a4   : > { %13394 = vmatprep.subr.bf16.mxu0 %v15777_v20  ;;  %8925 = vmatmul.mubr.f32.gmra.mrb[8].mxu1 %v16492_v35  ;;  %v9125_v20 = vand.u32 4294901760, %v9124_v50 }
 0x9a5   : > { %8999 = vmatprep.mubr.f32.mxu1 %v16414_v28 }
 0x9a6   : > { %7723 = vmatmul.mubr.f32.gmra.mrb[8].mxu0 %v16511_v62  ;;  %v9126_v30 = vsub.f32 %v9124_v50, %v9125_v20  ;;  %v15987_v62 = vand.u32 4294901760, %v9594_v52 }
 0x9a7   : > { %7805 = vmatprep.mubr.f32.mxu0 %v16414_v28 }
 0x9a8   : > { %9001 = vmatmul.mubr.f32.vlgmr.msra.gmra.mrb[6].mxu1 %v16482_v2  ;;  %v16513_v2 = vld [vmem:[#allocation31_spill] sm:$0xff] }
 0x9a9   : > { %13448 = vmatpush1.bf16.msra.mxu1 %v16512_v33  ;;  %9006 = vmatprep.mubr.f32.mxu1 %v16414_v28 }
 0x9aa   : > { %7807 = vmatmul.mubr.f32.vlgmr.msra.gmra.mrb[6].mxu0 %v16493_v31  ;;  %13450 = vmatprep.subr.bf16.mxu1 %v15520_v29  ;;  %v16514_v29 = vld [vmem:[#allocation28_spill] sm:$0xff] }
 0x9ab   : > { %13396 = vmatpush1.bf16.msra.mxu0 %v15763_v21  ;;  %7812 = vmatprep.mubr.f32.mxu0 %v16414_v28  ;;  %v9127_v21 = vand.u32 4294901760, %v9126_v30  ;;  %v16516_v15 = vpack.c.bf16 %v16514_v29, %v16515_v18  ;;  %v16525_v29 = vld [vmem:[#allocation13_spill] sm:$0xff]  ;;  %v16527_v18 = vld [vmem:[#allocation6_spill] sm:$0xff] }
 0x9ac   : > { %9008 = vmatmul.mubr.f32.gmra.mrb[8].mxu1 %v16492_v35  ;;  %v16517_v35 = vld [vmem:[#allocation26_spill] sm:$0xff] }
 0x9ad   : > { %9111 = vmatprep.mubr.f32.mxu1 %v16414_v28 }
 0x9ae   : > { %7814 = vmatmul.mubr.f32.gmra.mrb[8].mxu0 %v16497_v5 }
 0x9af   : > { %7888 = vmatprep.mubr.f32.mxu0 %v16414_v28 }
 0x9b0   : > { %9117 = vmatmul.mubr.f32.vlgmr.msra.gmra.mrb[6].mxu1 %v9116_v34  ;;  %v16523_v34 = vld [vmem:[#allocation7_spill] sm:$0xff] }
 0x9b1   : > { %13452 = vmatpush1.bf16.msra.mxu1 %v16513_v2  ;;  %9122 = vmatprep.mubr.f32.mxu1 %v16414_v28 }
 0x9b2   : > { %7890 = vmatmul.mubr.f32.vlgmr.msra.gmra.mrb[6].mxu0 %v16493_v31  ;;  %13454 = vmatprep.subr.bf16.mxu1 %v16516_v15  ;;  %v16519_v31 = vpack.c.bf16 %v16517_v35, %v16518_v44  ;;  %v16529_v35 = vld [vmem:[#allocation8_spill] sm:$0xff] }
 0x9b3   : > { %7895 = vmatprep.mubr.f32.mxu0 %v16414_v28 }
 0x9b4   : > { %9128 = vmatmul.mubr.f32.gmra.mrb[8].mxu1 %v9127_v21 }
 0x9b5   : > { %9218 = vmatprep.mubr.f32.mxu1 %v16414_v28 }
 0x9b6   : > { %7897 = vmatmul.mubr.f32.gmra.mrb[8].mxu0 %v16497_v5  ;;  %v16520_v5 = vld [vmem:[#allocation32_spill] sm:$0xff] }
 0x9b8   : > { %9220 = vmatmul.mubr.f32.vlgmr.msra.gmra.mrb[6].mxu1 %v15916_v32 }
 0x9b9   : > { %13456 = vmatpush1.bf16.msra.mxu1 %v16519_v31  ;;  %9225 = vmatprep.mubr.f32.mxu1 %v16414_v28  ;;  %v16532_v31 = vld [vmem:[#allocation12_spill] sm:$0xff] }
 0x9ba   : > { %13458 = vmatprep.subr.bf16.mxu1 %v16510_v39 }
 0x9bc   : > { %9227 = vmatmul.mubr.f32.gmra.mrb[8].mxu1 %v15929_v14 }
 0x9bd   : > { %9305 = vmatprep.mubr.f32.mxu1 %v16414_v28 }
 0x9c0   : > { %9308 = vmatmul.mubr.f32.vlgmr.msra.gmra.mrb[6].mxu1 %v9113_v27  ;;  %v9666_v27 = vsub.f32 %v9591_v16, %v9665_v1  ;;  %v13094_v16 = vld [vmem:[%s16311_s6 + $0x58] sm:$0xff] }
 0x9c1   : > { %13460 = vmatpush1.bf16.msra.mxu1 %v16512_v33  ;;  %9313 = vmatprep.mubr.f32.mxu1 %v16414_v28 }
 0x9c2   : > { %13462 = vmatprep.subr.bf16.mxu1 %v16520_v5  ;;  %v13093_v5 = vld [vmem:[%s16311_s6 + $0x50] sm:$0xff] }
 0x9c4   : > { %9316 = vmatmul.mubr.f32.gmra.mrb[8].mxu1 %v9124_v50  ;;  %v9677_v50 = vsub.f32 %v9594_v52, %v15987_v62  ;;  %v10163_v52 = vsel %vm6225_vm10, %v13094_v16, 0 }
 0x9c5   : > { %9390 = vmatprep.mubr.f32.mxu1 %v16414_v28 }
 0x9c8   : > { %9394 = vmatmul.mubr.f32.vlgmr.msra.gmra.mrb[6].mxu1 %v9114_v19  ;;  %v9667_v19 = vand.u32 4294901760, %v9666_v27 }
 0x9c9   : > { %13464 = vmatpush1.bf16.msra.mxu1 %v16521_v46  ;;  %9399 = vmatprep.mubr.f32.mxu1 %v16414_v28  ;;  %v10160_v46 = vsel %vm6225_vm10, %v13093_v5, 0 }
 0x9ca   : > { %13466 = vmatprep.subr.bf16.mxu1 %v16510_v39  ;;  %v16522_v39 = vld [vmem:[#allocation9_spill] sm:$0xff]  ;;  %v9668_v26 = vsub.f32 %v9666_v27, %v9667_v19  ;;  %v10234_v6 = vand.u32 4294901760, %v10160_v46 }
 0x9cc   : > { %9403 = vmatmul.mubr.f32.gmra.mrb[8].mxu1 %v9125_v20  ;;  %v9678_v20 = vand.u32 4294901760, %v9677_v50  ;;  %v9669_v30 = vand.u32 4294901760, %v9668_v26 }
 0x9cd   : > { %9485 = vmatprep.mubr.f32.mxu1 %v16414_v28 }
 0x9ce   : > { %v9679_v21 = vsub.f32 %v9677_v50, %v9678_v20 }
 0x9d0   : > { %9487 = vmatmul.mubr.f32.vlgmr.msra.gmra.mrb[6].mxu1 %v15916_v32  ;;  %v9680_v2 = vand.u32 4294901760, %v9679_v21 }
 0x9d1   : > { %13468 = vmatpush1.bf16.msra.mxu1 %v16512_v33  ;;  %9492 = vmatprep.mubr.f32.mxu1 %v16414_v28  ;;  %v16524_v33 = vld [vmem:[#allocation14_spill] sm:$0xff] }
 0x9d2   : > { %13470 = vmatprep.subr.bf16.mxu1 %v16522_v39 }
 0x9d4   : > { %9494 = vmatmul.mubr.f32.gmra.mrb[8].mxu1 %v15929_v14 }
 0x9d5   : > { %9568 = vmatprep.mubr.f32.mxu1 %v16414_v28 }
 0x9d8   : > { %9570 = vmatmul.mubr.f32.vlgmr.msra.gmra.mrb[6].mxu1 %v15916_v32  ;;  %v16526_v32 = vld [vmem:[#allocation10_spill] sm:$0xff] }
 0x9d9   : > { %13472 = vmatpush1.bf16.msra.mxu1 %v16523_v34  ;;  %9575 = vmatprep.mubr.f32.mxu1 %v16414_v28  ;;  %v16528_v15 = vpack.c.bf16 %v16526_v32, %v16527_v18 }
 0x9da   : > { %13474 = vmatprep.subr.bf16.mxu1 %v16524_v33 }
 0x9dc   : > { %9577 = vmatmul.mubr.f32.gmra.mrb[8].mxu1 %v15929_v14  ;;  %v16530_v14 = vld [vmem:[#allocation5_spill] sm:$0xff] }
 0x9dd   : > { %9664 = vmatprep.mubr.f32.mxu1 %v16414_v28  ;;  %v16531_v44 = vpack.c.bf16 %v16529_v35, %v16530_v14 }
 0x9e0   : > { %9670 = vmatmul.mubr.f32.vlgmr.msra.gmra.mrb[6].mxu1 %v9669_v30  ;;  %v16535_v30 = vld [vmem:[#allocation30_spill] sm:$0xff] }
 0x9e1   : > { %13476 = vmatpush1.bf16.msra.mxu1 %v16525_v29  ;;  %9675 = vmatprep.mubr.f32.mxu1 %v16414_v28 }
 0x9e2   : > { %13478 = vmatprep.subr.bf16.mxu1 %v16528_v15  ;;  %v16538_v15 = vld [vmem:[#allocation34_spill] sm:$0xff] }
 0x9e4   : > { %9681 = vmatmul.mubr.f32.gmra.mrb[8].mxu1 %v9680_v2 }
 0x9e5   : > { %9771 = vmatprep.mubr.f32.mxu1 %v16414_v28 }
 0x9e8   : > { %9773 = vmatmul.mubr.f32.vlgmr.msra.gmra.mrb[6].mxu1 %v9665_v1 }
 0x9e9   : > { %13480 = vmatpush1.bf16.msra.mxu1 %v16531_v44  ;;  %9778 = vmatprep.mubr.f32.mxu1 %v16414_v28 }
 0x9ea   : > { %13482 = vmatprep.subr.bf16.mxu1 %v16522_v39 }
 0x9ec   : > { %9780 = vmatmul.mubr.f32.gmra.mrb[8].mxu1 %v15987_v62 }
 0x9ed   : > { %9858 = vmatprep.mubr.f32.mxu1 %v16414_v28 }
 0x9f0   : > { %9861 = vmatmul.mubr.f32.vlgmr.msra.gmra.mrb[6].mxu1 %v9666_v27  ;;  %v10235_v27 = vsub.f32 %v10160_v46, %v10234_v6 }
 0x9f1   : > { %13484 = vmatpush1.bf16.msra.mxu1 %v16523_v34  ;;  %9866 = vmatprep.mubr.f32.mxu1 %v16414_v28 }
 0x9f2   : > { %13486 = vmatprep.subr.bf16.mxu1 %v16532_v31  ;;  %v16539_v31 = vpack.c.bf16 %v15606_v47, %v15578_v45  ;;  %v16541_v45 = vld [vmem:[#allocation38_spill] sm:$0xff] }
 0x9f4   : > { %9869 = vmatmul.mubr.f32.gmra.mrb[8].mxu1 %v9677_v50  ;;  %v16534_v50 = vld [vmem:[#allocation35_spill] sm:$0xff] }
 0x9f5   : > { %9943 = vmatprep.mubr.f32.mxu1 %v16414_v28 }
 0x9f8   : > { %9947 = vmatmul.mubr.f32.vlgmr.msra.gmra.mrb[6].mxu1 %v9667_v19  ;;  %v16030_v19 = vand.u32 4294901760, %v10163_v52 }
 0x9f9   : > { %13488 = vmatpush1.bf16.msra.mxu1 %v16533_v22  ;;  %9952 = vmatprep.mubr.f32.mxu1 %v16414_v28 }
 0x9fa   : > { %13490 = vmatprep.subr.bf16.mxu1 %v16522_v39  ;;  %v10236_v39 = vand.u32 4294901760, %v10235_v27  ;;  %v10246_v26 = vsub.f32 %v10163_v52, %v16030_v19 }
 0x9fc   : > { %9956 = vmatmul.mubr.f32.gmra.mrb[8].mxu1 %v9678_v20  ;;  %v10237_v20 = vsub.f32 %v10235_v27, %v10236_v39  ;;  %v10247_v33 = vand.u32 4294901760, %v10246_v26 }
 0x9fd   : > { %10038 = vmatprep.mubr.f32.mxu1 %v16414_v28 }
 0x9fe   : > { %v10248_v21 = vsub.f32 %v10246_v26, %v10247_v33 }
 0xa00   : > { %10040 = vmatmul.mubr.f32.vlgmr.msra.gmra.mrb[6].mxu1 %v9665_v1  ;;  %v10249_v2 = vand.u32 4294901760, %v10248_v21 }
 0xa01   : > { %13492 = vmatpush1.bf16.msra.mxu1 %v16523_v34  ;;  %10045 = vmatprep.mubr.f32.mxu1 %v16414_v28  ;;  %v10238_v34 = vand.u32 4294901760, %v10237_v20 }
 0xa02   : > { %13494 = vmatprep.subr.bf16.mxu1 %v16534_v50 }
 0xa04   : > { %10047 = vmatmul.mubr.f32.gmra.mrb[8].mxu1 %v15987_v62 }
 0xa05   : > { %10121 = vmatprep.mubr.f32.mxu1 %v16414_v28 }
 0xa08   : > { %10123 = vmatmul.mubr.f32.vlgmr.msra.gmra.mrb[6].mxu1 %v9665_v1  ;;  %v16536_v1 = vpack.c.bf16 %v15580_v23, %v15436_v42 }
 0xa09   : > { %13496 = vmatpush1.bf16.msra.mxu1 %v16535_v30  ;;  %10128 = vmatprep.mubr.f32.mxu1 %v16414_v28 }
 0xa0a   : > { %13498 = vmatprep.subr.bf16.mxu1 %v15736_v53  ;;  %v16537_v53 = vpack.c.bf16 %v15508_v51, %v15381_v24  ;;  %v13095_v24 = vld [vmem:[%s16311_s6 + $0x60] sm:$0xff]  ;;  %v13096_v51 = vld [vmem:[%s16311_s6 + $0x68] sm:$0xff] }
 0xa0b   : > { %v10729_v42 = vsel %vm6225_vm10, %v13095_v24, 0  ;;  %v10732_v23 = vsel %vm6225_vm10, %v13096_v51, 0  ;;  %v16545_v51 = vld [vmem:[#allocation37_spill] sm:$0xff] }
 0xa0c   : > { %10130 = vmatmul.mubr.f32.gmra.mrb[8].mxu1 %v15987_v62  ;;  %v16072_v62 = vand.u32 4294901760, %v10732_v23 }
 0xa0d   : > { %10233 = vmatprep.mubr.f32.mxu1 %v16414_v28 }
 0xa0e   : > { %v10815_v29 = vsub.f32 %v10732_v23, %v16072_v62 }
 0xa10   : > { %10239 = vmatmul.mubr.f32.vlgmr.msra.gmra.mrb[6].mxu1 %v10238_v34  ;;  %v10816_v18 = vand.u32 4294901760, %v10815_v29 }
 0xa11   : > { %13500 = vmatpush1.bf16.msra.mxu1 %v15700_v54  ;;  %10244 = vmatprep.mubr.f32.mxu1 %v16414_v28  ;;  %v10803_v54 = vand.u32 4294901760, %v10729_v42 }
 0xa12   : > { %13502 = vmatprep.subr.bf16.mxu1 %v16536_v1  ;;  %v10817_v14 = vsub.f32 %v10815_v29, %v10816_v18 }
 0xa14   : > { %10250 = vmatmul.mubr.f32.gmra.mrb[8].mxu1 %v10249_v2  ;;  %v10818_v44 = vand.u32 4294901760, %v10817_v14 }
 0xa15   : > { %10340 = vmatprep.mubr.f32.mxu1 %v16414_v28 }
 0xa18   : > { %10342 = vmatmul.mubr.f32.vlgmr.msra.gmra.mrb[6].mxu1 %v10234_v6 }
 0xa19   : > { %13504 = vmatpush1.bf16.msra.mxu1 %v16537_v53  ;;  %10347 = vmatprep.mubr.f32.mxu1 %v16414_v28 }
 0xa1a   : > { %13506 = vmatprep.subr.bf16.mxu1 %v16534_v50 }
 0xa1c   : > { %10349 = vmatmul.mubr.f32.gmra.mrb[8].mxu1 %v16030_v19 }
 0xa1d   : > { %10427 = vmatprep.mubr.f32.mxu1 %v16414_v28 }
 0xa20   : > { %10430 = vmatmul.mubr.f32.vlgmr.msra.gmra.mrb[6].mxu1 %v10235_v27 }
 0xa21   : > { %13508 = vmatpush1.bf16.msra.mxu1 %v16535_v30  ;;  %10435 = vmatprep.mubr.f32.mxu1 %v16414_v28 }
 0xa22   : > { %13510 = vmatprep.subr.bf16.mxu1 %v15702_v49  ;;  %v10804_v49 = vsub.f32 %v10729_v42, %v10803_v54 }
 0xa24   : > { %10438 = vmatmul.mubr.f32.gmra.mrb[8].mxu1 %v10246_v26 }
 0xa25   : > { %10512 = vmatprep.mubr.f32.mxu1 %v16414_v28 }
 0xa28   : > { %10516 = vmatmul.mubr.f32.vlgmr.msra.gmra.mrb[6].mxu1 %v10236_v39 }
 0xa29   : > { %13512 = vmatpush1.bf16.msra.mxu1 %v15718_v0  ;;  %10521 = vmatprep.mubr.f32.mxu1 %v16414_v28  ;;  %v10805_v0 = vand.u32 4294901760, %v10804_v49 }
 0xa2a   : > { %13514 = vmatprep.subr.bf16.mxu1 %v16534_v50  ;;  %v16544_v50 = vld [vmem:[#allocation36_spill] sm:$0xff] }
 0xa2b   : > { %v10806_v32 = vsub.f32 %v10804_v49, %v10805_v0 }
 0xa2c   : > { %10525 = vmatmul.mubr.f32.gmra.mrb[8].mxu1 %v10247_v33 }
 0xa2d   : > { %10607 = vmatprep.mubr.f32.mxu1 %v16414_v28  ;;  %v10807_v35 = vand.u32 4294901760, %v10806_v32 }
 0xa30   : > { %10609 = vmatmul.mubr.f32.vlgmr.msra.gmra.mrb[6].mxu1 %v10234_v6 }
 0xa31   : > { %13516 = vmatpush1.bf16.msra.mxu1 %v16535_v30  ;;  %10614 = vmatprep.mubr.f32.mxu1 %v16414_v28  ;;  %v13100_v30 = vld [vmem:[%s16311_s6 + $0x88] sm:$0xff] }
 0xa32   : > { %13518 = vmatprep.subr.bf16.mxu1 %v15724_v60  ;;  %v11870_v21 = vsel %vm6225_vm10, %v13100_v30, 0 }
 0xa33   : > { %v16178_v2 = vand.u32 4294901760, %v11870_v21 }
 0xa34   : > { %10616 = vmatmul.mubr.f32.gmra.mrb[8].mxu1 %v16030_v19 }
 0xa35   : > { %10690 = vmatprep.mubr.f32.mxu1 %v16414_v28  ;;  %v11953_v53 = vsub.f32 %v11870_v21, %v16178_v2 }
 0xa37   : > { %v11954_v42 = vand.u32 4294901760, %v11953_v53 }
 0xa38   : > { %10692 = vmatmul.mubr.f32.vlgmr.msra.gmra.mrb[6].mxu1 %v10234_v6 }
 0xa39   : > { %13520 = vmatpush1.bf16.msra.mxu1 %v16538_v15  ;;  %10697 = vmatprep.mubr.f32.mxu1 %v16414_v28  ;;  %v11955_v23 = vsub.f32 %v11953_v53, %v11954_v42 }
 0xa3a   : > { %13522 = vmatprep.subr.bf16.mxu1 %v15794_v7  ;;  %v16540_v7 = vpack.c.bf16 %v15552_v58, %v15504_v3  ;;  %v13097_v3 = vld [vmem:[%s16311_s6 + $0x70] sm:$0xff] }
 0xa3b   : > { %v16542_v58 = vld [vmem:[#allocation39_spill] sm:$0xff]  ;;  %v11298_v47 = vsel %vm6225_vm10, %v13097_v3, 0 }
 0xa3c   : > { %10699 = vmatmul.mubr.f32.gmra.mrb[8].mxu1 %v16030_v19  ;;  %v16112_v5 = vand.u32 4294901760, %v11298_v47 }
 0xa3d   : > { %10802 = vmatprep.mubr.f32.mxu1 %v16414_v28 }
 0xa3e   : > { %v11373_v46 = vsub.f32 %v11298_v47, %v16112_v5 }
 0xa40   : > { %10808 = vmatmul.mubr.f32.vlgmr.msra.gmra.mrb[6].mxu1 %v10807_v35  ;;  %v11374_v6 = vand.u32 4294901760, %v11373_v46 }
 0xa41   : > { %13524 = vmatpush1.bf16.msra.mxu1 %v15759_v41  ;;  %10813 = vmatprep.mubr.f32.mxu1 %v16414_v28  ;;  %v13098_v41 = vld [vmem:[%s16311_s6 + $0x78] sm:$0xff] }
 0xa42   : > { %13526 = vmatprep.subr.bf16.mxu1 %v16539_v31  ;;  %v11301_v22 = vsel %vm6225_vm10, %v13098_v41, 0  ;;  %v11375_v27 = vsub.f32 %v11373_v46, %v11374_v6 }
 0xa43   : > { %v16117_v16 = vand.u32 4294901760, %v11301_v22 }
 0xa44   : > { %10819 = vmatmul.mubr.f32.gmra.mrb[8].mxu1 %v10818_v44  ;;  %v11376_v39 = vand.u32 4294901760, %v11375_v27 }
 0xa45   : > { %10909 = vmatprep.mubr.f32.mxu1 %v16414_v28  ;;  %v11384_v52 = vsub.f32 %v11301_v22, %v16117_v16 }
 0xa47   : > { %v11385_v19 = vand.u32 4294901760, %v11384_v52 }
 0xa48   : > { %10911 = vmatmul.mubr.f32.vlgmr.msra.gmra.mrb[6].mxu1 %v10803_v54 }
 0xa49   : > { %13528 = vmatpush1.bf16.msra.mxu1 %v16540_v7  ;;  %10916 = vmatprep.mubr.f32.mxu1 %v16414_v28  ;;  %v11386_v26 = vsub.f32 %v11384_v52, %v11385_v19 }
 0xa4a   : > { %13530 = vmatprep.subr.bf16.mxu1 %v15724_v60 }
 0xa4b   : > { %v11387_v20 = vand.u32 4294901760, %v11386_v26 }
 0xa4c   : > { %10918 = vmatmul.mubr.f32.gmra.mrb[8].mxu1 %v16072_v62 }
 0xa4d   : > { %10996 = vmatprep.mubr.f32.mxu1 %v16414_v28 }
 0xa50   : > { %10999 = vmatmul.mubr.f32.vlgmr.msra.gmra.mrb[6].mxu1 %v10804_v49  ;;  %v11956_v49 = vand.u32 4294901760, %v11955_v23 }
 0xa51   : > { %13532 = vmatpush1.bf16.msra.mxu1 %v16538_v15  ;;  %11004 = vmatprep.mubr.f32.mxu1 %v16414_v28 }
 0xa52   : > { %13534 = vmatprep.subr.bf16.mxu1 %v16541_v45 }
 0xa54   : > { %11007 = vmatmul.mubr.f32.gmra.mrb[8].mxu1 %v10815_v29 }
 0xa55   : > { %11081 = vmatprep.mubr.f32.mxu1 %v16414_v28 }
 0xa58   : > { %11085 = vmatmul.mubr.f32.vlgmr.msra.gmra.mrb[6].mxu1 %v10805_v0 }
 0xa59   : > { %13536 = vmatpush1.bf16.msra.mxu1 %v16542_v58  ;;  %11090 = vmatprep.mubr.f32.mxu1 %v16414_v28 }
 0xa5a   : > { %13538 = vmatprep.subr.bf16.mxu1 %v15724_v60  ;;  %v16543_v60 = vld [vmem:[#allocation40_spill] sm:$0xff] }
 0xa5c   : > { %11094 = vmatmul.mubr.f32.gmra.mrb[8].mxu1 %v10816_v18 }
 0xa5d   : > { %11176 = vmatprep.mubr.f32.mxu1 %v16414_v28 }
 0xa60   : > { %11178 = vmatmul.mubr.f32.vlgmr.msra.gmra.mrb[6].mxu1 %v10803_v54 }
 0xa61   : > { %13540 = vmatpush1.bf16.msra.mxu1 %v16538_v15  ;;  %11183 = vmatprep.mubr.f32.mxu1 %v16414_v28 }
 0xa62   : > { %13542 = vmatprep.subr.bf16.mxu1 %v16543_v60 }
 0xa64   : > { %11185 = vmatmul.mubr.f32.gmra.mrb[8].mxu1 %v16072_v62 }
 0xa65   : > { %11259 = vmatprep.mubr.f32.mxu1 %v16414_v28 }
 0xa68   : > { %11261 = vmatmul.mubr.f32.vlgmr.msra.gmra.mrb[6].mxu1 %v10803_v54 }
 0xa69   : > { %13544 = vmatpush1.bf16.msra.mxu1 %v16544_v50  ;;  %11266 = vmatprep.mubr.f32.mxu1 %v16414_v28 }
 0xa6a   : > { %13546 = vmatprep.subr.bf16.mxu1 %v15848_v4 }
 0xa6c   : > { %11268 = vmatmul.mubr.f32.gmra.mrb[8].mxu1 %v16072_v62 }
 0xa6d   : > { %11371 = vmatprep.mubr.f32.mxu1 %v16414_v28 }
 0xa70   : > { %11377 = vmatmul.mubr.f32.vlgmr.msra.gmra.mrb[6].mxu1 %v11376_v39 }
 0xa71   : > { %13548 = vmatpush1.bf16.msra.mxu1 %v15825_v36  ;;  %11382 = vmatprep.mubr.f32.mxu1 %v16414_v28  ;;  %v14272_v36 = vmov 5  }
 0xa72   : > { %13550 = vmatprep.subr.bf16.mxu1 %v13549_v25  ;;  %14152 = vset.pattern.permute.xlu1 %v14272_v36 }
 0xa73   : > { %12421 = vperm.xlu1 %14152, %v14188_v55   ;;  %14151 = vset.pattern.permute.xlu0 %v14272_v36 }
 0xa74   : > { %11388 = vmatmul.mubr.f32.gmra.mrb[8].mxu1 %v11387_v20  ;;  %12417 = vperm.xlu0 %14151, %v14189_v9  }
 0xa75   : > { %11478 = vmatprep.mubr.f32.mxu1 %v16414_v28 }
 0xa77   : > { %14153 = vset.pattern.permute.xlu1 %v14273_v11 }
 0xa78   : > { %11480 = vmatmul.mubr.f32.vlgmr.msra.gmra.mrb[6].mxu1 %v16112_v5  ;;  %12429 = vperm.xlu1 %14153, %v14189_v9  }
 0xa79   : > { %13552 = vmatpush1.bf16.msra.mxu1 %v13551_v38  ;;  %11485 = vmatprep.mubr.f32.mxu1 %v16414_v28  ;;  %v13099_v38 = vld [vmem:[%s16311_s6 + $0x80] sm:$0xff] }
 0xa7a   : > { %13554 = vmatprep.subr.bf16.mxu1 %v16543_v60  ;;  %14154 = vset.pattern.permute.xlu0 %v14273_v11  ;;  %v11867_v33 = vsel %vm6225_vm10, %v13099_v38, 0 }
 0xa7b   : > { %12433 = vperm.xlu0 %14154, %v14188_v55   ;;  %v16172_v34 = vand.u32 4294901760, %v11867_v33 }
 0xa7c   : > { %11487 = vmatmul.mubr.f32.gmra.mrb[8].mxu1 %v16117_v16 }
 0xa7d   : > { %11565 = vmatprep.mubr.f32.mxu1 %v16414_v28 }
 0xa80   : > { %11568 = vmatmul.mubr.f32.vlgmr.msra.gmra.mrb[6].mxu1 %v11373_v46 }
 0xa81   : > { %13556 = vmatpush1.bf16.msra.mxu1 %v16544_v50  ;;  %11573 = vmatprep.mubr.f32.mxu1 %v16414_v28 }
 0xa82   : > { %13558 = vmatprep.subr.bf16.mxu1 %v15827_v12 }
 0xa84   : > { %11576 = vmatmul.mubr.f32.gmra.mrb[8].mxu1 %v11384_v52 }
 0xa85   : > { %v16153_v48 = vpop.f32.mrb[6].mxu0  ;;  %11650 = vmatprep.mubr.f32.mxu1 %v16414_v28 }
 0xa86   : > { %v16155_v25 = vpop.f32.mrb[7].mxu0 }
 0xa88   : > { %11654 = vmatmul.mubr.f32.vlgmr.msra.gmra.mrb[6].mxu1 %v11374_v6 }
 0xa89   : > { %v16161_v4 = vpop.f32.mrb[8].mxu0  ;;  %13560 = vmatpush1.bf16.msra.mxu1 %v15833_v57  ;;  %11659 = vmatprep.mubr.f32.mxu1 %v16414_v28  ;;  %v11942_v57 = vsub.f32 %v11867_v33, %v16172_v34 }
 0xa8a   : > { %v16163_v12 = vpop.f32.mrb[9].mxu0  ;;  %13562 = vmatprep.subr.bf16.mxu1 %v16543_v60 }
 0xa8b   : > { %v11943_v1 = vand.u32 4294901760, %v11942_v57 }
 0xa8c   : > { %11663 = vmatmul.mubr.f32.gmra.mrb[8].mxu1 %v11385_v19 }
 0xa8d   : > { %11745 = vmatprep.mubr.f32.mxu1 %v16414_v28  ;;  %v11944_v24 = vsub.f32 %v11942_v57, %v11943_v1 }
 0xa8f   : > { %v11945_v54 = vand.u32 4294901760, %v11944_v24 }
 0xa90   : > { %11747 = vmatmul.mubr.f32.vlgmr.msra.gmra.mrb[6].mxu1 %v16112_v5 }
 0xa91   : > { %13564 = vmatpush1.bf16.msra.mxu1 %v16544_v50  ;;  %11752 = vmatprep.mubr.f32.mxu1 %v16414_v28 }
 0xa92   : > { %13566 = vmatprep.subr.bf16.mxu1 %v15843_v61 }
 0xa94   : > { %11754 = vmatmul.mubr.f32.gmra.mrb[8].mxu1 %v16117_v16 }
 0xa95   : > { %11828 = vmatprep.mubr.f32.mxu1 %v16414_v28 }
 0xa98   : > { %11830 = vmatmul.mubr.f32.vlgmr.msra.gmra.mrb[6].mxu1 %v16112_v5 }
 0xa99   : > { %13568 = vmatpush1.bf16.msra.mxu1 %v16545_v51  ;;  %11835 = vmatprep.mubr.f32.mxu1 %v16414_v28 }
 0xa9a   : > { %13570 = vmatprep.subr.bf16.mxu1 %v15881_v63 }
 0xa9c   : > { %11837 = vmatmul.mubr.f32.gmra.mrb[8].mxu1 %v16117_v16 }
 0xa9d   : > { %11940 = vmatprep.mubr.f32.mxu1 %v16414_v28 }
 0xaa0   : > { %11946 = vmatmul.mubr.f32.vlgmr.msra.gmra.mrb[6].mxu1 %v11945_v54 }
 0xaa1   : > { %13572 = vmatpush1.bf16.msra.mxu1 %v15867_v40  ;;  %11951 = vmatprep.mubr.f32.mxu1 %v16414_v28  ;;  %v12509_v40 = vand.u32 4294901760, %v12437_v56 }
 0xaa2   : > { %13574 = vmatprep.subr.bf16.mxu1 %v13573_v10  ;;  %v357_v10 = vld [vmem:[%s16312_s7 + $0x8] sm:$0xff] }
 0xaa3   : > { %v12510_v0 = vsub.f32 %v12437_v56, %v12509_v40 }
 0xaa4   : > { %11957 = vmatmul.mubr.f32.gmra.mrb[8].mxu1 %v11956_v49 }
 0xaa5   : > { %12047 = vmatprep.mubr.f32.mxu1 %v16414_v28  ;;  %v12511_v18 = vand.u32 4294901760, %v12510_v0 }
 0xaa7   : > { %v12512_v44 = vsub.f32 %v12510_v0, %v12511_v18 }
 0xaa8   : > { %12049 = vmatmul.mubr.f32.vlgmr.msra.gmra.mrb[6].mxu1 %v16172_v34 }
 0xaa9   : > { %13576 = vmatpush1.bf16.msra.mxu1 %v13575_v43  ;;  %12054 = vmatprep.mubr.f32.mxu1 %v16414_v28  ;;  %v12532_v43 = vsub.f32 %v14190_v8, %v16211_v13  ;;  %v12513_v45 = vand.u32 4294901760, %v12512_v44 }
 0xaaa   : > { %13578 = vmatprep.subr.bf16.mxu1 %v15843_v61 }
 0xaab   : > { %v12533_v62 = vand.u32 4294901760, %v12532_v43 }
 0xaac   : > { %12056 = vmatmul.mubr.f32.gmra.mrb[8].mxu1 %v16178_v2 }
 0xaad   : > { %12134 = vmatprep.mubr.f32.mxu1 %v16414_v28  ;;  %v12534_v32 = vsub.f32 %v12532_v43, %v12533_v62 }
 0xaaf   : > { %v12535_v14 = vand.u32 4294901760, %v12534_v32 }
 0xab0   : > { %12137 = vmatmul.mubr.f32.vlgmr.msra.gmra.mrb[6].mxu1 %v11942_v57 }
 0xab1   : > { %13580 = vmatpush1.bf16.msra.mxu1 %v16545_v51  ;;  %12142 = vmatprep.mubr.f32.mxu1 %v16414_v28 }
 0xab2   : > { %13582 = vmatprep.subr.bf16.mxu1 %v15869_v37  ;;  %v14191_v37 = vld [vmem:[%s14384_s25] sm:$0xff]  ;;  %s338_s25 = sand.u32 1, %s14246_s10  }
 0xab3   : > { %v12444_v63 = vand.u32 4294901760, %v14191_v37  ;;  %s13056_s16 = sshll.u32 %s338_s25, 5  ;;  %s16263_s21 = scalar_lea.sflag [#allocation3], %s338_s25 }
 0xab4   : > { %12145 = vmatmul.mubr.f32.gmra.mrb[8].mxu1 %v11953_v53  ;;  %s340_s17 = scalar_lea.vmem [#allocation2], %s13056_s16  ;;  %s14198_s16 = scalar_lea.vmem %s14197_s29, 1024 }
 0xab5   : > { %12219 = vmatprep.mubr.f32.mxu1 %v16414_v28  ;;  %s12978_s26 = sshll.u32 %s340_s17, 4  ;;  %s16256_s26 = int_to_ptr.vmem [resolvable:$true] %s12978_s26 }
 0xab6   : > { %s14192_s13 = scalar_lea.vmem %s16256_s26, 512  ;;  %p14199_p0 = scmp.lt.s32.totalorder %s16256_s26, %s14197_s29 }
 0xab7   : > { %p14193_p11 = scmp.ne.s32.totalorder %s16256_s26, %s14192_s13  ;;  %p14200_p1 = scmp.lt.s32.totalorder %s14198_s16, %s14192_s13 }
 0xab8   : > { %12223 = vmatmul.mubr.f32.vlgmr.msra.gmra.mrb[6].mxu1 %v11943_v1 }
 0xab9   : > { %13584 = vmatpush1.bf16.msra.mxu1 %v15861_v59  ;;  %12228 = vmatprep.mubr.f32.mxu1 %v16414_v28  ;;  %v12440_v59 = vsel %vm372_vm1, %v357_v10, 0  ;;  %p14194_p12 = pnand %p14193_p11, %p14364_p5  ;;  %p14201_p2 = por %p14200_p1, %p14199_p0 }
 0xaba   : > { %13586 = vmatprep.subr.bf16.mxu1 %v15843_v61  ;;  %v12520_v29 = vand.u32 4294901760, %v12440_v59  ;;  %v12538_v61 = vsub.f32 %v14191_v37, %v12444_v63 }
 0xabb   : > { %p14195_p13 = pneg %p14194_p12 }
 0xabc   : > { %12232 = vmatmul.mubr.f32.gmra.mrb[8].mxu1 %v11954_v42  ;;  %v12521_v15 = vsub.f32 %v12440_v59, %v12520_v29  ;;  %v12539_v35 = vand.u32 4294901760, %v12538_v61 }
 0xabd   : > { %12314 = vmatprep.mubr.f32.mxu1 %v16414_v28  ;;  %p14202_p3 = pnand %p14201_p2, %p14195_p13 }
 0xabe   : > { %v12522_v31 = vand.u32 4294901760, %v12521_v15  ;;  %v12540_v7 = vsub.f32 %v12538_v61, %v12539_v35 }
 0xac0   : > { %12316 = vmatmul.mubr.f32.vlgmr.msra.gmra.mrb[6].mxu1 %v16172_v34  ;;  %v12523_v3 = vsub.f32 %v12521_v15, %v12522_v31  ;;  %v12541_v58 = vand.u32 4294901760, %v12540_v7 }
 0xac1   : > { %13588 = vmatpush1.bf16.msra.mxu1 %v16545_v51  ;;  %12321 = vmatprep.mubr.f32.mxu1 %v16414_v28 }
 0xac2   : > { %12443 = vmatprep.subr.mxu1 %v16211_v13  ;;  %v12524_v47 = vand.u32 4294901760, %v12523_v3 }
 0xac4   : > { %12323 = vmatmul.mubr.f32.gmra.mrb[8].mxu1 %v16178_v2 }
 0xac5   : > { %12397 = vmatprep.mubr.f32.mxu1 %v16414_v28 }
 0xac8   : > { %12399 = vmatmul.mubr.f32.vlgmr.msra.gmra.mrb[6].mxu1 %v16172_v34 }
 0xac9   : > { %12404 = vmatprep.mubr.f32.mxu1 %v16414_v28  ;;  %12445 = vmatpush1.msra.mxu1 %v12444_v63 }
 0xaca   : > { %12536 = vmatprep.subr.mxu1 %v12535_v14 }
 0xacc   : > { %12406 = vmatmul.mubr.f32.gmra.mrb[8].mxu1 %v16178_v2 }
 0xacd   : > { %12508 = vmatprep.mubr.f32.mxu1 %v16414_v28 }
 0xad0   : > { %12514 = vmatmul.mubr.f32.vlgmr.msra.gmra.mrb[6].mxu1 %v12513_v45 }
 0xad1   : > { %12519 = vmatprep.mubr.f32.mxu1 %v16414_v28  ;;  %12542 = vmatpush1.msra.mxu1 %v12541_v58 }
 0xad2   : > { %12622 = vmatprep.subr.mxu1 %v12532_v43 }
 0xad4   : > { %12525 = vmatmul.mubr.f32.gmra.mrb[8].mxu1 %v12524_v47 }
 0xad5   : > { %12605 = vmatprep.mubr.f32.mxu1 %v16414_v28 }
 0xad8   : > { %12607 = vmatmul.mubr.f32.vlgmr.msra.gmra.mrb[6].mxu1 %v12509_v40 }
 0xad9   : > { %12612 = vmatprep.mubr.f32.mxu1 %v16414_v28  ;;  %12625 = vmatpush1.msra.mxu1 %v12538_v61 }
 0xada   : > { %12706 = vmatprep.subr.mxu1 %v16211_v13 }
 0xadc   : > { %12614 = vmatmul.mubr.f32.gmra.mrb[8].mxu1 %v12520_v29 }
 0xadd   : > { %12688 = vmatprep.mubr.f32.mxu1 %v16414_v28 }
 0xae0   : > { %12691 = vmatmul.mubr.f32.vlgmr.msra.gmra.mrb[6].mxu1 %v12510_v0 }
 0xae1   : > { %12696 = vmatprep.mubr.f32.mxu1 %v16414_v28  ;;  %12708 = vmatpush1.msra.mxu1 %v12444_v63 }
 0xae2   : > { %12793 = vmatprep.subr.mxu1 %v12533_v62 }
 0xae4   : > { %12699 = vmatmul.mubr.f32.gmra.mrb[8].mxu1 %v12521_v15 }
 0xae5   : > { %12771 = vmatprep.mubr.f32.mxu1 %v16414_v28 }
 0xae8   : > { %12775 = vmatmul.mubr.f32.vlgmr.msra.gmra.mrb[6].mxu1 %v12511_v18 }
 0xae9   : > { %12780 = vmatprep.mubr.f32.mxu1 %v16414_v28  ;;  %12797 = vmatpush1.msra.mxu1 %v12539_v35 }
 0xaea   : > { %12876 = vmatprep.subr.mxu1 %v16211_v13 }
 0xaec   : > { %12784 = vmatmul.mubr.f32.gmra.mrb[8].mxu1 %v12522_v31 }
 0xaed   : > { %12860 = vmatprep.mubr.f32.mxu1 %v16414_v28 }
 0xaf0   : > { %12862 = vmatmul.mubr.f32.vlgmr.msra.gmra.mrb[6].mxu1 %v12509_v40 }
 0xaf1   : > { %12867 = vmatprep.mubr.f32.mxu1 %v16414_v28  ;;  %12878 = vmatpush1.msra.mxu1 %v12444_v63 }
 0xaf2   : > { %v12422_v41 = vpop.permute.xlu1 %12421 }
 0xaf3   : > { %v12418_v5 = vpop.permute.xlu0 %12417  ;;  %v13595_v6 = vadd.f32 %v12422_v41, %v16161_v4  ;;  %v13598_v27 = vadd.f32 %v12422_v41, %v16163_v12 }
 0xaf4   : > { %12869 = vmatmul.mubr.f32.gmra.mrb[8].mxu1 %v12520_v29  ;;  %v13589_v22 = vadd.f32 %v12418_v5, %v16153_v48  ;;  %v13592_v46 = vadd.f32 %v12418_v5, %v16155_v25 }
 0xaf5   : > { %12941 = vmatprep.mubr.f32.mxu1 %v16414_v28 }
 0xaf7   : > { %v12430_v16 = vpop.permute.xlu1 %12429 }
 0xaf8   : > { %12943 = vmatmul.mubr.f32.vlgmr.msra.gmra.mrb[6].mxu1 %v12509_v40  ;;  %v13590_v60 = vadd.f32 %v13589_v22, %v12430_v16  ;;  %v13593_v52 = vadd.f32 %v13592_v46, %v12430_v16 }
 0xaf9   : > { %12948 = vmatprep.mubr.f32.mxu1 %v16414_v28 }
 0xafa   : > { %v12434_v19 = vpop.permute.xlu0 %12433 }
 0xafb   : > { %v13596_v20 = vadd.f32 %v13595_v6, %v12434_v19  ;;  %v13599_v36 = vadd.f32 %v13598_v27, %v12434_v19 }
 0xafc   : > { %12950 = vmatmul.mubr.f32.gmra.mrb[8].mxu1 %v12520_v29 }
 0xbcb   : > { %v12944_v50 = vpop.f32.mrb[6].mxu1 }
 0xbcc   : > { %v13591_v28 = vadd.f32 %v13590_v60, %v12944_v50  ;;  %v12946_v39 = vpop.f32.mrb[7].mxu1 }
 0xbcd   : > { %v13594_v26 = vadd.f32 %v13593_v52, %v12946_v39 }
 0xbce   : > { %12960 = vst [vmem:[%s340_s17] sm:$0xff] %v13591_v28 }
 0xbcf   : > { %12961 = vst [vmem:[%s340_s17 + $0x8] sm:$0xff] %v13594_v26  ;;  %v12951_v55 = vpop.f32.mrb[8].mxu1 }
 0xbd0   : > { %v13597_v9 = vadd.f32 %v13596_v20, %v12951_v55  ;;  %v12953_v11 = vpop.f32.mrb[9].mxu1 }
 0xbd1   : > { %v13600_v48 = vadd.f32 %v13599_v36, %v12953_v11 }
 0xbd2   : > { %12962 = vst [vmem:[%s340_s17 + $0x10] sm:$0xff] %v13597_v9 }
 0xbd3   : > { %12963 = vst [vmem:[%s340_s17 + $0x18] sm:$0xff] %v13600_v48 }
 0xbd4   : > { %14205 = shalt.err (!%p14202_p3)
}
 0xbd5   : > { %s14206_s25 = scalar_lea.hbm %s16261_s28, 512  ;;  %s14210_s24 = scalar_lea.hbm %s16314_s9, 1024 }
 0xbd6   : > { %p14207_p4 = scmp.ne.s32.totalorder %s16261_s28, %s14206_s25  ;;  %p14211_p9 = scmp.lt.u32.totalorder %s16261_s28, %s16314_s9 }
 0xbd7   : > { %p14212_p10 = scmp.lt.u32.totalorder %s14210_s24, %s14206_s25  ;;  %p14214_p12 = scmp.lt.u32.totalorder %s14206_s25, %s16261_s28 }
 0xbd8   : > { %p14208_p7 = pnand %p14207_p4, %p14364_p5 }
 0xbd9   : > { %p14213_p11 = por %p14212_p10, %p14211_p9 }
 0xbda   : > { %p14209_p8 = pneg %p14208_p7 }
 0xbdb   : > { %p14215_p13 = por %p14214_p12, %p14213_p11 }
 0xbdd   : > { %p14216_p0 = pnand %p14215_p13, %p14209_p8 }
 0xbdf   : > { %14219 = shalt.err (!%p14216_p0)
}
 0xbe0   : > { %s14275_s13 = smov 256  }
 0xbe1   : > { %14085 = dma.vmem_to_hbm [thread:$0]  (%p14364_p5), %s16256_s26, 512, %s16261_s28, %s16263_s21, %s14275_s13, %s14275_s13, %s16403_s23  }
 0xbe2 PF: > { %p14091_p1 = scmp.ge.s32.totalorder %s14254_s12, 2  ;;  %s12993_s29 = sand.u32 1, %s14242_s30  }
 0xbe3   : > { %s12994_s16 = scalar_lea.sflag [#allocation3], %s12993_s29 }
 0xbe4   : > { %p14088_p2 = pnand %p14091_p1, %p14368_p6 }
 0xbe6   : > { %14237 = dma.done.wait (!%p14088_p2), %s12994_s16, 512  }
 0xbe7   : > { %14239 = vsyncadd (!%p14088_p2), %s12994_s16, 4294966784  ;;  %p19_p3 = scmp.ge.s32.totalorder %s14351_s15, 4   ;;  %s16546_s30 = smov %s14246_s10 }
 0xbe8   : > { %s16547_s10 = smov %s14250_s11  ;;  %s16548_s11 = smov %s14362_s18 }
 0xbe9   : > { %s16549_s12 = smov %s14351_s15  ;;  %21 = sbr.rel (!%p19_p3) target bundleno = 3 (0x3), region = 110 }
 0xbf0   :  { %12999 = vsyncpa [#allocation3], 1 }
 0xbf1   :  { %13001 = vsyncpa [#allocation3 + $0x1], 1 }

</bundles_post_ra>
